<compile_context>
chip_gen: v7x
topology: tpu7x:2x2x1
jax: 0.10.0
libtpu: 0.0.40
codegen_flags: <defaults>
</compile_context>

<pallas_src>
import functools

import jax
import jax.numpy as jnp
from jax import lax
from jax.experimental import pallas as pl
from jax.experimental.pallas import tpu as pltpu


def _round_up(x, m):
    return (x + m - 1) // m * m


# ------------------------- generic row-tiled matmul(+bias, +relu) kernel -------------------------

def _mm_kernel(x_ref, w_ref, b_ref, o_ref, *, relu_in, relu_out):
    x = x_ref[...]
    if relu_in:
        x = jnp.maximum(x, 0.0)
    y = jnp.dot(x, w_ref[...], preferred_element_type=jnp.float32) + b_ref[...]
    if relu_out:
        y = jnp.maximum(y, 0.0)
    o_ref[...] = y.astype(o_ref.dtype)


def tiled_matmul_bias(x, w, b, *, relu_in=False, relu_out=False,
                      tile_m=512, compute_dtype=None):
    """out = maybe_relu( maybe_relu(x) @ w + b ), tiled over rows (M).

    Rows are zero-padded to a multiple of the M tile so every block is full; the weight and
    bias use a constant index_map so they stay resident in VMEM across the row tiles."""
    M, K = x.shape
    N = w.shape[1]
    if compute_dtype is not None:          # bf16 operands, f32 MXU accumulation
        x = x.astype(compute_dtype)
        w = w.astype(compute_dtype)
    tm = min(tile_m, _round_up(M, 8))      # second-to-last block dim must be a multiple of 8
    Mp = _round_up(M, tm)
    if Mp != M:
        x = jnp.pad(x, ((0, Mp - M), (0, 0)))

    out = pl.pallas_call(
        functools.partial(_mm_kernel, relu_in=relu_in, relu_out=relu_out),
        out_shape=jax.ShapeDtypeStruct((Mp, N), jnp.float32),
        grid_spec=pltpu.PrefetchScalarGridSpec(
            num_scalar_prefetch=0,
            grid=(Mp // tm,),
            in_specs=[
                pl.BlockSpec((tm, K), lambda i: (i, 0)),
                pl.BlockSpec((K, N), lambda i: (0, 0)),
                pl.BlockSpec((1, N), lambda i: (0, 0)),
            ],
            out_specs=pl.BlockSpec((tm, N), lambda i: (i, 0)),
        ),
        compiler_params=pltpu.CompilerParams(
            dimension_semantics=("parallel",)),
    )(x, w, b.reshape(1, N).astype(jnp.float32))
    return out[:M]


# ------------------------- LSTM recurrence kernel (timestep-blocked) -------------------------

def lstm_seq_kernel(gx_ref, keep_ref, whh_ref, h_out_ref, h_sc, c_sc, *, t_blk):
    """One grid step = t_blk time steps. gx already contains fx@w_ih + bias; only the
    (H,4H) recurrent matmul and the gate nonlinearities run inside the sequential loop.
    h/c persist in VMEM scratch across the (sequential) grid."""
    @pl.when(pl.program_id(0) == 0)
    def _():
        h_sc[...] = jnp.zeros_like(h_sc)
        c_sc[...] = jnp.zeros_like(c_sc)

    bp, hs = h_sc.shape
    # lane mask selecting the "g" gate columns [2H, 3H) -> tanh; everything else -> sigmoid.
    lane = lax.broadcasted_iota(jnp.int32, (bp, 4 * hs), 1)
    g_mask = jnp.logical_and(lane >= 2 * hs, lane < 3 * hs)
    whh = whh_ref[...]                       # (H, 4H), resident

    def step(t, carry):
        h, c = carry
        gates = gx_ref[t] + jnp.dot(h, whh, preferred_element_type=jnp.float32)  # (B, 4H)
        # single full-tile tanh on the EUP; sigmoid lanes via sigmoid(x) = 0.5*tanh(x/2)+0.5
        th = jnp.tanh(jnp.where(g_mask, gates, 0.5 * gates))
        act = jnp.where(g_mask, th, 0.5 * th + 0.5)
        i_g = act[:, 0 * hs:1 * hs]
        f_g = act[:, 1 * hs:2 * hs]
        g_g = act[:, 2 * hs:3 * hs]
        o_g = act[:, 3 * hs:4 * hs]
        c_new = f_g * c + i_g * g_g
        h_new = o_g * jnp.tanh(c_new)
        h_out_ref[t] = h_new                  # UNmasked h feeds the dense head (matches PyTorch)
        m = keep_ref[t]                       # (B, 1) = 1 - done  — partial_reset AFTER output
        return h_new * m, c_new * m

    h, c = lax.fori_loop(0, t_blk, step, (h_sc[...], c_sc[...]), unroll=True)
    h_sc[...] = h
    c_sc[...] = c


def lstm_recurrence(gx_sbg, keep_sb1, w_hh, t_blk):
    Sp, Bp, G = gx_sbg.shape
    hs = w_hh.shape[0]
    return pl.pallas_call(
        functools.partial(lstm_seq_kernel, t_blk=t_blk),
        out_shape=jax.ShapeDtypeStruct((Sp, Bp, hs), jnp.float32),
        grid_spec=pltpu.PrefetchScalarGridSpec(
            num_scalar_prefetch=0,
            grid=(Sp // t_blk,),
            in_specs=[
                pl.BlockSpec((t_blk, Bp, G), lambda s: (s, 0, 0)),
                pl.BlockSpec((t_blk, Bp, 1), lambda s: (s, 0, 0)),
                pl.BlockSpec((hs, G), lambda s: (0, 0)),
            ],
            out_specs=pl.BlockSpec((t_blk, Bp, hs), lambda s: (s, 0, 0)),
            scratch_shapes=[pltpu.VMEM((Bp, hs), jnp.float32),
                            pltpu.VMEM((Bp, hs), jnp.float32)],
        ),
        compiler_params=pltpu.CompilerParams(
            dimension_semantics=("arbitrary",)),   # recurrence -> sequential grid
    )(gx_sbg, keep_sb1, w_hh)


# ------------------------- JAX glue -------------------------

def im2col(x_nhwc, kh, kw):
    """Extract valid (stride 1, no pad) kh x kw patches.  Patch feature order is
    ((i*kw + j)*C + c), matching a PyTorch conv weight transposed to (kh,kw,Cin,Cout)."""
    N, H, W, C = x_nhwc.shape
    Ho, Wo = H - kh + 1, W - kw + 1
    cols = []
    for i in range(kh):
        for j in range(kw):
            cols.append(x_nhwc[:, i:i + Ho, j:j + Wo, :])
    return jnp.concatenate(cols, axis=-1), Ho, Wo


def simple_lstm_forward(params, x_bschw, dones_bs):
    """x: (B, S, C, H, W) float32, dones: (B, S) int.  Returns (B, S, actn_size)."""
    B, S, C, H, W = x_bschw.shape
    h_size = params["w_hh"].shape[0]
    actn_size = params["w_out"].shape[1]

    # ---- conv features over all B*S frames at once (im2col -> tiled Pallas matmuls, bf16) ----
    frames = x_bschw.reshape(B * S, C, H, W).transpose(0, 2, 3, 1)   # NHWC
    p1, h1, w1 = im2col(frames, 3, 3)
    y1 = tiled_matmul_bias(p1.reshape(B * S * h1 * w1, -1),
                           params["w_conv1"], params["b_conv1"],
                           relu_out=True, compute_dtype=jnp.bfloat16)
    y1 = y1.reshape(B * S, h1, w1, -1)

    p2, h2, w2 = im2col(y1, 3, 3)
    y2 = tiled_matmul_bias(p2.reshape(B * S * h2 * w2, -1),
                           params["w_conv2"], params["b_conv2"],
                           relu_out=True, compute_dtype=jnp.bfloat16)
    y2 = y2.reshape(B * S, h2, w2, -1)

    # PyTorch flattens (C_out, H_out, W_out) channel-major
    fx = y2.transpose(0, 3, 1, 2).reshape(B, S, -1)                  # (B, S, F)
    F = fx.shape[-1]

    # ---- pad batch to a sublane multiple (8) and sequence to a timestep-block multiple ----
    Bp = _round_up(B, 8)
    t_blk = min(S, 8)
    Sp = _round_up(S, t_blk)
    fx = jnp.pad(fx, ((0, Bp - B), (0, Sp - S), (0, 0)))             # zero rows are harmless
    # keep = 1 - done, padded regions get keep=0 (state stays zeroed, outputs sliced off anyway)
    keep = jnp.pad(1.0 - dones_bs.astype(jnp.float32),
                   ((0, Bp - B), (0, Sp - S)), constant_values=0.0)

    fx_sbf = fx.transpose(1, 0, 2)                                   # (Sp, Bp, F) time-major
    keep_sb1 = keep.T[..., None]                                     # (Sp, Bp, 1)

    # ---- hoisted input projection: gates_x = fx @ w_ih + (b_ih + b_hh), one big matmul ----
    gx = tiled_matmul_bias(fx_sbf.reshape(Sp * Bp, F),
                           params["w_ih"], params["b_lstm"],
                           compute_dtype=jnp.bfloat16)               # (Sp*Bp, 4H) f32
    gx_sbg = gx.reshape(Sp, Bp, 4 * h_size)

    # ---- sequential recurrence: only h @ w_hh + gate math per step ----
    h_out = lstm_recurrence(gx_sbg, keep_sb1, params["w_hh"], t_blk)  # (Sp, Bp, H)

    # ---- hoisted dense head: Linear(ReLU(h)) as one batched matmul ----
    # Pad the output columns to a 128-lane multiple so the kernel's stores are unmasked
    # full-lane writes (lane-dense out_spec); slice the real actn_size back afterwards.
    Np = _round_up(actn_size, 128)
    w_out_p = jnp.pad(params["w_out"], ((0, 0), (0, Np - actn_size)))
    b_out_p = jnp.pad(params["b_out"], (0, Np - actn_size))
    out = tiled_matmul_bias(h_out.reshape(Sp * Bp, h_size),
                            w_out_p, b_out_p, relu_in=True)
    out = out.reshape(Sp, Bp, Np)[:S, :B, :actn_size]
    return out.transpose(1, 0, 2)                                     # (B, S, K)


# ------------------------- reference (pure JAX) -------------------------

def ref_forward(params, x_bschw, dones_bs):
    B, S, C, H, W = x_bschw.shape
    frames = x_bschw.reshape(B * S, C, H, W).transpose(0, 2, 3, 1)
    hp = jax.lax.Precision.HIGHEST

    p1, h1, w1 = im2col(frames, 3, 3)
    y1 = jnp.maximum(jnp.dot(p1.reshape(-1, p1.shape[-1]), params["w_conv1"],
                             precision=hp) + params["b_conv1"], 0.0)
    y1 = y1.reshape(B * S, h1, w1, -1)
    p2, h2, w2 = im2col(y1, 3, 3)
    y2 = jnp.maximum(jnp.dot(p2.reshape(-1, p2.shape[-1]), params["w_conv2"],
                             precision=hp) + params["b_conv2"], 0.0)
    y2 = y2.reshape(B * S, h2, w2, -1)
    fx = y2.transpose(0, 3, 1, 2).reshape(B, S, -1)

    hs = params["w_hh"].shape[0]
    h = jnp.zeros((B, hs), jnp.float32)
    c = jnp.zeros((B, hs), jnp.float32)
    outs = []
    for s in range(S):
        gates = (jnp.dot(fx[:, s], params["w_ih"], precision=hp)
                 + jnp.dot(h, params["w_hh"], precision=hp) + params["b_lstm"])
        i = jax.nn.sigmoid(gates[:, :hs])
        f = jax.nn.sigmoid(gates[:, hs:2 * hs])
        g = jnp.tanh(gates[:, 2 * hs:3 * hs])
        o = jax.nn.sigmoid(gates[:, 3 * hs:])
        c = f * c + i * g
        h = o * jnp.tanh(c)
        outs.append(jnp.dot(jnp.maximum(h, 0.0), params["w_out"], precision=hp)
                    + params["b_out"])
        mask = (1.0 - dones_bs[:, s].astype(jnp.float32))[:, None]
        h = h * mask
        c = c * mask
    return jnp.stack(outs, axis=1)


# ------------------------- params -------------------------

def init_params(key, C, H, W, h_size, actn_size):
    h2, w2 = H - 4, W - 4
    flat = 48 * h2 * w2
    ks = jax.random.split(key, 9)

    def u(k, shape, scale):
        return jax.random.uniform(k, shape, jnp.float32, -scale, scale)

    return {
        # conv weights pre-arranged in im2col layout (kh*kw*Cin, Cout)
        "w_conv1": u(ks[0], (3 * 3 * C, 32), 0.10),
        "b_conv1": u(ks[1], (32,), 0.10),
        "w_conv2": u(ks[2], (3 * 3 * 32, 48), 0.05),
        "b_conv2": u(ks[3], (48,), 0.05),
        # LSTMCell: weight_ih^T (F,4H), weight_hh^T (H,4H), bias_ih+bias_hh (4H,)
        "w_ih": u(ks[4], (flat, 4 * h_size), 0.02),
        "w_hh": u(ks[5], (h_size, 4 * h_size), 0.10),
        "b_lstm": u(ks[6], (4 * h_size,), 0.10),
        # dense head Linear(h_size, actn_size)
        "w_out": u(ks[7], (h_size, actn_size), 0.10),
        "b_out": u(ks[8], (actn_size,), 0.10),
    }


if __name__ == "__main__":
    B, S, C, H, W = 2, 8, 3, 10, 10
    h_size, actn_size = 32, 6          # 4*h_size == 128 -> one full vreg per gate tile

    key = jax.random.PRNGKey(0)
    kx, kd, kp = jax.random.split(key, 3)
    x = jax.random.normal(kx, (B, S, C, H, W), jnp.float32)
    dones = (jax.random.uniform(kd, (B, S)) < 0.3).astype(jnp.int32)
    params = init_params(kp, C, H, W, h_size, actn_size)

    out = jax.jit(simple_lstm_forward)(params, x, dones)
    out = jax.block_until_ready(out)

    ref = ref_forward(params, x, dones)
    assert out.shape == (B, S, actn_size)
    assert jnp.allclose(out, ref, atol=1e-2, rtol=1e-2), "mismatch vs JAX reference"

    print("KERNEL_OK")
</pallas_src>

<mosaic_0001>
module attributes {stable_mosaic.version = 11 : i64} {
  func.func @_mm_kernel(%arg0: i32, %arg1: memref<512x27xbf16, #tpu.memory_space<vmem>>, %arg2: memref<27x32xbf16, #tpu.memory_space<vmem>>, %arg3: memref<1x32xf32, #tpu.memory_space<vmem>>, %arg4: memref<512x32xf32, #tpu.memory_space<vmem>>) attributes {dimension_semantics = [#tpu.dimension_semantics<parallel>], iteration_bounds = array<i64: 2>, scalar_prefetch = 0 : i64, scratch_operands = 0 : i64, tpu.core_type = #tpu.core_type<tc>, window_params = [{transform_indices = @transform_0, window_bounds = array<i64: 512, 27>}, {pipeline_mode = #tpu.pipeline_mode<synchronous>, transform_indices = @transform_1, window_bounds = array<i64: 27, 32>}, {pipeline_mode = #tpu.pipeline_mode<synchronous>, transform_indices = @transform_2, window_bounds = array<i64: 1, 32>}, {transform_indices = @transform_3, window_bounds = array<i64: 512, 32>}]} {
    %c0 = arith.constant 0 : index
    %c0_0 = arith.constant 0 : index
    %0 = vector.load %arg1[%c0, %c0_0] : memref<512x27xbf16, #tpu.memory_space<vmem>>, vector<512x27xbf16>
    %c0_1 = arith.constant 0 : index
    %c0_2 = arith.constant 0 : index
    %1 = vector.load %arg2[%c0_1, %c0_2] : memref<27x32xbf16, #tpu.memory_space<vmem>>, vector<27x32xbf16>
    %cst = arith.constant dense<0.000000e+00> : vector<512x32xf32>
    %2 = tpu.matmul %0, %1, %cst {dimension_numbers = #tpu.dot_dimension_numbers<[1], [0], [0], [1], [0, 0, 1, 1], [], []>} : vector<512x27xbf16>, vector<27x32xbf16>, vector<512x32xf32> -> vector<512x32xf32>
    %c0_3 = arith.constant 0 : index
    %c0_4 = arith.constant 0 : index
    %3 = vector.load %arg3[%c0_3, %c0_4] : memref<1x32xf32, #tpu.memory_space<vmem>>, vector<1x32xf32>
    %4 = vector.broadcast %3 : vector<1x32xf32> to vector<512x32xf32>
    %5 = arith.addf %2, %4 : vector<512x32xf32>
    %cst_5 = arith.constant 0.000000e+00 : f32
    %6 = vector.broadcast %cst_5 : f32 to vector<512x32xf32>
    %7 = arith.maximumf %5, %6 : vector<512x32xf32>
    %c0_6 = arith.constant 0 : index
    %c0_7 = arith.constant 0 : index
    %8 = vector.load %arg4[%c0_6, %c0_7] : memref<512x32xf32, #tpu.memory_space<vmem>>, vector<512x32xf32>
    tpu.vector_store %arg4[%c0_6, %c0_7], %7 {strides = array<i32>} : memref<512x32xf32, #tpu.memory_space<vmem>>, vector<512x32xf32>,
    return
  }
  func.func @transform_0(%arg0: i32) -> (i32, i32) {
    %c0_i32 = arith.constant 0 : i32
    %c0_i32_0 = arith.constant 0 : i32
    return %arg0, %c0_i32 : i32, i32
  }
  func.func @transform_1(%arg0: i32) -> (i32, i32) {
    %c0_i32 = arith.constant 0 : i32
    %c0_i32_0 = arith.constant 0 : i32
    %c0_i32_1 = arith.constant 0 : i32
    return %c0_i32, %c0_i32_0 : i32, i32
  }
  func.func @transform_2(%arg0: i32) -> (i32, i32) {
    %c0_i32 = arith.constant 0 : i32
    %c0_i32_0 = arith.constant 0 : i32
    %c0_i32_1 = arith.constant 0 : i32
    return %c0_i32, %c0_i32_0 : i32, i32
  }
  func.func @transform_3(%arg0: i32) -> (i32, i32) {
    %c0_i32 = arith.constant 0 : i32
    %c0_i32_0 = arith.constant 0 : i32
    return %arg0, %c0_i32 : i32, i32
  }
}

module attributes {stable_mosaic.version = 11 : i64} {
  func.func @_mm_kernel(%arg0: i32, %arg1: memref<512x288xbf16, #tpu.memory_space<vmem>>, %arg2: memref<288x48xbf16, #tpu.memory_space<vmem>>, %arg3: memref<1x48xf32, #tpu.memory_space<vmem>>, %arg4: memref<512x48xf32, #tpu.memory_space<vmem>>) attributes {dimension_semantics = [#tpu.dimension_semantics<parallel>], iteration_bounds = array<i64: 2>, scalar_prefetch = 0 : i64, scratch_operands = 0 : i64, tpu.core_type = #tpu.core_type<tc>, window_params = [{transform_indices = @transform_0, window_bounds = array<i64: 512, 288>}, {pipeline_mode = #tpu.pipeline_mode<synchronous>, transform_indices = @transform_1, window_bounds = array<i64: 288, 48>}, {pipeline_mode = #tpu.pipeline_mode<synchronous>, transform_indices = @transform_2, window_bounds = array<i64: 1, 48>}, {transform_indices = @transform_3, window_bounds = array<i64: 512, 48>}]} {
    %c0 = arith.constant 0 : index
    %c0_0 = arith.constant 0 : index
    %0 = vector.load %arg1[%c0, %c0_0] : memref<512x288xbf16, #tpu.memory_space<vmem>>, vector<512x288xbf16>
    %c0_1 = arith.constant 0 : index
    %c0_2 = arith.constant 0 : index
    %1 = vector.load %arg2[%c0_1, %c0_2] : memref<288x48xbf16, #tpu.memory_space<vmem>>, vector<288x48xbf16>
    %cst = arith.constant dense<0.000000e+00> : vector<512x48xf32>
    %2 = tpu.matmul %0, %1, %cst {dimension_numbers = #tpu.dot_dimension_numbers<[1], [0], [0], [1], [0, 0, 1, 1], [], []>} : vector<512x288xbf16>, vector<288x48xbf16>, vector<512x48xf32> -> vector<512x48xf32>
    %c0_3 = arith.constant 0 : index
    %c0_4 = arith.constant 0 : index
    %3 = vector.load %arg3[%c0_3, %c0_4] : memref<1x48xf32, #tpu.memory_space<vmem>>, vector<1x48xf32>
    %4 = vector.broadcast %3 : vector<1x48xf32> to vector<512x48xf32>
    %5 = arith.addf %2, %4 : vector<512x48xf32>
    %cst_5 = arith.constant 0.000000e+00 : f32
    %6 = vector.broadcast %cst_5 : f32 to vector<512x48xf32>
    %7 = arith.maximumf %5, %6 : vector<512x48xf32>
    %c0_6 = arith.constant 0 : index
    %c0_7 = arith.constant 0 : index
    %8 = vector.load %arg4[%c0_6, %c0_7] : memref<512x48xf32, #tpu.memory_space<vmem>>, vector<512x48xf32>
    tpu.vector_store %arg4[%c0_6, %c0_7], %7 {strides = array<i32>} : memref<512x48xf32, #tpu.memory_space<vmem>>, vector<512x48xf32>,
    return
  }
  func.func @transform_0(%arg0: i32) -> (i32, i32) {
    %c0_i32 = arith.constant 0 : i32
    %c0_i32_0 = arith.constant 0 : i32
    return %arg0, %c0_i32 : i32, i32
  }
  func.func @transform_1(%arg0: i32) -> (i32, i32) {
    %c0_i32 = arith.constant 0 : i32
    %c0_i32_0 = arith.constant 0 : i32
    %c0_i32_1 = arith.constant 0 : i32
    return %c0_i32, %c0_i32_0 : i32, i32
  }
  func.func @transform_2(%arg0: i32) -> (i32, i32) {
    %c0_i32 = arith.constant 0 : i32
    %c0_i32_0 = arith.constant 0 : i32
    %c0_i32_1 = arith.constant 0 : i32
    return %c0_i32, %c0_i32_0 : i32, i32
  }
  func.func @transform_3(%arg0: i32) -> (i32, i32) {
    %c0_i32 = arith.constant 0 : i32
    %c0_i32_0 = arith.constant 0 : i32
    return %arg0, %c0_i32 : i32, i32
  }
}

module attributes {stable_mosaic.version = 11 : i64} {
  func.func @_mm_kernel(%arg0: i32, %arg1: memref<64x1728xbf16, #tpu.memory_space<vmem>>, %arg2: memref<1728x128xbf16, #tpu.memory_space<vmem>>, %arg3: memref<1x128xf32, #tpu.memory_space<vmem>>, %arg4: memref<64x128xf32, #tpu.memory_space<vmem>>) attributes {dimension_semantics = [#tpu.dimension_semantics<parallel>], iteration_bounds = array<i64: 1>, scalar_prefetch = 0 : i64, scratch_operands = 0 : i64, tpu.core_type = #tpu.core_type<tc>, window_params = [{transform_indices = @transform_0, window_bounds = array<i64: 64, 1728>}, {pipeline_mode = #tpu.pipeline_mode<synchronous>, transform_indices = @transform_1, window_bounds = array<i64: 1728, 128>}, {pipeline_mode = #tpu.pipeline_mode<synchronous>, transform_indices = @transform_2, window_bounds = array<i64: 1, 128>}, {transform_indices = @transform_3, window_bounds = array<i64: 64, 128>}]} {
    %c0 = arith.constant 0 : index
    %c0_0 = arith.constant 0 : index
    %0 = vector.load %arg1[%c0, %c0_0] : memref<64x1728xbf16, #tpu.memory_space<vmem>>, vector<64x1728xbf16>
    %c0_1 = arith.constant 0 : index
    %c0_2 = arith.constant 0 : index
    %1 = vector.load %arg2[%c0_1, %c0_2] : memref<1728x128xbf16, #tpu.memory_space<vmem>>, vector<1728x128xbf16>
    %cst = arith.constant dense<0.000000e+00> : vector<64x128xf32>
    %2 = tpu.matmul %0, %1, %cst {dimension_numbers = #tpu.dot_dimension_numbers<[1], [0], [0], [1], [0, 0, 1, 1], [], []>} : vector<64x1728xbf16>, vector<1728x128xbf16>, vector<64x128xf32> -> vector<64x128xf32>
    %c0_3 = arith.constant 0 : index
    %c0_4 = arith.constant 0 : index
    %3 = vector.load %arg3[%c0_3, %c0_4] : memref<1x128xf32, #tpu.memory_space<vmem>>, vector<1x128xf32>
    %4 = vector.broadcast %3 : vector<1x128xf32> to vector<64x128xf32>
    %5 = arith.addf %2, %4 : vector<64x128xf32>
    %c0_5 = arith.constant 0 : index
    %c0_6 = arith.constant 0 : index
    %6 = vector.load %arg4[%c0_5, %c0_6] : memref<64x128xf32, #tpu.memory_space<vmem>>, vector<64x128xf32>
    tpu.vector_store %arg4[%c0_5, %c0_6], %5 {strides = array<i32>} : memref<64x128xf32, #tpu.memory_space<vmem>>, vector<64x128xf32>,
    return
  }
  func.func @transform_0(%arg0: i32) -> (i32, i32) {
    %c0_i32 = arith.constant 0 : i32
    %c0_i32_0 = arith.constant 0 : i32
    return %arg0, %c0_i32 : i32, i32
  }
  func.func @transform_1(%arg0: i32) -> (i32, i32) {
    %c0_i32 = arith.constant 0 : i32
    %c0_i32_0 = arith.constant 0 : i32
    %c0_i32_1 = arith.constant 0 : i32
    return %c0_i32, %c0_i32_0 : i32, i32
  }
  func.func @transform_2(%arg0: i32) -> (i32, i32) {
    %c0_i32 = arith.constant 0 : i32
    %c0_i32_0 = arith.constant 0 : i32
    %c0_i32_1 = arith.constant 0 : i32
    return %c0_i32, %c0_i32_0 : i32, i32
  }
  func.func @transform_3(%arg0: i32) -> (i32, i32) {
    %c0_i32 = arith.constant 0 : i32
    %c0_i32_0 = arith.constant 0 : i32
    return %arg0, %c0_i32 : i32, i32
  }
}

module attributes {stable_mosaic.version = 11 : i64} {
  func.func @lstm_seq_kernel(%arg0: i32, %arg1: memref<8x8x128xf32, #tpu.memory_space<vmem>>, %arg2: memref<8x8x1xf32, #tpu.memory_space<vmem>>, %arg3: memref<32x128xf32, #tpu.memory_space<vmem>>, %arg4: memref<8x8x32xf32, #tpu.memory_space<vmem>>, %arg5: memref<8x32xf32, #tpu.memory_space<vmem>>, %arg6: memref<8x32xf32, #tpu.memory_space<vmem>>) attributes {dimension_semantics = [#tpu.dimension_semantics<arbitrary>], iteration_bounds = array<i64: 1>, scalar_prefetch = 0 : i64, scratch_operands = 2 : i64, tpu.core_type = #tpu.core_type<tc>, window_params = [{transform_indices = @transform_0, window_bounds = array<i64: 8, 8, 128>}, {transform_indices = @transform_1, window_bounds = array<i64: 8, 8, 1>}, {pipeline_mode = #tpu.pipeline_mode<synchronous>, transform_indices = @transform_2, window_bounds = array<i64: 32, 128>}, {transform_indices = @transform_3, window_bounds = array<i64: 8, 8, 32>}]} {
    %c0_i32 = arith.constant 0 : i32
    %0 = arith.cmpi eq, %arg0, %c0_i32 : i32
    %1 = arith.extui %0 : i1 to i32
    %c0_i32_0 = arith.constant 0 : i32
    %2 = arith.cmpi ne, %1, %c0_i32_0 : i32
    scf.if %2 {
      %cst_90 = arith.constant 0.000000e+00 : f32
      %286 = vector.broadcast %cst_90 : f32 to vector<8x32xf32>
      %c0_91 = arith.constant 0 : index
      %c0_92 = arith.constant 0 : index
      %287 = vector.load %arg5[%c0_91, %c0_92] : memref<8x32xf32, #tpu.memory_space<vmem>>, vector<8x32xf32>
      tpu.vector_store %arg5[%c0_91, %c0_92], %286 {strides = array<i32>} : memref<8x32xf32, #tpu.memory_space<vmem>>, vector<8x32xf32>,
      %cst_93 = arith.constant 0.000000e+00 : f32
      %288 = vector.broadcast %cst_93 : f32 to vector<8x32xf32>
      %c0_94 = arith.constant 0 : index
      %c0_95 = arith.constant 0 : index
      %289 = vector.load %arg6[%c0_94, %c0_95] : memref<8x32xf32, #tpu.memory_space<vmem>>, vector<8x32xf32>
      tpu.vector_store %arg6[%c0_94, %c0_95], %288 {strides = array<i32>} : memref<8x32xf32, #tpu.memory_space<vmem>>, vector<8x32xf32>,
    } else {
    }
    %3 = tpu.iota {dimensions = array<i32: 1>} : vector<8x128xi32>
    %c64_i32 = arith.constant 64 : i32
    %4 = vector.broadcast %c64_i32 : i32 to vector<8x128xi32>
    %5 = arith.cmpi sge, %3, %4 : vector<8x128xi32>
    %c96_i32 = arith.constant 96 : i32
    %6 = vector.broadcast %c96_i32 : i32 to vector<8x128xi32>
    %7 = arith.cmpi slt, %3, %6 : vector<8x128xi32>
    %8 = arith.andi %5, %7 : vector<8x128xi1>
    %c0 = arith.constant 0 : index
    %c0_1 = arith.constant 0 : index
    %9 = vector.load %arg3[%c0, %c0_1] : memref<32x128xf32, #tpu.memory_space<vmem>>, vector<32x128xf32>
    %c0_2 = arith.constant 0 : index
    %c0_3 = arith.constant 0 : index
    %10 = vector.load %arg5[%c0_2, %c0_3] : memref<8x32xf32, #tpu.memory_space<vmem>>, vector<8x32xf32>
    %c0_4 = arith.constant 0 : index
    %c0_5 = arith.constant 0 : index
    %11 = vector.load %arg6[%c0_4, %c0_5] : memref<8x32xf32, #tpu.memory_space<vmem>>, vector<8x32xf32>
    %c0_i32_6 = arith.constant 0 : i32
    %12 = arith.index_cast %c0_i32_6 : i32 to index
    %c0_7 = arith.constant 0 : index
    %c0_8 = arith.constant 0 : index
    %13 = vector.load %arg1[%12, %c0_7, %c0_8] : memref<8x8x128xf32, #tpu.memory_space<vmem>>, vector<1x8x128xf32>
    %14 = vector.shape_cast %13 : vector<1x8x128xf32> to vector<8x128xf32>
    %cst = arith.constant dense<0.000000e+00> : vector<8x128xf32>
    %15 = tpu.matmul %10, %9, %cst {dimension_numbers = #tpu.dot_dimension_numbers<[1], [0], [0], [1], [0, 0, 1, 1], [], []>} : vector<8x32xf32>, vector<32x128xf32>, vector<8x128xf32> -> vector<8x128xf32>
    %16 = arith.addf %14, %15 : vector<8x128xf32>
    %cst_9 = arith.constant 5.000000e-01 : f32
    %17 = vector.broadcast %cst_9 : f32 to vector<8x128xf32>
    %18 = arith.mulf %17, %16 : vector<8x128xf32>
    %19 = arith.select %8, %16, %18 : vector<8x128xi1>, vector<8x128xf32>
    %20 = math.tanh %19 : vector<8x128xf32>
    %cst_10 = arith.constant 5.000000e-01 : f32
    %21 = vector.broadcast %cst_10 : f32 to vector<8x128xf32>
    %22 = arith.mulf %21, %20 : vector<8x128xf32>
    %cst_11 = arith.constant 5.000000e-01 : f32
    %23 = vector.broadcast %cst_11 : f32 to vector<8x128xf32>
    %24 = arith.addf %22, %23 : vector<8x128xf32>
    %25 = arith.select %8, %20, %24 : vector<8x128xi1>, vector<8x128xf32>
    %26 = vector.extract_strided_slice %25 {offsets = [0, 0], sizes = [8, 32], strides = [1, 1]} : vector<8x128xf32> to vector<8x32xf32>
    %27 = vector.extract_strided_slice %25 {offsets = [0, 32], sizes = [8, 32], strides = [1, 1]} : vector<8x128xf32> to vector<8x32xf32>
    %28 = vector.extract_strided_slice %25 {offsets = [0, 64], sizes = [8, 32], strides = [1, 1]} : vector<8x128xf32> to vector<8x32xf32>
    %29 = vector.extract_strided_slice %25 {offsets = [0, 96], sizes = [8, 32], strides = [1, 1]} : vector<8x128xf32> to vector<8x32xf32>
    %30 = arith.mulf %27, %11 : vector<8x32xf32>
    %31 = arith.mulf %26, %28 : vector<8x32xf32>
    %32 = arith.addf %30, %31 : vector<8x32xf32>
    %33 = math.tanh %32 : vector<8x32xf32>
    %34 = arith.mulf %29, %33 : vector<8x32xf32>
    %35 = arith.index_cast %c0_i32_6 : i32 to index
    %c0_12 = arith.constant 0 : index
    %c0_13 = arith.constant 0 : index
    %36 = vector.load %arg4[%35, %c0_12, %c0_13] : memref<8x8x32xf32, #tpu.memory_space<vmem>>, vector<1x8x32xf32>
    %37 = vector.shape_cast %36 : vector<1x8x32xf32> to vector<8x32xf32>
    %38 = vector.shape_cast %34 : vector<8x32xf32> to vector<1x8x32xf32>
    tpu.vector_store %arg4[%35, %c0_12, %c0_13], %38 {strides = array<i32>} : memref<8x8x32xf32, #tpu.memory_space<vmem>>, vector<1x8x32xf32>,
    %39 = arith.index_cast %c0_i32_6 : i32 to index
    %c0_14 = arith.constant 0 : index
    %c0_15 = arith.constant 0 : index
    %40 = vector.load %arg2[%39, %c0_14, %c0_15] : memref<8x8x1xf32, #tpu.memory_space<vmem>>, vector<1x8x1xf32>
    %41 = vector.shape_cast %40 : vector<1x8x1xf32> to vector<8x1xf32>
    %42 = vector.broadcast %41 : vector<8x1xf32> to vector<8x32xf32>
    %43 = arith.mulf %34, %42 : vector<8x32xf32>
    %44 = vector.broadcast %41 : vector<8x1xf32> to vector<8x32xf32>
    %45 = arith.mulf %32, %44 : vector<8x32xf32>
    %c1_i32 = arith.constant 1 : i32
    %46 = arith.index_cast %c1_i32 : i32 to index
    %c0_16 = arith.constant 0 : index
    %c0_17 = arith.constant 0 : index
    %47 = vector.load %arg1[%46, %c0_16, %c0_17] : memref<8x8x128xf32, #tpu.memory_space<vmem>>, vector<1x8x128xf32>
    %48 = vector.shape_cast %47 : vector<1x8x128xf32> to vector<8x128xf32>
    %cst_18 = arith.constant dense<0.000000e+00> : vector<8x128xf32>
    %49 = tpu.matmul %43, %9, %cst_18 {dimension_numbers = #tpu.dot_dimension_numbers<[1], [0], [0], [1], [0, 0, 1, 1], [], []>} : vector<8x32xf32>, vector<32x128xf32>, vector<8x128xf32> -> vector<8x128xf32>
    %50 = arith.addf %48, %49 : vector<8x128xf32>
    %cst_19 = arith.constant 5.000000e-01 : f32
    %51 = vector.broadcast %cst_19 : f32 to vector<8x128xf32>
    %52 = arith.mulf %51, %50 : vector<8x128xf32>
    %53 = arith.select %8, %50, %52 : vector<8x128xi1>, vector<8x128xf32>
    %54 = math.tanh %53 : vector<8x128xf32>
    %cst_20 = arith.constant 5.000000e-01 : f32
    %55 = vector.broadcast %cst_20 : f32 to vector<8x128xf32>
    %56 = arith.mulf %55, %54 : vector<8x128xf32>
    %cst_21 = arith.constant 5.000000e-01 : f32
    %57 = vector.broadcast %cst_21 : f32 to vector<8x128xf32>
    %58 = arith.addf %56, %57 : vector<8x128xf32>
    %59 = arith.select %8, %54, %58 : vector<8x128xi1>, vector<8x128xf32>
    %60 = vector.extract_strided_slice %59 {offsets = [0, 0], sizes = [8, 32], strides = [1, 1]} : vector<8x128xf32> to vector<8x32xf32>
    %61 = vector.extract_strided_slice %59 {offsets = [0, 32], sizes = [8, 32], strides = [1, 1]} : vector<8x128xf32> to vector<8x32xf32>
    %62 = vector.extract_strided_slice %59 {offsets = [0, 64], sizes = [8, 32], strides = [1, 1]} : vector<8x128xf32> to vector<8x32xf32>
    %63 = vector.extract_strided_slice %59 {offsets = [0, 96], sizes = [8, 32], strides = [1, 1]} : vector<8x128xf32> to vector<8x32xf32>
    %64 = arith.mulf %61, %45 : vector<8x32xf32>
    %65 = arith.mulf %60, %62 : vector<8x32xf32>
    %66 = arith.addf %64, %65 : vector<8x32xf32>
    %67 = math.tanh %66 : vector<8x32xf32>
    %68 = arith.mulf %63, %67 : vector<8x32xf32>
    %69 = arith.index_cast %c1_i32 : i32 to index
    %c0_22 = arith.constant 0 : index
    %c0_23 = arith.constant 0 : index
    %70 = vector.load %arg4[%69, %c0_22, %c0_23] : memref<8x8x32xf32, #tpu.memory_space<vmem>>, vector<1x8x32xf32>
    %71 = vector.shape_cast %70 : vector<1x8x32xf32> to vector<8x32xf32>
    %72 = vector.shape_cast %68 : vector<8x32xf32> to vector<1x8x32xf32>
    tpu.vector_store %arg4[%69, %c0_22, %c0_23], %72 {strides = array<i32>} : memref<8x8x32xf32, #tpu.memory_space<vmem>>, vector<1x8x32xf32>,
    %73 = arith.index_cast %c1_i32 : i32 to index
    %c0_24 = arith.constant 0 : index
    %c0_25 = arith.constant 0 : index
    %74 = vector.load %arg2[%73, %c0_24, %c0_25] : memref<8x8x1xf32, #tpu.memory_space<vmem>>, vector<1x8x1xf32>
    %75 = vector.shape_cast %74 : vector<1x8x1xf32> to vector<8x1xf32>
    %76 = vector.broadcast %75 : vector<8x1xf32> to vector<8x32xf32>
    %77 = arith.mulf %68, %76 : vector<8x32xf32>
    %78 = vector.broadcast %75 : vector<8x1xf32> to vector<8x32xf32>
    %79 = arith.mulf %66, %78 : vector<8x32xf32>
    %c2_i32 = arith.constant 2 : i32
    %80 = arith.index_cast %c2_i32 : i32 to index
    %c0_26 = arith.constant 0 : index
    %c0_27 = arith.constant 0 : index
    %81 = vector.load %arg1[%80, %c0_26, %c0_27] : memref<8x8x128xf32, #tpu.memory_space<vmem>>, vector<1x8x128xf32>
    %82 = vector.shape_cast %81 : vector<1x8x128xf32> to vector<8x128xf32>
    %cst_28 = arith.constant dense<0.000000e+00> : vector<8x128xf32>
    %83 = tpu.matmul %77, %9, %cst_28 {dimension_numbers = #tpu.dot_dimension_numbers<[1], [0], [0], [1], [0, 0, 1, 1], [], []>} : vector<8x32xf32>, vector<32x128xf32>, vector<8x128xf32> -> vector<8x128xf32>
    %84 = arith.addf %82, %83 : vector<8x128xf32>
    %cst_29 = arith.constant 5.000000e-01 : f32
    %85 = vector.broadcast %cst_29 : f32 to vector<8x128xf32>
    %86 = arith.mulf %85, %84 : vector<8x128xf32>
    %87 = arith.select %8, %84, %86 : vector<8x128xi1>, vector<8x128xf32>
    %88 = math.tanh %87 : vector<8x128xf32>
    %cst_30 = arith.constant 5.000000e-01 : f32
    %89 = vector.broadcast %cst_30 : f32 to vector<8x128xf32>
    %90 = arith.mulf %89, %88 : vector<8x128xf32>
    %cst_31 = arith.constant 5.000000e-01 : f32
    %91 = vector.broadcast %cst_31 : f32 to vector<8x128xf32>
    %92 = arith.addf %90, %91 : vector<8x128xf32>
    %93 = arith.select %8, %88, %92 : vector<8x128xi1>, vector<8x128xf32>
    %94 = vector.extract_strided_slice %93 {offsets = [0, 0], sizes = [8, 32], strides = [1, 1]} : vector<8x128xf32> to vector<8x32xf32>
    %95 = vector.extract_strided_slice %93 {offsets = [0, 32], sizes = [8, 32], strides = [1, 1]} : vector<8x128xf32> to vector<8x32xf32>
    %96 = vector.extract_strided_slice %93 {offsets = [0, 64], sizes = [8, 32], strides = [1, 1]} : vector<8x128xf32> to vector<8x32xf32>
    %97 = vector.extract_strided_slice %93 {offsets = [0, 96], sizes = [8, 32], strides = [1, 1]} : vector<8x128xf32> to vector<8x32xf32>
    %98 = arith.mulf %95, %79 : vector<8x32xf32>
    %99 = arith.mulf %94, %96 : vector<8x32xf32>
    %100 = arith.addf %98, %99 : vector<8x32xf32>
    %101 = math.tanh %100 : vector<8x32xf32>
    %102 = arith.mulf %97, %101 : vector<8x32xf32>
    %103 = arith.index_cast %c2_i32 : i32 to index
    %c0_32 = arith.constant 0 : index
    %c0_33 = arith.constant 0 : index
    %104 = vector.load %arg4[%103, %c0_32, %c0_33] : memref<8x8x32xf32, #tpu.memory_space<vmem>>, vector<1x8x32xf32>
    %105 = vector.shape_cast %104 : vector<1x8x32xf32> to vector<8x32xf32>
    %106 = vector.shape_cast %102 : vector<8x32xf32> to vector<1x8x32xf32>
    tpu.vector_store %arg4[%103, %c0_32, %c0_33], %106 {strides = array<i32>} : memref<8x8x32xf32, #tpu.memory_space<vmem>>, vector<1x8x32xf32>,
    %107 = arith.index_cast %c2_i32 : i32 to index
    %c0_34 = arith.constant 0 : index
    %c0_35 = arith.constant 0 : index
    %108 = vector.load %arg2[%107, %c0_34, %c0_35] : memref<8x8x1xf32, #tpu.memory_space<vmem>>, vector<1x8x1xf32>
    %109 = vector.shape_cast %108 : vector<1x8x1xf32> to vector<8x1xf32>
    %110 = vector.broadcast %109 : vector<8x1xf32> to vector<8x32xf32>
    %111 = arith.mulf %102, %110 : vector<8x32xf32>
    %112 = vector.broadcast %109 : vector<8x1xf32> to vector<8x32xf32>
    %113 = arith.mulf %100, %112 : vector<8x32xf32>
    %c3_i32 = arith.constant 3 : i32
    %114 = arith.index_cast %c3_i32 : i32 to index
    %c0_36 = arith.constant 0 : index
    %c0_37 = arith.constant 0 : index
    %115 = vector.load %arg1[%114, %c0_36, %c0_37] : memref<8x8x128xf32, #tpu.memory_space<vmem>>, vector<1x8x128xf32>
    %116 = vector.shape_cast %115 : vector<1x8x128xf32> to vector<8x128xf32>
    %cst_38 = arith.constant dense<0.000000e+00> : vector<8x128xf32>
    %117 = tpu.matmul %111, %9, %cst_38 {dimension_numbers = #tpu.dot_dimension_numbers<[1], [0], [0], [1], [0, 0, 1, 1], [], []>} : vector<8x32xf32>, vector<32x128xf32>, vector<8x128xf32> -> vector<8x128xf32>
    %118 = arith.addf %116, %117 : vector<8x128xf32>
    %cst_39 = arith.constant 5.000000e-01 : f32
    %119 = vector.broadcast %cst_39 : f32 to vector<8x128xf32>
    %120 = arith.mulf %119, %118 : vector<8x128xf32>
    %121 = arith.select %8, %118, %120 : vector<8x128xi1>, vector<8x128xf32>
    %122 = math.tanh %121 : vector<8x128xf32>
    %cst_40 = arith.constant 5.000000e-01 : f32
    %123 = vector.broadcast %cst_40 : f32 to vector<8x128xf32>
    %124 = arith.mulf %123, %122 : vector<8x128xf32>
    %cst_41 = arith.constant 5.000000e-01 : f32
    %125 = vector.broadcast %cst_41 : f32 to vector<8x128xf32>
    %126 = arith.addf %124, %125 : vector<8x128xf32>
    %127 = arith.select %8, %122, %126 : vector<8x128xi1>, vector<8x128xf32>
    %128 = vector.extract_strided_slice %127 {offsets = [0, 0], sizes = [8, 32], strides = [1, 1]} : vector<8x128xf32> to vector<8x32xf32>
    %129 = vector.extract_strided_slice %127 {offsets = [0, 32], sizes = [8, 32], strides = [1, 1]} : vector<8x128xf32> to vector<8x32xf32>
    %130 = vector.extract_strided_slice %127 {offsets = [0, 64], sizes = [8, 32], strides = [1, 1]} : vector<8x128xf32> to vector<8x32xf32>
    %131 = vector.extract_strided_slice %127 {offsets = [0, 96], sizes = [8, 32], strides = [1, 1]} : vector<8x128xf32> to vector<8x32xf32>
    %132 = arith.mulf %129, %113 : vector<8x32xf32>
    %133 = arith.mulf %128, %130 : vector<8x32xf32>
    %134 = arith.addf %132, %133 : vector<8x32xf32>
    %135 = math.tanh %134 : vector<8x32xf32>
    %136 = arith.mulf %131, %135 : vector<8x32xf32>
    %137 = arith.index_cast %c3_i32 : i32 to index
    %c0_42 = arith.constant 0 : index
    %c0_43 = arith.constant 0 : index
    %138 = vector.load %arg4[%137, %c0_42, %c0_43] : memref<8x8x32xf32, #tpu.memory_space<vmem>>, vector<1x8x32xf32>
    %139 = vector.shape_cast %138 : vector<1x8x32xf32> to vector<8x32xf32>
    %140 = vector.shape_cast %136 : vector<8x32xf32> to vector<1x8x32xf32>
    tpu.vector_store %arg4[%137, %c0_42, %c0_43], %140 {strides = array<i32>} : memref<8x8x32xf32, #tpu.memory_space<vmem>>, vector<1x8x32xf32>,
    %141 = arith.index_cast %c3_i32 : i32 to index
    %c0_44 = arith.constant 0 : index
    %c0_45 = arith.constant 0 : index
    %142 = vector.load %arg2[%141, %c0_44, %c0_45] : memref<8x8x1xf32, #tpu.memory_space<vmem>>, vector<1x8x1xf32>
    %143 = vector.shape_cast %142 : vector<1x8x1xf32> to vector<8x1xf32>
    %144 = vector.broadcast %143 : vector<8x1xf32> to vector<8x32xf32>
    %145 = arith.mulf %136, %144 : vector<8x32xf32>
    %146 = vector.broadcast %143 : vector<8x1xf32> to vector<8x32xf32>
    %147 = arith.mulf %134, %146 : vector<8x32xf32>
    %c4_i32 = arith.constant 4 : i32
    %148 = arith.index_cast %c4_i32 : i32 to index
    %c0_46 = arith.constant 0 : index
    %c0_47 = arith.constant 0 : index
    %149 = vector.load %arg1[%148, %c0_46, %c0_47] : memref<8x8x128xf32, #tpu.memory_space<vmem>>, vector<1x8x128xf32>
    %150 = vector.shape_cast %149 : vector<1x8x128xf32> to vector<8x128xf32>
    %cst_48 = arith.constant dense<0.000000e+00> : vector<8x128xf32>
    %151 = tpu.matmul %145, %9, %cst_48 {dimension_numbers = #tpu.dot_dimension_numbers<[1], [0], [0], [1], [0, 0, 1, 1], [], []>} : vector<8x32xf32>, vector<32x128xf32>, vector<8x128xf32> -> vector<8x128xf32>
    %152 = arith.addf %150, %151 : vector<8x128xf32>
    %cst_49 = arith.constant 5.000000e-01 : f32
    %153 = vector.broadcast %cst_49 : f32 to vector<8x128xf32>
    %154 = arith.mulf %153, %152 : vector<8x128xf32>
    %155 = arith.select %8, %152, %154 : vector<8x128xi1>, vector<8x128xf32>
    %156 = math.tanh %155 : vector<8x128xf32>
    %cst_50 = arith.constant 5.000000e-01 : f32
    %157 = vector.broadcast %cst_50 : f32 to vector<8x128xf32>
    %158 = arith.mulf %157, %156 : vector<8x128xf32>
    %cst_51 = arith.constant 5.000000e-01 : f32
    %159 = vector.broadcast %cst_51 : f32 to vector<8x128xf32>
    %160 = arith.addf %158, %159 : vector<8x128xf32>
    %161 = arith.select %8, %156, %160 : vector<8x128xi1>, vector<8x128xf32>
    %162 = vector.extract_strided_slice %161 {offsets = [0, 0], sizes = [8, 32], strides = [1, 1]} : vector<8x128xf32> to vector<8x32xf32>
    %163 = vector.extract_strided_slice %161 {offsets = [0, 32], sizes = [8, 32], strides = [1, 1]} : vector<8x128xf32> to vector<8x32xf32>
    %164 = vector.extract_strided_slice %161 {offsets = [0, 64], sizes = [8, 32], strides = [1, 1]} : vector<8x128xf32> to vector<8x32xf32>
    %165 = vector.extract_strided_slice %161 {offsets = [0, 96], sizes = [8, 32], strides = [1, 1]} : vector<8x128xf32> to vector<8x32xf32>
    %166 = arith.mulf %163, %147 : vector<8x32xf32>
    %167 = arith.mulf %162, %164 : vector<8x32xf32>
    %168 = arith.addf %166, %167 : vector<8x32xf32>
    %169 = math.tanh %168 : vector<8x32xf32>
    %170 = arith.mulf %165, %169 : vector<8x32xf32>
    %171 = arith.index_cast %c4_i32 : i32 to index
    %c0_52 = arith.constant 0 : index
    %c0_53 = arith.constant 0 : index
    %172 = vector.load %arg4[%171, %c0_52, %c0_53] : memref<8x8x32xf32, #tpu.memory_space<vmem>>, vector<1x8x32xf32>
    %173 = vector.shape_cast %172 : vector<1x8x32xf32> to vector<8x32xf32>
    %174 = vector.shape_cast %170 : vector<8x32xf32> to vector<1x8x32xf32>
    tpu.vector_store %arg4[%171, %c0_52, %c0_53], %174 {strides = array<i32>} : memref<8x8x32xf32, #tpu.memory_space<vmem>>, vector<1x8x32xf32>,
    %175 = arith.index_cast %c4_i32 : i32 to index
    %c0_54 = arith.constant 0 : index
    %c0_55 = arith.constant 0 : index
    %176 = vector.load %arg2[%175, %c0_54, %c0_55] : memref<8x8x1xf32, #tpu.memory_space<vmem>>, vector<1x8x1xf32>
    %177 = vector.shape_cast %176 : vector<1x8x1xf32> to vector<8x1xf32>
    %178 = vector.broadcast %177 : vector<8x1xf32> to vector<8x32xf32>
    %179 = arith.mulf %170, %178 : vector<8x32xf32>
    %180 = vector.broadcast %177 : vector<8x1xf32> to vector<8x32xf32>
    %181 = arith.mulf %168, %180 : vector<8x32xf32>
    %c5_i32 = arith.constant 5 : i32
    %182 = arith.index_cast %c5_i32 : i32 to index
    %c0_56 = arith.constant 0 : index
    %c0_57 = arith.constant 0 : index
    %183 = vector.load %arg1[%182, %c0_56, %c0_57] : memref<8x8x128xf32, #tpu.memory_space<vmem>>, vector<1x8x128xf32>
    %184 = vector.shape_cast %183 : vector<1x8x128xf32> to vector<8x128xf32>
    %cst_58 = arith.constant dense<0.000000e+00> : vector<8x128xf32>
    %185 = tpu.matmul %179, %9, %cst_58 {dimension_numbers = #tpu.dot_dimension_numbers<[1], [0], [0], [1], [0, 0, 1, 1], [], []>} : vector<8x32xf32>, vector<32x128xf32>, vector<8x128xf32> -> vector<8x128xf32>
    %186 = arith.addf %184, %185 : vector<8x128xf32>
    %cst_59 = arith.constant 5.000000e-01 : f32
    %187 = vector.broadcast %cst_59 : f32 to vector<8x128xf32>
    %188 = arith.mulf %187, %186 : vector<8x128xf32>
    %189 = arith.select %8, %186, %188 : vector<8x128xi1>, vector<8x128xf32>
    %190 = math.tanh %189 : vector<8x128xf32>
    %cst_60 = arith.constant 5.000000e-01 : f32
    %191 = vector.broadcast %cst_60 : f32 to vector<8x128xf32>
    %192 = arith.mulf %191, %190 : vector<8x128xf32>
    %cst_61 = arith.constant 5.000000e-01 : f32
    %193 = vector.broadcast %cst_61 : f32 to vector<8x128xf32>
    %194 = arith.addf %192, %193 : vector<8x128xf32>
    %195 = arith.select %8, %190, %194 : vector<8x128xi1>, vector<8x128xf32>
    %196 = vector.extract_strided_slice %195 {offsets = [0, 0], sizes = [8, 32], strides = [1, 1]} : vector<8x128xf32> to vector<8x32xf32>
    %197 = vector.extract_strided_slice %195 {offsets = [0, 32], sizes = [8, 32], strides = [1, 1]} : vector<8x128xf32> to vector<8x32xf32>
    %198 = vector.extract_strided_slice %195 {offsets = [0, 64], sizes = [8, 32], strides = [1, 1]} : vector<8x128xf32> to vector<8x32xf32>
    %199 = vector.extract_strided_slice %195 {offsets = [0, 96], sizes = [8, 32], strides = [1, 1]} : vector<8x128xf32> to vector<8x32xf32>
    %200 = arith.mulf %197, %181 : vector<8x32xf32>
    %201 = arith.mulf %196, %198 : vector<8x32xf32>
    %202 = arith.addf %200, %201 : vector<8x32xf32>
    %203 = math.tanh %202 : vector<8x32xf32>
    %204 = arith.mulf %199, %203 : vector<8x32xf32>
    %205 = arith.index_cast %c5_i32 : i32 to index
    %c0_62 = arith.constant 0 : index
    %c0_63 = arith.constant 0 : index
    %206 = vector.load %arg4[%205, %c0_62, %c0_63] : memref<8x8x32xf32, #tpu.memory_space<vmem>>, vector<1x8x32xf32>
    %207 = vector.shape_cast %206 : vector<1x8x32xf32> to vector<8x32xf32>
    %208 = vector.shape_cast %204 : vector<8x32xf32> to vector<1x8x32xf32>
    tpu.vector_store %arg4[%205, %c0_62, %c0_63], %208 {strides = array<i32>} : memref<8x8x32xf32, #tpu.memory_space<vmem>>, vector<1x8x32xf32>,
    %209 = arith.index_cast %c5_i32 : i32 to index
    %c0_64 = arith.constant 0 : index
    %c0_65 = arith.constant 0 : index
    %210 = vector.load %arg2[%209, %c0_64, %c0_65] : memref<8x8x1xf32, #tpu.memory_space<vmem>>, vector<1x8x1xf32>
    %211 = vector.shape_cast %210 : vector<1x8x1xf32> to vector<8x1xf32>
    %212 = vector.broadcast %211 : vector<8x1xf32> to vector<8x32xf32>
    %213 = arith.mulf %204, %212 : vector<8x32xf32>
    %214 = vector.broadcast %211 : vector<8x1xf32> to vector<8x32xf32>
    %215 = arith.mulf %202, %214 : vector<8x32xf32>
    %c6_i32 = arith.constant 6 : i32
    %216 = arith.index_cast %c6_i32 : i32 to index
    %c0_66 = arith.constant 0 : index
    %c0_67 = arith.constant 0 : index
    %217 = vector.load %arg1[%216, %c0_66, %c0_67] : memref<8x8x128xf32, #tpu.memory_space<vmem>>, vector<1x8x128xf32>
    %218 = vector.shape_cast %217 : vector<1x8x128xf32> to vector<8x128xf32>
    %cst_68 = arith.constant dense<0.000000e+00> : vector<8x128xf32>
    %219 = tpu.matmul %213, %9, %cst_68 {dimension_numbers = #tpu.dot_dimension_numbers<[1], [0], [0], [1], [0, 0, 1, 1], [], []>} : vector<8x32xf32>, vector<32x128xf32>, vector<8x128xf32> -> vector<8x128xf32>
    %220 = arith.addf %218, %219 : vector<8x128xf32>
    %cst_69 = arith.constant 5.000000e-01 : f32
    %221 = vector.broadcast %cst_69 : f32 to vector<8x128xf32>
    %222 = arith.mulf %221, %220 : vector<8x128xf32>
    %223 = arith.select %8, %220, %222 : vector<8x128xi1>, vector<8x128xf32>
    %224 = math.tanh %223 : vector<8x128xf32>
    %cst_70 = arith.constant 5.000000e-01 : f32
    %225 = vector.broadcast %cst_70 : f32 to vector<8x128xf32>
    %226 = arith.mulf %225, %224 : vector<8x128xf32>
    %cst_71 = arith.constant 5.000000e-01 : f32
    %227 = vector.broadcast %cst_71 : f32 to vector<8x128xf32>
    %228 = arith.addf %226, %227 : vector<8x128xf32>
    %229 = arith.select %8, %224, %228 : vector<8x128xi1>, vector<8x128xf32>
    %230 = vector.extract_strided_slice %229 {offsets = [0, 0], sizes = [8, 32], strides = [1, 1]} : vector<8x128xf32> to vector<8x32xf32>
    %231 = vector.extract_strided_slice %229 {offsets = [0, 32], sizes = [8, 32], strides = [1, 1]} : vector<8x128xf32> to vector<8x32xf32>
    %232 = vector.extract_strided_slice %229 {offsets = [0, 64], sizes = [8, 32], strides = [1, 1]} : vector<8x128xf32> to vector<8x32xf32>
    %233 = vector.extract_strided_slice %229 {offsets = [0, 96], sizes = [8, 32], strides = [1, 1]} : vector<8x128xf32> to vector<8x32xf32>
    %234 = arith.mulf %231, %215 : vector<8x32xf32>
    %235 = arith.mulf %230, %232 : vector<8x32xf32>
    %236 = arith.addf %234, %235 : vector<8x32xf32>
    %237 = math.tanh %236 : vector<8x32xf32>
    %238 = arith.mulf %233, %237 : vector<8x32xf32>
    %239 = arith.index_cast %c6_i32 : i32 to index
    %c0_72 = arith.constant 0 : index
    %c0_73 = arith.constant 0 : index
    %240 = vector.load %arg4[%239, %c0_72, %c0_73] : memref<8x8x32xf32, #tpu.memory_space<vmem>>, vector<1x8x32xf32>
    %241 = vector.shape_cast %240 : vector<1x8x32xf32> to vector<8x32xf32>
    %242 = vector.shape_cast %238 : vector<8x32xf32> to vector<1x8x32xf32>
    tpu.vector_store %arg4[%239, %c0_72, %c0_73], %242 {strides = array<i32>} : memref<8x8x32xf32, #tpu.memory_space<vmem>>, vector<1x8x32xf32>,
    %243 = arith.index_cast %c6_i32 : i32 to index
    %c0_74 = arith.constant 0 : index
    %c0_75 = arith.constant 0 : index
    %244 = vector.load %arg2[%243, %c0_74, %c0_75] : memref<8x8x1xf32, #tpu.memory_space<vmem>>, vector<1x8x1xf32>
    %245 = vector.shape_cast %244 : vector<1x8x1xf32> to vector<8x1xf32>
    %246 = vector.broadcast %245 : vector<8x1xf32> to vector<8x32xf32>
    %247 = arith.mulf %238, %246 : vector<8x32xf32>
    %248 = vector.broadcast %245 : vector<8x1xf32> to vector<8x32xf32>
    %249 = arith.mulf %236, %248 : vector<8x32xf32>
    %c7_i32 = arith.constant 7 : i32
    %250 = arith.index_cast %c7_i32 : i32 to index
    %c0_76 = arith.constant 0 : index
    %c0_77 = arith.constant 0 : index
    %251 = vector.load %arg1[%250, %c0_76, %c0_77] : memref<8x8x128xf32, #tpu.memory_space<vmem>>, vector<1x8x128xf32>
    %252 = vector.shape_cast %251 : vector<1x8x128xf32> to vector<8x128xf32>
    %cst_78 = arith.constant dense<0.000000e+00> : vector<8x128xf32>
    %253 = tpu.matmul %247, %9, %cst_78 {dimension_numbers = #tpu.dot_dimension_numbers<[1], [0], [0], [1], [0, 0, 1, 1], [], []>} : vector<8x32xf32>, vector<32x128xf32>, vector<8x128xf32> -> vector<8x128xf32>
    %254 = arith.addf %252, %253 : vector<8x128xf32>
    %cst_79 = arith.constant 5.000000e-01 : f32
    %255 = vector.broadcast %cst_79 : f32 to vector<8x128xf32>
    %256 = arith.mulf %255, %254 : vector<8x128xf32>
    %257 = arith.select %8, %254, %256 : vector<8x128xi1>, vector<8x128xf32>
    %258 = math.tanh %257 : vector<8x128xf32>
    %cst_80 = arith.constant 5.000000e-01 : f32
    %259 = vector.broadcast %cst_80 : f32 to vector<8x128xf32>
    %260 = arith.mulf %259, %258 : vector<8x128xf32>
    %cst_81 = arith.constant 5.000000e-01 : f32
    %261 = vector.broadcast %cst_81 : f32 to vector<8x128xf32>
    %262 = arith.addf %260, %261 : vector<8x128xf32>
    %263 = arith.select %8, %258, %262 : vector<8x128xi1>, vector<8x128xf32>
    %264 = vector.extract_strided_slice %263 {offsets = [0, 0], sizes = [8, 32], strides = [1, 1]} : vector<8x128xf32> to vector<8x32xf32>
    %265 = vector.extract_strided_slice %263 {offsets = [0, 32], sizes = [8, 32], strides = [1, 1]} : vector<8x128xf32> to vector<8x32xf32>
    %266 = vector.extract_strided_slice %263 {offsets = [0, 64], sizes = [8, 32], strides = [1, 1]} : vector<8x128xf32> to vector<8x32xf32>
    %267 = vector.extract_strided_slice %263 {offsets = [0, 96], sizes = [8, 32], strides = [1, 1]} : vector<8x128xf32> to vector<8x32xf32>
    %268 = arith.mulf %265, %249 : vector<8x32xf32>
    %269 = arith.mulf %264, %266 : vector<8x32xf32>
    %270 = arith.addf %268, %269 : vector<8x32xf32>
    %271 = math.tanh %270 : vector<8x32xf32>
    %272 = arith.mulf %267, %271 : vector<8x32xf32>
    %273 = arith.index_cast %c7_i32 : i32 to index
    %c0_82 = arith.constant 0 : index
    %c0_83 = arith.constant 0 : index
    %274 = vector.load %arg4[%273, %c0_82, %c0_83] : memref<8x8x32xf32, #tpu.memory_space<vmem>>, vector<1x8x32xf32>
    %275 = vector.shape_cast %274 : vector<1x8x32xf32> to vector<8x32xf32>
    %276 = vector.shape_cast %272 : vector<8x32xf32> to vector<1x8x32xf32>
    tpu.vector_store %arg4[%273, %c0_82, %c0_83], %276 {strides = array<i32>} : memref<8x8x32xf32, #tpu.memory_space<vmem>>, vector<1x8x32xf32>,
    %277 = arith.index_cast %c7_i32 : i32 to index
    %c0_84 = arith.constant 0 : index
    %c0_85 = arith.constant 0 : index
    %278 = vector.load %arg2[%277, %c0_84, %c0_85] : memref<8x8x1xf32, #tpu.memory_space<vmem>>, vector<1x8x1xf32>
    %279 = vector.shape_cast %278 : vector<1x8x1xf32> to vector<8x1xf32>
    %280 = vector.broadcast %279 : vector<8x1xf32> to vector<8x32xf32>
    %281 = arith.mulf %272, %280 : vector<8x32xf32>
    %282 = vector.broadcast %279 : vector<8x1xf32> to vector<8x32xf32>
    %283 = arith.mulf %270, %282 : vector<8x32xf32>
    %c8_i32 = arith.constant 8 : i32
    %c0_86 = arith.constant 0 : index
    %c0_87 = arith.constant 0 : index
    %284 = vector.load %arg5[%c0_86, %c0_87] : memref<8x32xf32, #tpu.memory_space<vmem>>, vector<8x32xf32>
    tpu.vector_store %arg5[%c0_86, %c0_87], %281 {strides = array<i32>} : memref<8x32xf32, #tpu.memory_space<vmem>>, vector<8x32xf32>,
    %c0_88 = arith.constant 0 : index
    %c0_89 = arith.constant 0 : index
    %285 = vector.load %arg6[%c0_88, %c0_89] : memref<8x32xf32, #tpu.memory_space<vmem>>, vector<8x32xf32>
    tpu.vector_store %arg6[%c0_88, %c0_89], %283 {strides = array<i32>} : memref<8x32xf32, #tpu.memory_space<vmem>>, vector<8x32xf32>,
    return
  }
  func.func @transform_0(%arg0: i32) -> (i32, i32, i32) {
    %c0_i32 = arith.constant 0 : i32
    %c0_i32_0 = arith.constant 0 : i32
    %c0_i32_1 = arith.constant 0 : i32
    return %arg0, %c0_i32, %c0_i32_0 : i32, i32, i32
  }
  func.func @transform_1(%arg0: i32) -> (i32, i32, i32) {
    %c0_i32 = arith.constant 0 : i32
    %c0_i32_0 = arith.constant 0 : i32
    %c0_i32_1 = arith.constant 0 : i32
    return %arg0, %c0_i32, %c0_i32_0 : i32, i32, i32
  }
  func.func @transform_2(%arg0: i32) -> (i32, i32) {
    %c0_i32 = arith.constant 0 : i32
    %c0_i32_0 = arith.constant 0 : i32
    %c0_i32_1 = arith.constant 0 : i32
    return %c0_i32, %c0_i32_0 : i32, i32
  }
  func.func @transform_3(%arg0: i32) -> (i32, i32, i32) {
    %c0_i32 = arith.constant 0 : i32
    %c0_i32_0 = arith.constant 0 : i32
    %c0_i32_1 = arith.constant 0 : i32
    return %arg0, %c0_i32, %c0_i32_0 : i32, i32, i32
  }
}

module attributes {stable_mosaic.version = 11 : i64} {
  func.func @_mm_kernel(%arg0: i32, %arg1: memref<64x32xf32, #tpu.memory_space<vmem>>, %arg2: memref<32x128xf32, #tpu.memory_space<vmem>>, %arg3: memref<1x128xf32, #tpu.memory_space<vmem>>, %arg4: memref<64x128xf32, #tpu.memory_space<vmem>>) attributes {dimension_semantics = [#tpu.dimension_semantics<parallel>], iteration_bounds = array<i64: 1>, scalar_prefetch = 0 : i64, scratch_operands = 0 : i64, tpu.core_type = #tpu.core_type<tc>, window_params = [{transform_indices = @transform_0, window_bounds = array<i64: 64, 32>}, {pipeline_mode = #tpu.pipeline_mode<synchronous>, transform_indices = @transform_1, window_bounds = array<i64: 32, 128>}, {pipeline_mode = #tpu.pipeline_mode<synchronous>, transform_indices = @transform_2, window_bounds = array<i64: 1, 128>}, {transform_indices = @transform_3, window_bounds = array<i64: 64, 128>}]} {
    %c0 = arith.constant 0 : index
    %c0_0 = arith.constant 0 : index
    %0 = vector.load %arg1[%c0, %c0_0] : memref<64x32xf32, #tpu.memory_space<vmem>>, vector<64x32xf32>
    %cst = arith.constant 0.000000e+00 : f32
    %1 = vector.broadcast %cst : f32 to vector<64x32xf32>
    %2 = arith.maximumf %0, %1 : vector<64x32xf32>
    %c0_1 = arith.constant 0 : index
    %c0_2 = arith.constant 0 : index
    %3 = vector.load %arg2[%c0_1, %c0_2] : memref<32x128xf32, #tpu.memory_space<vmem>>, vector<32x128xf32>
    %cst_3 = arith.constant dense<0.000000e+00> : vector<64x128xf32>
    %4 = tpu.matmul %2, %3, %cst_3 {dimension_numbers = #tpu.dot_dimension_numbers<[1], [0], [0], [1], [0, 0, 1, 1], [], []>} : vector<64x32xf32>, vector<32x128xf32>, vector<64x128xf32> -> vector<64x128xf32>
    %c0_4 = arith.constant 0 : index
    %c0_5 = arith.constant 0 : index
    %5 = vector.load %arg3[%c0_4, %c0_5] : memref<1x128xf32, #tpu.memory_space<vmem>>, vector<1x128xf32>
    %6 = vector.broadcast %5 : vector<1x128xf32> to vector<64x128xf32>
    %7 = arith.addf %4, %6 : vector<64x128xf32>
    %c0_6 = arith.constant 0 : index
    %c0_7 = arith.constant 0 : index
    %8 = vector.load %arg4[%c0_6, %c0_7] : memref<64x128xf32, #tpu.memory_space<vmem>>, vector<64x128xf32>
    tpu.vector_store %arg4[%c0_6, %c0_7], %7 {strides = array<i32>} : memref<64x128xf32, #tpu.memory_space<vmem>>, vector<64x128xf32>,
    return
  }
  func.func @transform_0(%arg0: i32) -> (i32, i32) {
    %c0_i32 = arith.constant 0 : i32
    %c0_i32_0 = arith.constant 0 : i32
    return %arg0, %c0_i32 : i32, i32
  }
  func.func @transform_1(%arg0: i32) -> (i32, i32) {
    %c0_i32 = arith.constant 0 : i32
    %c0_i32_0 = arith.constant 0 : i32
    %c0_i32_1 = arith.constant 0 : i32
    return %c0_i32, %c0_i32_0 : i32, i32
  }
  func.func @transform_2(%arg0: i32) -> (i32, i32) {
    %c0_i32 = arith.constant 0 : i32
    %c0_i32_0 = arith.constant 0 : i32
    %c0_i32_1 = arith.constant 0 : i32
    return %c0_i32, %c0_i32_0 : i32, i32
  }
  func.func @transform_3(%arg0: i32) -> (i32, i32) {
    %c0_i32 = arith.constant 0 : i32
    %c0_i32_0 = arith.constant 0 : i32
    return %arg0, %c0_i32 : i32, i32
  }
}

</mosaic_0001>

<bundles_post_ra>
// kernel: simple_lstm_forward.5
= control target key start
LH: loop header
LB: loop body
LE: loop exit
PB: predicated region body
PF: predicated region fallthrough
CT: control target
= control target key end

     0   :  { %s1255_s12 = smov 0   ;;  %s1547_s0 = inlined_call_operand.vmem [shape: bf16[1024,27], index: 0, kind: input, shape index: {}]   ;;  %s1548_s1 = inlined_call_operand.vmem [shape: bf16[27,32], index: 1, kind: input, shape index: {}]   ;;  %s1549_s2 = inlined_call_operand.vmem [shape: f32[1,32], index: 2, kind: input, shape index: {}]   ;;  %s1550_s3 = inlined_call_operand.vmem [shape: f32[1024,32], index: 3, kind: output, shape index: {}]  }
   0x1 LB: > { %s999_s13 = sadd.s32 4294967295, %s1232_s12   ;;  %p1003_p0 = scmp.ge.s32.totalorder %s1232_s12, 1  ;;  %s1232_s12 = sphi %s1255_s12, %s13_s12  }
   0x2   : > { %p138_p1 = scmp.lt.s32.totalorder %s1232_s12, 3 }
   0x4   : > { %p139_p2 = pnand %p1003_p0, %p138_p1 }
   0x5   : > { %v1192_v0 = vld [vmem:[%s1548_s1] sm:$0xff] (!%p139_p2)   ;;  %vm518_vm0 = vcmask (!%p139_p2), 1044480   ;;  %v1193_v1 = vld [vmem:[%s1548_s1 + $0x8] sm:$0x3f] (!%p139_p2)   ;;  %vm519_vm1 = vcmask (!%p139_p2), 1045504   ;;  %s1004_s18 = sshll.u32 (!%p139_p2), %s999_s13, 6 }
   0x6   : > { %142 = sbr.rel (%p139_p2) target bundleno = 295 (0x127), region = 32  ;;  %1111 = vmatprep.subr.bf16.mxu0 (!%p139_p2), %v1192_v0  ;;  %1179 = vmatprep.subr.bf16.mxu1 (!%p139_p2), %v1192_v0  ;;  %v1234_v2 = vmov (!%p139_p2), 65535   ;;  %p163_p3 = scmp.lt.s32.totalorder (!%p139_p2), %s1004_s18, 127  ;;  %vm421_vm2 = vcmask (!%p139_p2), 220160   ;;  %v1344_v38 = vld [vmem:[%s1549_s2] ss:$0 sm:$0xff] (!%p139_p2) }
   0x7   : > { %1112 = vmatpush3.bf16.msra.mxu0 (!%p139_p2), %v1192_v0  ;;  %1181 = vmatpush3.bf16.msra.mxu1 (!%p139_p2), %v1192_v0  ;;  %v520_v3 = vsel (!%p139_p2), %vm518_vm0, 4294967295, %v1234_v2  ;;  %vm878_vm3 = vcmask (!%p139_p2), 261120  }
   0x8   : > { %v521_v4 = vsel (!%p139_p2), %vm519_vm1, %v520_v3, 0 }
   0x9   : > { %v523_v5 = vand.u32 (!%p139_p2), %v1193_v1, %v521_v4 }
   0xb   : > { %1113 = vmatprep.subr.bf16.mxu0 (!%p139_p2), %v523_v5  ;;  %1180 = vmatprep.subr.bf16.mxu1 (!%p139_p2), %v523_v5 }
   0xc   : > { %1114 = vmatpush3.bf16.msra.mxu0 (!%p139_p2), %v523_v5  ;;  %1182 = vmatpush3.bf16.msra.mxu1 (!%p139_p2), %v523_v5 }
   0xd   : > { %s1552_s18 = smov (!%p163_p3, %s1004_s18), 127 }
   0xe   : > { %s1005_s19 = sshll.u32 %s1552_s18, 2  ;;  %s1007_s25 = sshll.u32 %s1552_s18, 3 }
   0xf   : > { %s1275_s22 = scalar_lea.vmem %s1547_s0, %s1005_s19  ;;  %s1351_s28 = scalar_lea.vmem %s1550_s3, %s1007_s25 }
  0x10   : > { %v1194_v6 = vld [vmem:[%s1275_s22] sm:$0xff]   ;;  %v1196_v8 = vld [vmem:[%s1275_s22 + $0x8] sm:$0xff]   ;;  %v1198_v10 = vld [vmem:[%s1275_s22 + $0x10] sm:$0xff]  }
  0x11   : > { %v1195_v7 = vld [vmem:[%s1275_s22 + $0x80] sm:$0xff]   ;;  %1115 = vmatprep.mubr.msk.bf16.mxu0 %vm421_vm2, %v1194_v6  ;;  %v1197_v9 = vld [vmem:[%s1275_s22 + $0x88] sm:$0xff]   ;;  %v1199_v11 = vld [vmem:[%s1275_s22 + $0x90] sm:$0xff]  }
  0x12   : > { %1147 = vmatprep.mubr.msk.bf16.mxu1 %vm421_vm2, %v1195_v7  ;;  %1116 = vmatmul.mubr.msk.bf16.vlgmr.msra.gmra.mrb[0].mxu0 %vm421_vm2, %v1196_v8  ;;  %v1200_v12 = vld [vmem:[%s1275_s22 + $0x18] sm:$0xff]   ;;  %v1202_v14 = vld [vmem:[%s1275_s22 + $0x20] sm:$0xff]   ;;  %v1204_v16 = vld [vmem:[%s1275_s22 + $0x28] sm:$0xff]  }
  0x13   : > { %1148 = vmatmul.mubr.msk.bf16.vlgmr.msra.gmra.mrb[0].mxu1 %vm421_vm2, %v1197_v9  ;;  %1119 = vmatprep.mubr.msk.bf16.mxu0 %vm421_vm2, %v1198_v10  ;;  %v1201_v13 = vld [vmem:[%s1275_s22 + $0x98] sm:$0xff]   ;;  %v1203_v15 = vld [vmem:[%s1275_s22 + $0xa0] sm:$0xff]   ;;  %v1205_v17 = vld [vmem:[%s1275_s22 + $0xa8] sm:$0xff]  }
  0x14   : > { %1151 = vmatprep.mubr.msk.bf16.mxu1 %vm421_vm2, %v1199_v11  ;;  %v1206_v18 = vld [vmem:[%s1275_s22 + $0x30] sm:$0xff]   ;;  %v1208_v20 = vld [vmem:[%s1275_s22 + $0x38] sm:$0xff]   ;;  %v1210_v22 = vld [vmem:[%s1275_s22 + $0x40] sm:$0xff]  }
  0x15   : > { %v1207_v19 = vld [vmem:[%s1275_s22 + $0xb0] sm:$0xff]   ;;  %v1209_v21 = vld [vmem:[%s1275_s22 + $0xb8] sm:$0xff]   ;;  %v1211_v23 = vld [vmem:[%s1275_s22 + $0xc0] sm:$0xff]  }
  0x16   : > { %v1212_v24 = vld [vmem:[%s1275_s22 + $0x48] sm:$0xff]   ;;  %v1214_v26 = vld [vmem:[%s1275_s22 + $0x50] sm:$0xff]   ;;  %v1216_v28 = vld [vmem:[%s1275_s22 + $0x58] sm:$0xff]  }
  0x17   : > { %v1213_v25 = vld [vmem:[%s1275_s22 + $0xc8] sm:$0xff]   ;;  %v1215_v27 = vld [vmem:[%s1275_s22 + $0xd0] sm:$0xff]   ;;  %v1217_v29 = vld [vmem:[%s1275_s22 + $0xd8] sm:$0xff]  }
  0x18   : > { %v1218_v30 = vld [vmem:[%s1275_s22 + $0x60] sm:$0xff]   ;;  %v1220_v32 = vld [vmem:[%s1275_s22 + $0x68] sm:$0xff]   ;;  %v1222_v34 = vld [vmem:[%s1275_s22 + $0x70] sm:$0xff]  }
  0x19   : > { %v1219_v31 = vld [vmem:[%s1275_s22 + $0xe0] sm:$0xff]   ;;  %v1221_v33 = vld [vmem:[%s1275_s22 + $0xe8] sm:$0xff]   ;;  %v1223_v35 = vld [vmem:[%s1275_s22 + $0xf0] sm:$0xff]  }
  0x1a   : > { %1120 = vmatmul.mubr.msk.bf16.gmra.mrb[4].mxu0 %vm421_vm2, %v1200_v12  ;;  %v1224_v36 = vld [vmem:[%s1275_s22 + $0x78] sm:$0xff]  }
  0x1b   : > { %1152 = vmatmul.mubr.msk.bf16.gmra.mrb[4].mxu1 %vm421_vm2, %v1201_v13  ;;  %1123 = vmatprep.mubr.msk.bf16.mxu0 %vm421_vm2, %v1202_v14  ;;  %v1225_v37 = vld [vmem:[%s1275_s22 + $0xf8] sm:$0xff]  }
  0x1c   : > { %1155 = vmatprep.mubr.msk.bf16.mxu1 %vm421_vm2, %v1203_v15 }
  0x22   : > { %1124 = vmatmul.mubr.msk.bf16.gmra.mrb[8].mxu0 %vm421_vm2, %v1204_v16 }
  0x23   : > { %1156 = vmatmul.mubr.msk.bf16.gmra.mrb[8].mxu1 %vm421_vm2, %v1205_v17  ;;  %1127 = vmatprep.mubr.msk.bf16.mxu0 %vm421_vm2, %v1206_v18 }
  0x24   : > { %1159 = vmatprep.mubr.msk.bf16.mxu1 %vm421_vm2, %v1207_v19 }
  0x2a   : > { %1128 = vmatmul.mubr.msk.bf16.gmra.mrb[12].mxu0 %vm421_vm2, %v1208_v20 }
  0x2b   : > { %1160 = vmatmul.mubr.msk.bf16.gmra.mrb[12].mxu1 %vm421_vm2, %v1209_v21  ;;  %1131 = vmatprep.mubr.msk.bf16.mxu0 %vm421_vm2, %v1210_v22 }
  0x2c   : > { %1163 = vmatprep.mubr.msk.bf16.mxu1 %vm421_vm2, %v1211_v23 }
  0x32   : > { %1132 = vmatmul.mubr.msk.bf16.gmra.mrb[16].mxu0 %vm421_vm2, %v1212_v24 }
  0x33   : > { %1164 = vmatmul.mubr.msk.bf16.gmra.mrb[16].mxu1 %vm421_vm2, %v1213_v25  ;;  %1135 = vmatprep.mubr.msk.bf16.mxu0 %vm421_vm2, %v1214_v26 }
  0x34   : > { %1167 = vmatprep.mubr.msk.bf16.mxu1 %vm421_vm2, %v1215_v27 }
  0x3a   : > { %1136 = vmatmul.mubr.msk.bf16.gmra.mrb[20].mxu0 %vm421_vm2, %v1216_v28 }
  0x3b   : > { %1168 = vmatmul.mubr.msk.bf16.gmra.mrb[20].mxu1 %vm421_vm2, %v1217_v29  ;;  %1139 = vmatprep.mubr.msk.bf16.mxu0 %vm421_vm2, %v1218_v30 }
  0x3c   : > { %1171 = vmatprep.mubr.msk.bf16.mxu1 %vm421_vm2, %v1219_v31 }
  0x42   : > { %1140 = vmatmul.mubr.msk.bf16.gmra.mrb[24].mxu0 %vm421_vm2, %v1220_v32 }
  0x43   : > { %1172 = vmatmul.mubr.msk.bf16.gmra.mrb[24].mxu1 %vm421_vm2, %v1221_v33  ;;  %1143 = vmatprep.mubr.msk.bf16.mxu0 %vm421_vm2, %v1222_v34 }
  0x44   : > { %1175 = vmatprep.mubr.msk.bf16.mxu1 %vm421_vm2, %v1223_v35 }
  0x4a   : > { %1144 = vmatmul.mubr.msk.bf16.gmra.mrb[28].mxu0 %vm421_vm2, %v1224_v36 }
  0x4b   : > { %1176 = vmatmul.mubr.msk.bf16.gmra.mrb[28].mxu1 %vm421_vm2, %v1225_v37 }
  0xe5   : > { %v1117_v39 = vpop.f32.mrb[0].mxu0 }
  0xe6   : > { %v568_v40 = vadd.f32 %v1117_v39, %v1344_v38  ;;  %v1149_v41 = vpop.f32.mrb[0].mxu1  ;;  %v559_v42 = vpop.f32.mrb[1].mxu0 }
  0xe7   : > { %v696_v43 = vadd.f32 %v1149_v41, %v1344_v38  ;;  %v560_v44 = vadd.f32 %v1344_v38, %v559_v42  ;;  %v687_v45 = vpop.f32.mrb[1].mxu1  ;;  %v1118_v46 = vpop.f32.mrb[2].mxu0 }
  0xe8   : > { %v816_v47 = vmax.f32 %v568_v40, 0.0  ;;  %v688_v48 = vadd.f32 %v1344_v38, %v687_v45  ;;  %v571_v49 = vadd.f32 %v1118_v46, %v1344_v38  ;;  %v1150_v50 = vpop.f32.mrb[2].mxu1  ;;  %v562_v51 = vpop.f32.mrb[3].mxu0 }
  0xe9   : > { %v848_v52 = vmax.f32 %v696_v43, 0.0  ;;  %v814_v53 = vmax.f32 %v560_v44, 0.0  ;;  %v699_v54 = vadd.f32 %v1150_v50, %v1344_v38  ;;  %v563_v55 = vadd.f32 %v1344_v38, %v562_v51  ;;  %v690_v56 = vpop.f32.mrb[3].mxu1 }
  0xea   : > { %881 = vst.msk [vmem:[%s1351_s28 + $0x10] sm:$0xff] %vm878_vm3, %v816_v47  ;;  %v846_v57 = vmax.f32 %v688_v48, 0.0  ;;  %v817_v58 = vmax.f32 %v571_v49, 0.0  ;;  %v691_v59 = vadd.f32 %v1344_v38, %v690_v56 }
  0xeb   : > { %913 = vst.msk [vmem:[%s1351_s28 + $0x110] sm:$0xff] %vm878_vm3, %v848_v52  ;;  %879 = vst.msk [vmem:[%s1351_s28] sm:$0xff] %vm878_vm3, %v814_v53  ;;  %v849_v60 = vmax.f32 %v699_v54, 0.0  ;;  %v815_v61 = vmax.f32 %v563_v55, 0.0 }
  0xec   : > { %911 = vst.msk [vmem:[%s1351_s28 + $0x100] sm:$0xff] %vm878_vm3, %v846_v57  ;;  %882 = vst.msk [vmem:[%s1351_s28 + $0x18] sm:$0xff] %vm878_vm3, %v817_v58  ;;  %v847_v62 = vmax.f32 %v691_v59, 0.0 }
  0xed   : > { %914 = vst.msk [vmem:[%s1351_s28 + $0x118] sm:$0xff] %vm878_vm3, %v849_v60  ;;  %880 = vst.msk [vmem:[%s1351_s28 + $0x8] sm:$0xff] %vm878_vm3, %v815_v61  ;;  %v1121_v63 = vpop.f32.mrb[4].mxu0 }
  0xee   : > { %912 = vst.msk [vmem:[%s1351_s28 + $0x108] sm:$0xff] %vm878_vm3, %v847_v62  ;;  %v584_v0 = vadd.f32 %v1121_v63, %v1344_v38  ;;  %v1153_v1 = vpop.f32.mrb[4].mxu1  ;;  %v575_v2 = vpop.f32.mrb[5].mxu0 }
  0xef   : > { %v712_v3 = vadd.f32 %v1153_v1, %v1344_v38  ;;  %v576_v4 = vadd.f32 %v1344_v38, %v575_v2  ;;  %v703_v5 = vpop.f32.mrb[5].mxu1  ;;  %v1122_v6 = vpop.f32.mrb[6].mxu0 }
  0xf0   : > { %v820_v7 = vmax.f32 %v584_v0, 0.0  ;;  %v704_v8 = vadd.f32 %v1344_v38, %v703_v5  ;;  %v587_v9 = vadd.f32 %v1122_v6, %v1344_v38  ;;  %v1154_v10 = vpop.f32.mrb[6].mxu1  ;;  %v578_v11 = vpop.f32.mrb[7].mxu0 }
  0xf1   : > { %v852_v12 = vmax.f32 %v712_v3, 0.0  ;;  %v818_v13 = vmax.f32 %v576_v4, 0.0  ;;  %v715_v14 = vadd.f32 %v1154_v10, %v1344_v38  ;;  %v579_v15 = vadd.f32 %v1344_v38, %v578_v11  ;;  %v706_v16 = vpop.f32.mrb[7].mxu1 }
  0xf2   : > { %885 = vst.msk [vmem:[%s1351_s28 + $0x30] sm:$0xff] %vm878_vm3, %v820_v7  ;;  %v850_v17 = vmax.f32 %v704_v8, 0.0  ;;  %v821_v18 = vmax.f32 %v587_v9, 0.0  ;;  %v707_v19 = vadd.f32 %v1344_v38, %v706_v16 }
  0xf3   : > { %917 = vst.msk [vmem:[%s1351_s28 + $0x130] sm:$0xff] %vm878_vm3, %v852_v12  ;;  %883 = vst.msk [vmem:[%s1351_s28 + $0x20] sm:$0xff] %vm878_vm3, %v818_v13  ;;  %v853_v20 = vmax.f32 %v715_v14, 0.0  ;;  %v819_v21 = vmax.f32 %v579_v15, 0.0 }
  0xf4   : > { %915 = vst.msk [vmem:[%s1351_s28 + $0x120] sm:$0xff] %vm878_vm3, %v850_v17  ;;  %886 = vst.msk [vmem:[%s1351_s28 + $0x38] sm:$0xff] %vm878_vm3, %v821_v18  ;;  %v851_v22 = vmax.f32 %v707_v19, 0.0 }
  0xf5   : > { %918 = vst.msk [vmem:[%s1351_s28 + $0x138] sm:$0xff] %vm878_vm3, %v853_v20  ;;  %884 = vst.msk [vmem:[%s1351_s28 + $0x28] sm:$0xff] %vm878_vm3, %v819_v21  ;;  %v1125_v23 = vpop.f32.mrb[8].mxu0 }
  0xf6   : > { %916 = vst.msk [vmem:[%s1351_s28 + $0x128] sm:$0xff] %vm878_vm3, %v851_v22  ;;  %v600_v24 = vadd.f32 %v1125_v23, %v1344_v38  ;;  %v1157_v25 = vpop.f32.mrb[8].mxu1  ;;  %v591_v26 = vpop.f32.mrb[9].mxu0 }
  0xf7   : > { %v728_v27 = vadd.f32 %v1157_v25, %v1344_v38  ;;  %v592_v28 = vadd.f32 %v1344_v38, %v591_v26  ;;  %v719_v29 = vpop.f32.mrb[9].mxu1  ;;  %v1126_v30 = vpop.f32.mrb[10].mxu0 }
  0xf8   : > { %v824_v31 = vmax.f32 %v600_v24, 0.0  ;;  %v720_v32 = vadd.f32 %v1344_v38, %v719_v29  ;;  %v603_v33 = vadd.f32 %v1126_v30, %v1344_v38  ;;  %v1158_v34 = vpop.f32.mrb[10].mxu1  ;;  %v594_v35 = vpop.f32.mrb[11].mxu0 }
  0xf9   : > { %v856_v36 = vmax.f32 %v728_v27, 0.0  ;;  %v822_v37 = vmax.f32 %v592_v28, 0.0  ;;  %v731_v39 = vadd.f32 %v1158_v34, %v1344_v38  ;;  %v595_v40 = vadd.f32 %v1344_v38, %v594_v35  ;;  %v722_v41 = vpop.f32.mrb[11].mxu1 }
  0xfa   : > { %889 = vst.msk [vmem:[%s1351_s28 + $0x50] sm:$0xff] %vm878_vm3, %v824_v31  ;;  %v854_v42 = vmax.f32 %v720_v32, 0.0  ;;  %v825_v43 = vmax.f32 %v603_v33, 0.0  ;;  %v723_v44 = vadd.f32 %v1344_v38, %v722_v41 }
  0xfb   : > { %921 = vst.msk [vmem:[%s1351_s28 + $0x150] sm:$0xff] %vm878_vm3, %v856_v36  ;;  %887 = vst.msk [vmem:[%s1351_s28 + $0x40] sm:$0xff] %vm878_vm3, %v822_v37  ;;  %v857_v45 = vmax.f32 %v731_v39, 0.0  ;;  %v823_v46 = vmax.f32 %v595_v40, 0.0 }
  0xfc   : > { %919 = vst.msk [vmem:[%s1351_s28 + $0x140] sm:$0xff] %vm878_vm3, %v854_v42  ;;  %890 = vst.msk [vmem:[%s1351_s28 + $0x58] sm:$0xff] %vm878_vm3, %v825_v43  ;;  %v855_v47 = vmax.f32 %v723_v44, 0.0 }
  0xfd   : > { %922 = vst.msk [vmem:[%s1351_s28 + $0x158] sm:$0xff] %vm878_vm3, %v857_v45  ;;  %888 = vst.msk [vmem:[%s1351_s28 + $0x48] sm:$0xff] %vm878_vm3, %v823_v46  ;;  %v1129_v48 = vpop.f32.mrb[12].mxu0 }
  0xfe   : > { %920 = vst.msk [vmem:[%s1351_s28 + $0x148] sm:$0xff] %vm878_vm3, %v855_v47  ;;  %v616_v49 = vadd.f32 %v1129_v48, %v1344_v38  ;;  %v1161_v50 = vpop.f32.mrb[12].mxu1  ;;  %v607_v51 = vpop.f32.mrb[13].mxu0 }
  0xff   : > { %v744_v52 = vadd.f32 %v1161_v50, %v1344_v38  ;;  %v608_v53 = vadd.f32 %v1344_v38, %v607_v51  ;;  %v735_v54 = vpop.f32.mrb[13].mxu1  ;;  %v1130_v55 = vpop.f32.mrb[14].mxu0 }
 0x100   : > { %v828_v56 = vmax.f32 %v616_v49, 0.0  ;;  %v736_v57 = vadd.f32 %v1344_v38, %v735_v54  ;;  %v619_v58 = vadd.f32 %v1130_v55, %v1344_v38  ;;  %v1162_v59 = vpop.f32.mrb[14].mxu1  ;;  %v610_v60 = vpop.f32.mrb[15].mxu0 }
 0x101   : > { %v860_v61 = vmax.f32 %v744_v52, 0.0  ;;  %v826_v62 = vmax.f32 %v608_v53, 0.0  ;;  %v747_v63 = vadd.f32 %v1162_v59, %v1344_v38  ;;  %v611_v0 = vadd.f32 %v1344_v38, %v610_v60  ;;  %v738_v1 = vpop.f32.mrb[15].mxu1 }
 0x102   : > { %893 = vst.msk [vmem:[%s1351_s28 + $0x70] sm:$0xff] %vm878_vm3, %v828_v56  ;;  %v858_v2 = vmax.f32 %v736_v57, 0.0  ;;  %v829_v3 = vmax.f32 %v619_v58, 0.0  ;;  %v739_v4 = vadd.f32 %v1344_v38, %v738_v1 }
 0x103   : > { %925 = vst.msk [vmem:[%s1351_s28 + $0x170] sm:$0xff] %vm878_vm3, %v860_v61  ;;  %891 = vst.msk [vmem:[%s1351_s28 + $0x60] sm:$0xff] %vm878_vm3, %v826_v62  ;;  %v861_v5 = vmax.f32 %v747_v63, 0.0  ;;  %v827_v6 = vmax.f32 %v611_v0, 0.0 }
 0x104   : > { %923 = vst.msk [vmem:[%s1351_s28 + $0x160] sm:$0xff] %vm878_vm3, %v858_v2  ;;  %894 = vst.msk [vmem:[%s1351_s28 + $0x78] sm:$0xff] %vm878_vm3, %v829_v3  ;;  %v859_v7 = vmax.f32 %v739_v4, 0.0 }
 0x105   : > { %926 = vst.msk [vmem:[%s1351_s28 + $0x178] sm:$0xff] %vm878_vm3, %v861_v5  ;;  %892 = vst.msk [vmem:[%s1351_s28 + $0x68] sm:$0xff] %vm878_vm3, %v827_v6  ;;  %v1133_v8 = vpop.f32.mrb[16].mxu0 }
 0x106   : > { %924 = vst.msk [vmem:[%s1351_s28 + $0x168] sm:$0xff] %vm878_vm3, %v859_v7  ;;  %v632_v9 = vadd.f32 %v1133_v8, %v1344_v38  ;;  %v1165_v10 = vpop.f32.mrb[16].mxu1  ;;  %v623_v11 = vpop.f32.mrb[17].mxu0 }
 0x107   : > { %v760_v12 = vadd.f32 %v1165_v10, %v1344_v38  ;;  %v624_v13 = vadd.f32 %v1344_v38, %v623_v11  ;;  %v751_v14 = vpop.f32.mrb[17].mxu1  ;;  %v1134_v15 = vpop.f32.mrb[18].mxu0 }
 0x108   : > { %v832_v16 = vmax.f32 %v632_v9, 0.0  ;;  %v752_v17 = vadd.f32 %v1344_v38, %v751_v14  ;;  %v635_v18 = vadd.f32 %v1134_v15, %v1344_v38  ;;  %v1166_v19 = vpop.f32.mrb[18].mxu1  ;;  %v626_v20 = vpop.f32.mrb[19].mxu0 }
 0x109   : > { %v864_v21 = vmax.f32 %v760_v12, 0.0  ;;  %v830_v22 = vmax.f32 %v624_v13, 0.0  ;;  %v763_v23 = vadd.f32 %v1166_v19, %v1344_v38  ;;  %v627_v24 = vadd.f32 %v1344_v38, %v626_v20  ;;  %v754_v25 = vpop.f32.mrb[19].mxu1 }
 0x10a   : > { %897 = vst.msk [vmem:[%s1351_s28 + $0x90] sm:$0xff] %vm878_vm3, %v832_v16  ;;  %v862_v26 = vmax.f32 %v752_v17, 0.0  ;;  %v833_v27 = vmax.f32 %v635_v18, 0.0  ;;  %v755_v28 = vadd.f32 %v1344_v38, %v754_v25 }
 0x10b   : > { %929 = vst.msk [vmem:[%s1351_s28 + $0x190] sm:$0xff] %vm878_vm3, %v864_v21  ;;  %895 = vst.msk [vmem:[%s1351_s28 + $0x80] sm:$0xff] %vm878_vm3, %v830_v22  ;;  %v865_v29 = vmax.f32 %v763_v23, 0.0  ;;  %v831_v30 = vmax.f32 %v627_v24, 0.0 }
 0x10c   : > { %927 = vst.msk [vmem:[%s1351_s28 + $0x180] sm:$0xff] %vm878_vm3, %v862_v26  ;;  %898 = vst.msk [vmem:[%s1351_s28 + $0x98] sm:$0xff] %vm878_vm3, %v833_v27  ;;  %v863_v31 = vmax.f32 %v755_v28, 0.0 }
 0x10d   : > { %930 = vst.msk [vmem:[%s1351_s28 + $0x198] sm:$0xff] %vm878_vm3, %v865_v29  ;;  %896 = vst.msk [vmem:[%s1351_s28 + $0x88] sm:$0xff] %vm878_vm3, %v831_v30  ;;  %v1137_v32 = vpop.f32.mrb[20].mxu0 }
 0x10e   : > { %928 = vst.msk [vmem:[%s1351_s28 + $0x188] sm:$0xff] %vm878_vm3, %v863_v31  ;;  %v648_v33 = vadd.f32 %v1137_v32, %v1344_v38  ;;  %v1169_v34 = vpop.f32.mrb[20].mxu1  ;;  %v639_v35 = vpop.f32.mrb[21].mxu0 }
 0x10f   : > { %v776_v36 = vadd.f32 %v1169_v34, %v1344_v38  ;;  %v640_v37 = vadd.f32 %v1344_v38, %v639_v35  ;;  %v767_v39 = vpop.f32.mrb[21].mxu1  ;;  %v1138_v40 = vpop.f32.mrb[22].mxu0 }
 0x110   : > { %v836_v41 = vmax.f32 %v648_v33, 0.0  ;;  %v768_v42 = vadd.f32 %v1344_v38, %v767_v39  ;;  %v651_v43 = vadd.f32 %v1138_v40, %v1344_v38  ;;  %v1170_v44 = vpop.f32.mrb[22].mxu1  ;;  %v642_v45 = vpop.f32.mrb[23].mxu0 }
 0x111   : > { %v868_v46 = vmax.f32 %v776_v36, 0.0  ;;  %v834_v47 = vmax.f32 %v640_v37, 0.0  ;;  %v779_v48 = vadd.f32 %v1170_v44, %v1344_v38  ;;  %v643_v49 = vadd.f32 %v1344_v38, %v642_v45  ;;  %v770_v50 = vpop.f32.mrb[23].mxu1 }
 0x112   : > { %901 = vst.msk [vmem:[%s1351_s28 + $0xb0] sm:$0xff] %vm878_vm3, %v836_v41  ;;  %v866_v51 = vmax.f32 %v768_v42, 0.0  ;;  %v837_v52 = vmax.f32 %v651_v43, 0.0  ;;  %v771_v53 = vadd.f32 %v1344_v38, %v770_v50 }
 0x113   : > { %933 = vst.msk [vmem:[%s1351_s28 + $0x1b0] sm:$0xff] %vm878_vm3, %v868_v46  ;;  %899 = vst.msk [vmem:[%s1351_s28 + $0xa0] sm:$0xff] %vm878_vm3, %v834_v47  ;;  %v869_v54 = vmax.f32 %v779_v48, 0.0  ;;  %v835_v55 = vmax.f32 %v643_v49, 0.0 }
 0x114   : > { %931 = vst.msk [vmem:[%s1351_s28 + $0x1a0] sm:$0xff] %vm878_vm3, %v866_v51  ;;  %902 = vst.msk [vmem:[%s1351_s28 + $0xb8] sm:$0xff] %vm878_vm3, %v837_v52  ;;  %v867_v56 = vmax.f32 %v771_v53, 0.0 }
 0x115   : > { %934 = vst.msk [vmem:[%s1351_s28 + $0x1b8] sm:$0xff] %vm878_vm3, %v869_v54  ;;  %900 = vst.msk [vmem:[%s1351_s28 + $0xa8] sm:$0xff] %vm878_vm3, %v835_v55  ;;  %v1141_v57 = vpop.f32.mrb[24].mxu0 }
 0x116   : > { %932 = vst.msk [vmem:[%s1351_s28 + $0x1a8] sm:$0xff] %vm878_vm3, %v867_v56  ;;  %v664_v58 = vadd.f32 %v1141_v57, %v1344_v38  ;;  %v1173_v59 = vpop.f32.mrb[24].mxu1  ;;  %v655_v60 = vpop.f32.mrb[25].mxu0 }
 0x117   : > { %v792_v61 = vadd.f32 %v1173_v59, %v1344_v38  ;;  %v656_v62 = vadd.f32 %v1344_v38, %v655_v60  ;;  %v783_v63 = vpop.f32.mrb[25].mxu1  ;;  %v1142_v0 = vpop.f32.mrb[26].mxu0 }
 0x118   : > { %v840_v1 = vmax.f32 %v664_v58, 0.0  ;;  %v784_v2 = vadd.f32 %v1344_v38, %v783_v63  ;;  %v667_v3 = vadd.f32 %v1142_v0, %v1344_v38  ;;  %v1174_v4 = vpop.f32.mrb[26].mxu1  ;;  %v658_v5 = vpop.f32.mrb[27].mxu0 }
 0x119   : > { %v872_v6 = vmax.f32 %v792_v61, 0.0  ;;  %v838_v7 = vmax.f32 %v656_v62, 0.0  ;;  %v795_v8 = vadd.f32 %v1174_v4, %v1344_v38  ;;  %v659_v9 = vadd.f32 %v1344_v38, %v658_v5  ;;  %v786_v10 = vpop.f32.mrb[27].mxu1 }
 0x11a   : > { %905 = vst.msk [vmem:[%s1351_s28 + $0xd0] sm:$0xff] %vm878_vm3, %v840_v1  ;;  %v870_v11 = vmax.f32 %v784_v2, 0.0  ;;  %v841_v12 = vmax.f32 %v667_v3, 0.0  ;;  %v787_v13 = vadd.f32 %v1344_v38, %v786_v10 }
 0x11b   : > { %937 = vst.msk [vmem:[%s1351_s28 + $0x1d0] sm:$0xff] %vm878_vm3, %v872_v6  ;;  %903 = vst.msk [vmem:[%s1351_s28 + $0xc0] sm:$0xff] %vm878_vm3, %v838_v7  ;;  %v873_v14 = vmax.f32 %v795_v8, 0.0  ;;  %v839_v15 = vmax.f32 %v659_v9, 0.0 }
 0x11c   : > { %935 = vst.msk [vmem:[%s1351_s28 + $0x1c0] sm:$0xff] %vm878_vm3, %v870_v11  ;;  %906 = vst.msk [vmem:[%s1351_s28 + $0xd8] sm:$0xff] %vm878_vm3, %v841_v12  ;;  %v871_v16 = vmax.f32 %v787_v13, 0.0 }
 0x11d   : > { %938 = vst.msk [vmem:[%s1351_s28 + $0x1d8] sm:$0xff] %vm878_vm3, %v873_v14  ;;  %904 = vst.msk [vmem:[%s1351_s28 + $0xc8] sm:$0xff] %vm878_vm3, %v839_v15  ;;  %v1145_v17 = vpop.f32.mrb[28].mxu0 }
 0x11e   : > { %936 = vst.msk [vmem:[%s1351_s28 + $0x1c8] sm:$0xff] %vm878_vm3, %v871_v16  ;;  %v680_v18 = vadd.f32 %v1145_v17, %v1344_v38  ;;  %v1177_v19 = vpop.f32.mrb[28].mxu1  ;;  %v671_v20 = vpop.f32.mrb[29].mxu0 }
 0x11f   : > { %v808_v21 = vadd.f32 %v1177_v19, %v1344_v38  ;;  %v672_v22 = vadd.f32 %v1344_v38, %v671_v20  ;;  %v799_v23 = vpop.f32.mrb[29].mxu1  ;;  %v1146_v24 = vpop.f32.mrb[30].mxu0 }
 0x120   : > { %v844_v25 = vmax.f32 %v680_v18, 0.0  ;;  %v800_v26 = vadd.f32 %v1344_v38, %v799_v23  ;;  %v683_v27 = vadd.f32 %v1146_v24, %v1344_v38  ;;  %v1178_v28 = vpop.f32.mrb[30].mxu1  ;;  %v674_v29 = vpop.f32.mrb[31].mxu0 }
 0x121   : > { %v876_v30 = vmax.f32 %v808_v21, 0.0  ;;  %v842_v31 = vmax.f32 %v672_v22, 0.0  ;;  %v811_v32 = vadd.f32 %v1178_v28, %v1344_v38  ;;  %v675_v33 = vadd.f32 %v1344_v38, %v674_v29  ;;  %v802_v34 = vpop.f32.mrb[31].mxu1 }
 0x122   : > { %909 = vst.msk [vmem:[%s1351_s28 + $0xf0] sm:$0xff] %vm878_vm3, %v844_v25  ;;  %v874_v35 = vmax.f32 %v800_v26, 0.0  ;;  %v845_v36 = vmax.f32 %v683_v27, 0.0  ;;  %v803_v37 = vadd.f32 %v1344_v38, %v802_v34 }
 0x123   : > { %941 = vst.msk [vmem:[%s1351_s28 + $0x1f0] sm:$0xff] %vm878_vm3, %v876_v30  ;;  %907 = vst.msk [vmem:[%s1351_s28 + $0xe0] sm:$0xff] %vm878_vm3, %v842_v31  ;;  %v877_v39 = vmax.f32 %v811_v32, 0.0  ;;  %v843_v40 = vmax.f32 %v675_v33, 0.0 }
 0x124   : > { %939 = vst.msk [vmem:[%s1351_s28 + $0x1e0] sm:$0xff] %vm878_vm3, %v874_v35  ;;  %910 = vst.msk [vmem:[%s1351_s28 + $0xf8] sm:$0xff] %vm878_vm3, %v845_v36  ;;  %v875_v41 = vmax.f32 %v803_v37, 0.0 }
 0x125   : > { %942 = vst.msk [vmem:[%s1351_s28 + $0x1f8] sm:$0xff] %vm878_vm3, %v877_v39  ;;  %908 = vst.msk [vmem:[%s1351_s28 + $0xe8] sm:$0xff] %vm878_vm3, %v843_v40 }
 0x126   : > { %940 = vst.msk [vmem:[%s1351_s28 + $0x1e8] sm:$0xff] %vm878_vm3, %v875_v41 }
 0x127 PF: > { %s13_s12 = sadd.s32 1, %s1232_s12  }
 0x128   : > { %p10_p4 = scmp.ge.s32.totalorder %s13_s12, 4  }
 0x12a   :  { %12 = sbr.rel (!%p10_p4) target bundleno = 1 (0x1), region = 62 }

// kernel: simple_lstm_forward.6
= control target key start
LH: loop header
LB: loop body
LE: loop exit
PB: predicated region body
PF: predicated region fallthrough
CT: control target
= control target key end

     0   :  { %s2274_s12 = smov 0   ;;  %s2836_s0 = inlined_call_operand.vmem [shape: bf16[1024,288], index: 0, kind: input, shape index: {}]   ;;  %s2837_s1 = inlined_call_operand.vmem [shape: bf16[288,48], index: 1, kind: input, shape index: {}]   ;;  %s2838_s2 = inlined_call_operand.vmem [shape: f32[1,48], index: 2, kind: input, shape index: {}]   ;;  %s2839_s3 = inlined_call_operand.vmem [shape: f32[1024,48], index: 3, kind: output, shape index: {}]  }
   0x1 LB: > { %s1797_s13 = sadd.s32 4294967295, %s2251_s12   ;;  %p1801_p0 = scmp.ge.s32.totalorder %s2251_s12, 1  ;;  %s2251_s12 = sphi %s2274_s12, %s13_s12  }
   0x2   : > { %p139_p1 = scmp.lt.s32.totalorder %s2251_s12, 3 }
   0x4   : > { %p140_p2 = pnand %p1801_p0, %p139_p1 }
   0x5   : > { %v2099_v0 = vld [vmem:[%s2837_s1] sm:$0xff] (!%p140_p2)   ;;  %v2253_v1 = vmov (!%p140_p2), 0   ;;  %s1802_s16 = sshll.u32 (!%p140_p2), %s1797_s13, 6  ;;  %v2100_v2 = vld [vmem:[%s2837_s1 + $0x8] sm:$0xff] (!%p140_p2)   ;;  %v2101_v3 = vld [vmem:[%s2837_s1 + $0x10] sm:$0xff] (!%p140_p2)   ;;  %vm937_vm0 = vcmask (!%p140_p2), 261120  }
   0x6   : > { %143 = sbr.rel (%p140_p2) target bundleno = 475 (0x1db), region = 32  ;;  %1034 = vmatprep.subr.bf16.mxu0 (!%p140_p2), %v2253_v1  ;;  %2057 = vmatprep.subr.bf16.mxu1 (!%p140_p2), %v2253_v1  ;;  %p165_p3 = scmp.lt.s32.totalorder (!%p140_p2), %s1802_s16, 127  ;;  %v2102_v4 = vld [vmem:[%s2837_s1 + $0x18] sm:$0xff] (!%p140_p2)   ;;  %v2103_v5 = vld [vmem:[%s2837_s1 + $0x20] sm:$0xff] (!%p140_p2)   ;;  %v2104_v7 = vld [vmem:[%s2837_s1 + $0x28] sm:$0xff] (!%p140_p2)   ;;  %vm1676_vm1 = vcmask (!%p140_p2), 392192  }
   0x7   : > { %1035 = vmatpush1.bf16.msra.mxu0 (!%p140_p2), %v2099_v0  ;;  %2073 = vmatpush1.bf16.msra.mxu1 (!%p140_p2), %v2099_v0  ;;  %v2105_v9 = vld [vmem:[%s2837_s1 + $0x30] sm:$0xff] (!%p140_p2)   ;;  %v2106_v10 = vld [vmem:[%s2837_s1 + $0x38] sm:$0xff] (!%p140_p2)   ;;  %v2107_v11 = vld [vmem:[%s2837_s1 + $0x40] sm:$0xff] (!%p140_p2)  }
   0x8   : > { %1036 = vmatprep.subr.bf16.mxu0 (!%p140_p2), %v2253_v1  ;;  %2058 = vmatprep.subr.bf16.mxu1 (!%p140_p2), %v2253_v1  ;;  %v2108_v12 = vld [vmem:[%s2837_s1 + $0x48] sm:$0xff] (!%p140_p2)   ;;  %v2109_v13 = vld [vmem:[%s2837_s1 + $0x50] sm:$0xff] (!%p140_p2)   ;;  %v2110_v14 = vld [vmem:[%s2837_s1 + $0x58] sm:$0xff] (!%p140_p2)  }
   0x9   : > { %v2111_v15 = vld [vmem:[%s2837_s1 + $0x60] sm:$0xff] (!%p140_p2)   ;;  %v2112_v16 = vld [vmem:[%s2837_s1 + $0x68] sm:$0xff] (!%p140_p2)   ;;  %v2113_v17 = vld [vmem:[%s2837_s1 + $0x70] sm:$0xff] (!%p140_p2)  }
   0xa   : > { %v2114_v18 = vld [vmem:[%s2837_s1 + $0x78] sm:$0xff] (!%p140_p2)   ;;  %v2121_v19 = vld [vmem:[%s2837_s1 + $0x80] sm:$0xff] (!%p140_p2)   ;;  %v2146_v24 = vld [vmem:[%s2837_s1 + $0x88] sm:$0xff] (!%p140_p2)  }
   0xb   : > { %1037 = vmatpush1.bf16.msra.mxu0 (!%p140_p2), %v2100_v2  ;;  %2074 = vmatpush1.bf16.msra.mxu1 (!%p140_p2), %v2100_v2 }
   0xc   : > { %1038 = vmatprep.subr.bf16.mxu0 (!%p140_p2), %v2253_v1  ;;  %2059 = vmatprep.subr.bf16.mxu1 (!%p140_p2), %v2253_v1 }
   0xd   : > { %s2841_s16 = smov (!%p165_p3, %s1802_s16), 127 }
   0xe   : > { %s2089_s23 = smul.u32 12, %s2841_s16  ;;  %s1805_s5 = sshll.u32 %s2841_s16, 3 }
   0xf   : > { %1039 = vmatpush1.bf16.msra.mxu0 %v2101_v3  ;;  %2075 = vmatpush1.bf16.msra.mxu1 %v2101_v3  ;;  %s2581_s8 = scalar_lea.vmem %s2839_s3, %s1805_s5 }
  0x10   : > { %1040 = vmatprep.subr.bf16.mxu0 %v2253_v1  ;;  %2060 = vmatprep.subr.bf16.mxu1 %v2253_v1  ;;  %s2311_s28 = scalar_lea.vmem %s2836_s0, %s2089_s23 }
  0x11   : > { %v2117_v6 = vld [vmem:[%s2311_s28 + $0x4] ss:$12 sps:$4 sm:$0xff]   ;;  %v2115_v20 = vld [vmem:[%s2311_s28] ss:$12 sps:$4 sm:$0xff]   ;;  %v2122_v22 = vld [vmem:[%s2311_s28 + $0x1c] ss:$12 sps:$4 sm:$0xff]  }
  0x12   : > { %v2120_v8 = vld [vmem:[%s2311_s28 + $0x244] ss:$12 sps:$4 sm:$0xff]   ;;  %1066 = vmatprep.mubr.bf16.mxu0 %v2117_v6  ;;  %v2118_v21 = vld [vmem:[%s2311_s28 + $0x240] ss:$12 sps:$4 sm:$0xff]   ;;  %v2124_v23 = vld [vmem:[%s2311_s28 + $0x25c] ss:$12 sps:$4 sm:$0xff]  }
  0x13   : > { %1041 = vmatpush1.bf16.msra.mxu0 %v2102_v4  ;;  %2076 = vmatpush1.bf16.msra.mxu1 %v2102_v4  ;;  %v2126_v25 = vld [vmem:[%s2311_s28 + $0x18] ss:$12 sps:$4 sm:$0xff]   ;;  %v2128_v27 = vld [vmem:[%s2311_s28 + $0x34] ss:$12 sps:$4 sm:$0xff]   ;;  %v2132_v29 = vld [vmem:[%s2311_s28 + $0x30] ss:$12 sps:$4 sm:$0xff]  }
  0x14   : > { %1042 = vmatprep.subr.bf16.mxu0 %v2253_v1  ;;  %2061 = vmatprep.subr.bf16.mxu1 %v2253_v1  ;;  %v2127_v26 = vld [vmem:[%s2311_s28 + $0x258] ss:$12 sps:$4 sm:$0xff]   ;;  %v2130_v28 = vld [vmem:[%s2311_s28 + $0x274] ss:$12 sps:$4 sm:$0xff]   ;;  %v2133_v30 = vld [vmem:[%s2311_s28 + $0x270] ss:$12 sps:$4 sm:$0xff]  }
  0x15   : > { %1258 = vmatprep.mubr.bf16.mxu1 %v2120_v8  ;;  %v2134_v31 = vld [vmem:[%s2311_s28 + $0x4c] ss:$12 sps:$4 sm:$0xff]   ;;  %v2138_v33 = vld [vmem:[%s2311_s28 + $0x48] ss:$12 sps:$4 sm:$0xff]   ;;  %v2140_v35 = vld [vmem:[%s2311_s28 + $0x64] ss:$12 sps:$4 sm:$0xff]  }
  0x16   : > { %v2136_v32 = vld [vmem:[%s2311_s28 + $0x28c] ss:$12 sps:$4 sm:$0xff]   ;;  %v2139_v34 = vld [vmem:[%s2311_s28 + $0x288] ss:$12 sps:$4 sm:$0xff]   ;;  %v2142_v36 = vld [vmem:[%s2311_s28 + $0x2a4] ss:$12 sps:$4 sm:$0xff]  }
  0x17   : > { %1043 = vmatpush1.bf16.msra.mxu0 %v2103_v5  ;;  %2077 = vmatpush1.bf16.msra.mxu1 %v2103_v5  ;;  %v2144_v37 = vld [vmem:[%s2311_s28 + $0x60] ss:$12 sps:$4 sm:$0xff]   ;;  %v2147_v39 = vld [vmem:[%s2311_s28 + $0x7c] ss:$12 sps:$4 sm:$0xff]   ;;  %v2151_v41 = vld [vmem:[%s2311_s28 + $0x78] ss:$12 sps:$4 sm:$0xff]  }
  0x18   : > { %1044 = vmatprep.subr.bf16.mxu0 %v2253_v1  ;;  %2062 = vmatprep.subr.bf16.mxu1 %v2253_v1  ;;  %v2145_v38 = vld [vmem:[%s2311_s28 + $0x2a0] ss:$12 sps:$4 sm:$0xff]   ;;  %v2149_v40 = vld [vmem:[%s2311_s28 + $0x2bc] ss:$12 sps:$4 sm:$0xff]   ;;  %v2152_v42 = vld [vmem:[%s2311_s28 + $0x2b8] ss:$12 sps:$4 sm:$0xff]  }
  0x19   : > { %v2153_v43 = vld [vmem:[%s2311_s28 + $0x94] ss:$12 sps:$4 sm:$0xff]   ;;  %v2157_v45 = vld [vmem:[%s2311_s28 + $0x90] ss:$12 sps:$4 sm:$0xff]   ;;  %v2159_v47 = vld [vmem:[%s2311_s28 + $0xac] ss:$12 sps:$4 sm:$0xff]  }
  0x1a   : > { %v2155_v44 = vld [vmem:[%s2311_s28 + $0x2d4] ss:$12 sps:$4 sm:$0xff]   ;;  %v2158_v46 = vld [vmem:[%s2311_s28 + $0x2d0] ss:$12 sps:$4 sm:$0xff]   ;;  %v2161_v48 = vld [vmem:[%s2311_s28 + $0x2ec] ss:$12 sps:$4 sm:$0xff]  }
  0x1b   : > { %1045 = vmatpush1.bf16.msra.mxu0 %v2104_v7  ;;  %2078 = vmatpush1.bf16.msra.mxu1 %v2104_v7  ;;  %v2163_v49 = vld [vmem:[%s2311_s28 + $0xa8] ss:$12 sps:$4 sm:$0xff]   ;;  %v2165_v51 = vld [vmem:[%s2311_s28 + $0xc4] ss:$12 sps:$4 sm:$0xff]   ;;  %v2168_v53 = vld [vmem:[%s2311_s28 + $0xc0] ss:$12 sps:$4 sm:$0xff]  }
  0x1c   : > { %1046 = vmatprep.subr.bf16.mxu0 %v2253_v1  ;;  %2063 = vmatprep.subr.bf16.mxu1 %v2253_v1  ;;  %v2164_v50 = vld [vmem:[%s2311_s28 + $0x2e8] ss:$12 sps:$4 sm:$0xff]   ;;  %v2169_v54 = vld [vmem:[%s2311_s28 + $0x20] ss:$12 sps:$4 sm:$0xff]   ;;  %v2172_v56 = vld [vmem:[%s2311_s28 + $0x38] ss:$12 sps:$4 sm:$0xff]  }
  0x1d   : > { %v2167_v52 = vld [vmem:[%s2311_s28 + $0x8] ss:$12 sps:$4 sm:$0xff]   ;;  %v2173_v57 = vld [vmem:[%s2311_s28 + $0xd8] ss:$12 sps:$4 sm:$0xff]   ;;  %v2174_v58 = vld [vmem:[%s2311_s28 + $0x50] ss:$12 sps:$4 sm:$0xff]  }
  0x1e   : > { %v2170_v55 = vld [vmem:[%s2311_s28 + $0xdc] ss:$12 sps:$4 sm:$0xff]   ;;  %v2175_v59 = vld [vmem:[%s2311_s28 + $0xf4] ss:$12 sps:$4 sm:$0xff]   ;;  %v2180_v63 = vld [vmem:[%s2311_s28 + $0x10c] ss:$12 sps:$4 sm:$0xff]  }
  0x1f   : > { %1047 = vmatpush1.bf16.msra.mxu0 %v2105_v9  ;;  %2079 = vmatpush1.bf16.msra.mxu1 %v2105_v9  ;;  %v2177_v60 = vld [vmem:[%s2311_s28 + $0x68] ss:$12 sps:$4 sm:$0xff]   ;;  %v2178_v61 = vld [vmem:[%s2311_s28 + $0xf0] ss:$12 sps:$4 sm:$0xff]   ;;  %v2179_v62 = vld [vmem:[%s2311_s28 + $0x80] ss:$12 sps:$4 sm:$0xff]  }
  0x20   : > { %1048 = vmatprep.subr.bf16.mxu0 %v2253_v1  ;;  %2064 = vmatprep.subr.bf16.mxu1 %v2253_v1  ;;  %v2182_v0 = vld [vmem:[%s2311_s28 + $0x98] ss:$12 sps:$4 sm:$0xff]   ;;  %v2184_v2 = vld [vmem:[%s2311_s28 + $0xb0] ss:$12 sps:$4 sm:$0xff]   ;;  %v2187_v4 = vld [vmem:[%s2311_s28 + $0xc8] ss:$12 sps:$4 sm:$0xff]  }
  0x21   : > { %v2185_v3 = vld [vmem:[%s2311_s28 + $0x124] ss:$12 sps:$4 sm:$0xff]   ;;  %v2188_v5 = vld [vmem:[%s2311_s28 + $0x120] ss:$12 sps:$4 sm:$0xff]   ;;  %v2190_v7 = vld [vmem:[%s2311_s28 + $0x13c] ss:$12 sps:$4 sm:$0xff]  }
  0x22   : > { %v2189_v6 = vld [vmem:[%s2311_s28 + $0xe0] ss:$12 sps:$4 sm:$0xff]   ;;  %v2192_v8 = vld [vmem:[%s2311_s28 + $0xf8] ss:$12 sps:$4 sm:$0xff]  }
  0x23   : > { %1049 = vmatpush1.bf16.msra.mxu0 %v2106_v10  ;;  %2080 = vmatpush1.bf16.msra.mxu1 %v2106_v10  ;;  %v2193_v9 = vld [vmem:[%s2311_s28 + $0x138] ss:$12 sps:$4 sm:$0xff]   ;;  %v2194_v10 = vld [vmem:[%s2311_s28 + $0x110] ss:$12 sps:$4 sm:$0xff]  }
  0x24   : > { %1050 = vmatprep.subr.bf16.mxu0 %v2253_v1  ;;  %2065 = vmatprep.subr.bf16.mxu1 %v2253_v1 }
  0x27   : > { %1051 = vmatpush1.bf16.msra.mxu0 %v2107_v11  ;;  %2081 = vmatpush1.bf16.msra.mxu1 %v2107_v11  ;;  %v2195_v11 = vld [vmem:[%s2311_s28 + $0x154] ss:$12 sps:$4 sm:$0xff]  }
  0x28   : > { %1052 = vmatprep.subr.bf16.mxu0 %v2253_v1  ;;  %2066 = vmatprep.subr.bf16.mxu1 %v2253_v1 }
  0x2b   : > { %1053 = vmatpush1.bf16.msra.mxu0 %v2108_v12  ;;  %2082 = vmatpush1.bf16.msra.mxu1 %v2108_v12  ;;  %v2197_v12 = vld [vmem:[%s2311_s28 + $0x128] ss:$12 sps:$4 sm:$0xff]  }
  0x2c   : > { %1054 = vmatprep.subr.bf16.mxu0 %v2253_v1  ;;  %2067 = vmatprep.subr.bf16.mxu1 %v2253_v1 }
  0x2f   : > { %1055 = vmatpush1.bf16.msra.mxu0 %v2109_v13  ;;  %2083 = vmatpush1.bf16.msra.mxu1 %v2109_v13  ;;  %v2198_v13 = vld [vmem:[%s2311_s28 + $0x150] ss:$12 sps:$4 sm:$0xff]  }
  0x30   : > { %1056 = vmatprep.subr.bf16.mxu0 %v2253_v1  ;;  %2068 = vmatprep.subr.bf16.mxu1 %v2253_v1 }
  0x33   : > { %1057 = vmatpush1.bf16.msra.mxu0 %v2110_v14  ;;  %2084 = vmatpush1.bf16.msra.mxu1 %v2110_v14  ;;  %v2199_v14 = vld [vmem:[%s2311_s28 + $0x140] ss:$12 sps:$4 sm:$0xff]  }
  0x34   : > { %1058 = vmatprep.subr.bf16.mxu0 %v2253_v1  ;;  %2069 = vmatprep.subr.bf16.mxu1 %v2253_v1 }
  0x37   : > { %1059 = vmatpush1.bf16.msra.mxu0 %v2111_v15  ;;  %2085 = vmatpush1.bf16.msra.mxu1 %v2111_v15  ;;  %v2200_v15 = vld [vmem:[%s2311_s28 + $0x16c] ss:$12 sps:$4 sm:$0xff]  }
  0x38   : > { %1060 = vmatprep.subr.bf16.mxu0 %v2253_v1  ;;  %2070 = vmatprep.subr.bf16.mxu1 %v2253_v1 }
  0x3b   : > { %1061 = vmatpush1.bf16.msra.mxu0 %v2112_v16  ;;  %2086 = vmatpush1.bf16.msra.mxu1 %v2112_v16  ;;  %v2202_v16 = vld [vmem:[%s2311_s28 + $0x158] ss:$12 sps:$4 sm:$0xff]  }
  0x3c   : > { %1062 = vmatprep.subr.bf16.mxu0 %v2253_v1  ;;  %2071 = vmatprep.subr.bf16.mxu1 %v2253_v1 }
  0x3f   : > { %1063 = vmatpush1.bf16.msra.mxu0 %v2113_v17  ;;  %2087 = vmatpush1.bf16.msra.mxu1 %v2113_v17  ;;  %v2203_v17 = vld [vmem:[%s2311_s28 + $0x168] ss:$12 sps:$4 sm:$0xff]  }
  0x40   : > { %1064 = vmatprep.subr.bf16.mxu0 %v2253_v1  ;;  %2072 = vmatprep.subr.bf16.mxu1 %v2253_v1  ;;  %v2183_v1 = vld [vmem:[%s2311_s28 + $0x108] ss:$12 sps:$4 sm:$0xff]  }
  0x43   : > { %1065 = vmatpush1.bf16.msra.mxu0 %v2114_v18  ;;  %2088 = vmatpush1.bf16.msra.mxu1 %v2114_v18  ;;  %v2204_v18 = vld [vmem:[%s2311_s28 + $0x170] ss:$12 sps:$4 sm:$0xff]  }
  0x44   : > { %1989 = vmatprep.subr.bf16.mxu1 %v2121_v19 }
  0x46   : > { %1067 = vmatmul.mubr.bf16.vlgmr.msra.gmra.mrb[0].mxu0 %v2115_v20  ;;  %1259 = vmatmul.mubr.bf16.vlgmr.msra.gmra.mrb[0].mxu1 %v2118_v21  ;;  %v2207_v20 = vld [vmem:[%s2311_s28 + $0x188] ss:$12 sps:$4 sm:$0xff]   ;;  %v2208_v21 = vld [vmem:[%s2311_s28 + $0x180] ss:$12 sps:$4 sm:$0xff]  }
  0x47   : > { %1990 = vmatpush3.bf16.msra.mxu1 %v2121_v19  ;;  %1074 = vmatprep.mubr.bf16.mxu0 %v2122_v22  ;;  %v2205_v19 = vld [vmem:[%s2311_s28 + $0x184] ss:$12 sps:$4 sm:$0xff]   ;;  %v2209_v22 = vld [vmem:[%s2311_s28 + $0x1a0] ss:$12 sps:$4 sm:$0xff]  }
  0x48   : > { %1266 = vmatprep.mubr.bf16.mxu1 %v2124_v23  ;;  %1991 = vmatprep.subr.bf16.mxu1 %v2146_v24  ;;  %v2210_v23 = vld [vmem:[%s2311_s28 + $0x19c] ss:$12 sps:$4 sm:$0xff]  }
  0x4b   : > { %1992 = vmatpush3.bf16.msra.mxu1 %v2146_v24  ;;  %v2212_v24 = vld [vmem:[%s2311_s28 + $0x1b8] ss:$12 sps:$4 sm:$0xff]  }
  0x4e   : > { %1075 = vmatmul.mubr.bf16.gmra.mrb[4].mxu0 %v2126_v25  ;;  %1267 = vmatmul.mubr.bf16.gmra.mrb[4].mxu1 %v2127_v26  ;;  %v2213_v25 = vld [vmem:[%s2311_s28 + $0x198] ss:$12 sps:$4 sm:$0xff]   ;;  %v2214_v26 = vld [vmem:[%s2311_s28 + $0x1d0] ss:$12 sps:$4 sm:$0xff]  }
  0x4f   : > { %1082 = vmatprep.mubr.bf16.mxu0 %v2128_v27  ;;  %1274 = vmatprep.mubr.bf16.mxu1 %v2130_v28  ;;  %v2215_v27 = vld [vmem:[%s2311_s28 + $0x1b4] ss:$12 sps:$4 sm:$0xff]  }
  0x50   : > { %v2217_v28 = vld [vmem:[%s2311_s28 + $0x1e8] ss:$12 sps:$4 sm:$0xff]  }
  0x56   : > { %1083 = vmatmul.mubr.bf16.gmra.mrb[8].mxu0 %v2132_v29  ;;  %1275 = vmatmul.mubr.bf16.gmra.mrb[8].mxu1 %v2133_v30  ;;  %v2218_v29 = vld [vmem:[%s2311_s28 + $0x1b0] ss:$12 sps:$4 sm:$0xff]   ;;  %v2219_v30 = vld [vmem:[%s2311_s28 + $0x200] ss:$12 sps:$4 sm:$0xff]  }
  0x57   : > { %1090 = vmatprep.mubr.bf16.mxu0 %v2134_v31  ;;  %1282 = vmatprep.mubr.bf16.mxu1 %v2136_v32  ;;  %v2220_v31 = vld [vmem:[%s2311_s28 + $0x1cc] ss:$12 sps:$4 sm:$0xff]  }
  0x58   : > { %v2222_v32 = vld [vmem:[%s2311_s28 + $0x218] ss:$12 sps:$4 sm:$0xff]  }
  0x5e   : > { %1091 = vmatmul.mubr.bf16.gmra.mrb[12].mxu0 %v2138_v33  ;;  %1283 = vmatmul.mubr.bf16.gmra.mrb[12].mxu1 %v2139_v34  ;;  %v2223_v33 = vld [vmem:[%s2311_s28 + $0x1c8] ss:$12 sps:$4 sm:$0xff]   ;;  %v2224_v34 = vld [vmem:[%s2311_s28 + $0x230] ss:$12 sps:$4 sm:$0xff]  }
  0x5f   : > { %1098 = vmatprep.mubr.bf16.mxu0 %v2140_v35  ;;  %1290 = vmatprep.mubr.bf16.mxu1 %v2142_v36  ;;  %v2225_v35 = vld [vmem:[%s2311_s28 + $0x1e4] ss:$12 sps:$4 sm:$0xff]   ;;  %v2227_v36 = vld [vmem:[%s2311_s28 + $0x248] ss:$12 sps:$4 sm:$0xff]  }
  0x66   : > { %1099 = vmatmul.mubr.bf16.gmra.mrb[16].mxu0 %v2144_v37  ;;  %1291 = vmatmul.mubr.bf16.gmra.mrb[16].mxu1 %v2145_v38  ;;  %v2228_v37 = vld [vmem:[%s2311_s28 + $0x1e0] ss:$12 sps:$4 sm:$0xff]  }
  0x67   : > { %1106 = vmatprep.mubr.bf16.mxu0 %v2147_v39  ;;  %1298 = vmatprep.mubr.bf16.mxu1 %v2149_v40  ;;  %v2229_v38 = vld [vmem:[%s2311_s28 + $0x260] ss:$12 sps:$4 sm:$0xff]   ;;  %v2230_v39 = vld [vmem:[%s2311_s28 + $0x1fc] ss:$12 sps:$4 sm:$0xff]   ;;  %v2232_v40 = vld [vmem:[%s2311_s28 + $0x278] ss:$12 sps:$4 sm:$0xff]  }
  0x6e   : > { %1107 = vmatmul.mubr.bf16.gmra.mrb[20].mxu0 %v2151_v41  ;;  %1299 = vmatmul.mubr.bf16.gmra.mrb[20].mxu1 %v2152_v42  ;;  %v2233_v41 = vld [vmem:[%s2311_s28 + $0x1f8] ss:$12 sps:$4 sm:$0xff]   ;;  %v2234_v42 = vld [vmem:[%s2311_s28 + $0x290] ss:$12 sps:$4 sm:$0xff]  }
  0x6f   : > { %1114 = vmatprep.mubr.bf16.mxu0 %v2153_v43  ;;  %1306 = vmatprep.mubr.bf16.mxu1 %v2155_v44  ;;  %v2235_v43 = vld [vmem:[%s2311_s28 + $0x214] ss:$12 sps:$4 sm:$0xff]  }
  0x70   : > { %v2237_v44 = vld [vmem:[%s2311_s28 + $0x2a8] ss:$12 sps:$4 sm:$0xff]  }
  0x76   : > { %1115 = vmatmul.mubr.bf16.gmra.mrb[24].mxu0 %v2157_v45  ;;  %1307 = vmatmul.mubr.bf16.gmra.mrb[24].mxu1 %v2158_v46  ;;  %v2238_v45 = vld [vmem:[%s2311_s28 + $0x210] ss:$12 sps:$4 sm:$0xff]   ;;  %v2239_v46 = vld [vmem:[%s2311_s28 + $0x2c0] ss:$12 sps:$4 sm:$0xff]  }
  0x77   : > { %1122 = vmatprep.mubr.bf16.mxu0 %v2159_v47  ;;  %1314 = vmatprep.mubr.bf16.mxu1 %v2161_v48  ;;  %v2240_v47 = vld [vmem:[%s2311_s28 + $0x22c] ss:$12 sps:$4 sm:$0xff]  }
  0x78   : > { %v2242_v48 = vld [vmem:[%s2311_s28 + $0x2d8] ss:$12 sps:$4 sm:$0xff]  }
  0x7e   : > { %1123 = vmatmul.mubr.bf16.gmra.mrb[28].mxu0 %v2163_v49  ;;  %1315 = vmatmul.mubr.bf16.gmra.mrb[28].mxu1 %v2164_v50  ;;  %v2243_v49 = vld [vmem:[%s2311_s28 + $0x228] ss:$12 sps:$4 sm:$0xff]   ;;  %v2244_v50 = vld [vmem:[%s2311_s28 + $0x2f0] ss:$12 sps:$4 sm:$0xff]  }
  0x7f   : > { %1130 = vmatprep.mubr.bf16.mxu0 %v2165_v51  ;;  %1993 = vmatprep.mubr.msk.bf16.mxu1 %vm937_vm0, %v2167_v52 }
  0x86   : > { %1131 = vmatmul.mubr.bf16.gmra.mrb[32].mxu0 %v2168_v53  ;;  %1994 = vmatmul.mubr.msk.bf16.vlgmr.msra.gmra.mrb[32].mxu1 %vm937_vm0, %v2169_v54 }
  0x87   : > { %1138 = vmatprep.mubr.bf16.mxu0 %v2170_v55  ;;  %1997 = vmatprep.mubr.msk.bf16.mxu1 %vm937_vm0, %v2172_v56 }
  0x8e   : > { %1139 = vmatmul.mubr.bf16.gmra.mrb[36].mxu0 %v2173_v57  ;;  %1998 = vmatmul.mubr.msk.bf16.gmra.mrb[36].mxu1 %vm937_vm0, %v2174_v58 }
  0x8f   : > { %1146 = vmatprep.mubr.bf16.mxu0 %v2175_v59  ;;  %2001 = vmatprep.mubr.msk.bf16.mxu1 %vm937_vm0, %v2177_v60 }
  0x96   : > { %1147 = vmatmul.mubr.bf16.gmra.mrb[40].mxu0 %v2178_v61  ;;  %2002 = vmatmul.mubr.msk.bf16.gmra.mrb[40].mxu1 %vm937_vm0, %v2179_v62 }
  0x97   : > { %1154 = vmatprep.mubr.bf16.mxu0 %v2180_v63  ;;  %2005 = vmatprep.mubr.msk.bf16.mxu1 %vm937_vm0, %v2182_v0 }
  0x9e   : > { %1155 = vmatmul.mubr.bf16.gmra.mrb[44].mxu0 %v2183_v1  ;;  %2006 = vmatmul.mubr.msk.bf16.gmra.mrb[44].mxu1 %vm937_vm0, %v2184_v2 }
  0x9f   : > { %1162 = vmatprep.mubr.bf16.mxu0 %v2185_v3  ;;  %2009 = vmatprep.mubr.msk.bf16.mxu1 %vm937_vm0, %v2187_v4 }
  0xa6   : > { %1163 = vmatmul.mubr.bf16.gmra.mrb[48].mxu0 %v2188_v5  ;;  %2010 = vmatmul.mubr.msk.bf16.gmra.mrb[48].mxu1 %vm937_vm0, %v2189_v6 }
  0xa7   : > { %1170 = vmatprep.mubr.bf16.mxu0 %v2190_v7  ;;  %2013 = vmatprep.mubr.msk.bf16.mxu1 %vm937_vm0, %v2192_v8 }
  0xae   : > { %1171 = vmatmul.mubr.bf16.gmra.mrb[52].mxu0 %v2193_v9  ;;  %2014 = vmatmul.mubr.msk.bf16.gmra.mrb[52].mxu1 %vm937_vm0, %v2194_v10 }
  0xaf   : > { %1178 = vmatprep.mubr.bf16.mxu0 %v2195_v11  ;;  %2017 = vmatprep.mubr.msk.bf16.mxu1 %vm937_vm0, %v2197_v12 }
  0xb6   : > { %1179 = vmatmul.mubr.bf16.gmra.mrb[56].mxu0 %v2198_v13  ;;  %2018 = vmatmul.mubr.msk.bf16.gmra.mrb[56].mxu1 %vm937_vm0, %v2199_v14 }
  0xb7   : > { %1186 = vmatprep.mubr.bf16.mxu0 %v2200_v15  ;;  %2021 = vmatprep.mubr.msk.bf16.mxu1 %vm937_vm0, %v2202_v16 }
  0xbe   : > { %1187 = vmatmul.mubr.bf16.gmra.mrb[60].mxu0 %v2203_v17  ;;  %2022 = vmatmul.mubr.msk.bf16.gmra.mrb[60].mxu1 %vm937_vm0, %v2204_v18 }
  0xbf   : > { %1194 = vmatprep.mubr.bf16.mxu0 %v2205_v19  ;;  %2025 = vmatprep.mubr.msk.bf16.mxu1 %vm937_vm0, %v2207_v20 }
  0xc6   : > { %1195 = vmatmul.mubr.bf16.gmra.mrb[64].mxu0 %v2208_v21  ;;  %2026 = vmatmul.mubr.msk.bf16.gmra.mrb[64].mxu1 %vm937_vm0, %v2209_v22 }
  0xc7   : > { %1202 = vmatprep.mubr.bf16.mxu0 %v2210_v23  ;;  %2029 = vmatprep.mubr.msk.bf16.mxu1 %vm937_vm0, %v2212_v24 }
  0xce   : > { %1203 = vmatmul.mubr.bf16.gmra.mrb[68].mxu0 %v2213_v25  ;;  %2030 = vmatmul.mubr.msk.bf16.gmra.mrb[68].mxu1 %vm937_vm0, %v2214_v26 }
  0xcf   : > { %1210 = vmatprep.mubr.bf16.mxu0 %v2215_v27  ;;  %2033 = vmatprep.mubr.msk.bf16.mxu1 %vm937_vm0, %v2217_v28 }
  0xd6   : > { %1211 = vmatmul.mubr.bf16.gmra.mrb[72].mxu0 %v2218_v29  ;;  %2034 = vmatmul.mubr.msk.bf16.gmra.mrb[72].mxu1 %vm937_vm0, %v2219_v30 }
  0xd7   : > { %1218 = vmatprep.mubr.bf16.mxu0 %v2220_v31  ;;  %2037 = vmatprep.mubr.msk.bf16.mxu1 %vm937_vm0, %v2222_v32 }
  0xde   : > { %1219 = vmatmul.mubr.bf16.gmra.mrb[76].mxu0 %v2223_v33  ;;  %2038 = vmatmul.mubr.msk.bf16.gmra.mrb[76].mxu1 %vm937_vm0, %v2224_v34 }
  0xdf   : > { %1226 = vmatprep.mubr.bf16.mxu0 %v2225_v35  ;;  %2041 = vmatprep.mubr.msk.bf16.mxu1 %vm937_vm0, %v2227_v36 }
  0xe6   : > { %1227 = vmatmul.mubr.bf16.gmra.mrb[80].mxu0 %v2228_v37  ;;  %2042 = vmatmul.mubr.msk.bf16.gmra.mrb[80].mxu1 %vm937_vm0, %v2229_v38 }
  0xe7   : > { %1234 = vmatprep.mubr.bf16.mxu0 %v2230_v39  ;;  %2045 = vmatprep.mubr.msk.bf16.mxu1 %vm937_vm0, %v2232_v40 }
  0xee   : > { %1235 = vmatmul.mubr.bf16.gmra.mrb[84].mxu0 %v2233_v41  ;;  %2046 = vmatmul.mubr.msk.bf16.gmra.mrb[84].mxu1 %vm937_vm0, %v2234_v42 }
  0xef   : > { %1242 = vmatprep.mubr.bf16.mxu0 %v2235_v43  ;;  %2049 = vmatprep.mubr.msk.bf16.mxu1 %vm937_vm0, %v2237_v44 }
  0xf6   : > { %1243 = vmatmul.mubr.bf16.gmra.mrb[88].mxu0 %v2238_v45  ;;  %2050 = vmatmul.mubr.msk.bf16.gmra.mrb[88].mxu1 %vm937_vm0, %v2239_v46 }
  0xf7   : > { %1250 = vmatprep.mubr.bf16.mxu0 %v2240_v47  ;;  %2053 = vmatprep.mubr.msk.bf16.mxu1 %vm937_vm0, %v2242_v48 }
  0xfe   : > { %1251 = vmatmul.mubr.bf16.gmra.mrb[92].mxu0 %v2243_v49  ;;  %2054 = vmatmul.mubr.msk.bf16.gmra.mrb[92].mxu1 %vm937_vm0, %v2244_v50 }
 0x119   : > { %v2504_v51 = vpop.f32.mrb[0].mxu0  ;;  %v2506_v52 = vpop.f32.mrb[0].mxu1 }
 0x11a   : > { %v1070_v53 = vpop.f32.mrb[1].mxu0  ;;  %v1262_v54 = vpop.f32.mrb[1].mxu1 }
 0x11b   : > { %v2508_v55 = vpop.f32.mrb[2].mxu0  ;;  %v2510_v56 = vpop.f32.mrb[2].mxu1  ;;  %v2567_v53 = vld [vmem:[%s2838_s2] ss:$0 sm:$0xff] }
 0x11c   : > { %v1073_v57 = vpop.f32.mrb[3].mxu0  ;;  %v1265_v58 = vpop.f32.mrb[3].mxu1 }
 0x11d   : > { %v1069_v57 = vadd.f32 %v2567_v53, %v2504_v51 }
 0x121   : > { %v1076_v59 = vpop.f32.mrb[4].mxu0  ;;  %v2512_v60 = vpop.f32.mrb[4].mxu1 }
 0x122   : > { %v1078_v61 = vpop.f32.mrb[5].mxu0  ;;  %v1270_v62 = vpop.f32.mrb[5].mxu1  ;;  %v1077_v54 = vadd.f32 %v2567_v53, %v1076_v59 }
 0x123   : > { %v1079_v63 = vpop.f32.mrb[6].mxu0  ;;  %v2514_v0 = vpop.f32.mrb[6].mxu1 }
 0x124   : > { %v1081_v1 = vpop.f32.mrb[7].mxu0  ;;  %v1273_v2 = vpop.f32.mrb[7].mxu1  ;;  %v1080_v62 = vadd.f32 %v2567_v53, %v1079_v63 }
 0x129   : > { %v2516_v3 = vpop.f32.mrb[8].mxu0  ;;  %v2518_v4 = vpop.f32.mrb[8].mxu1 }
 0x12a   : > { %v1086_v5 = vpop.f32.mrb[9].mxu0  ;;  %v1278_v6 = vpop.f32.mrb[9].mxu1 }
 0x12b   : > { %v2520_v7 = vpop.f32.mrb[10].mxu0  ;;  %v2522_v8 = vpop.f32.mrb[10].mxu1  ;;  %v1072_v6 = vadd.f32 %v2567_v53, %v2508_v55 }
 0x12c   : > { %v1089_v9 = vpop.f32.mrb[11].mxu0  ;;  %v1281_v10 = vpop.f32.mrb[11].mxu1 }
 0x131   : > { %v2524_v11 = vpop.f32.mrb[12].mxu0  ;;  %v2526_v12 = vpop.f32.mrb[12].mxu1 }
 0x132   : > { %v1094_v13 = vpop.f32.mrb[13].mxu0  ;;  %v1286_v14 = vpop.f32.mrb[13].mxu1 }
 0x133   : > { %v2528_v15 = vpop.f32.mrb[14].mxu0  ;;  %v2530_v16 = vpop.f32.mrb[14].mxu1 }
 0x134   : > { %v1097_v17 = vpop.f32.mrb[15].mxu0  ;;  %v1289_v18 = vpop.f32.mrb[15].mxu1 }
 0x139   : > { %v2532_v19 = vpop.f32.mrb[16].mxu0  ;;  %v2534_v20 = vpop.f32.mrb[16].mxu1 }
 0x13a   : > { %v1102_v21 = vpop.f32.mrb[17].mxu0  ;;  %v1294_v22 = vpop.f32.mrb[17].mxu1 }
 0x13b   : > { %v2536_v23 = vpop.f32.mrb[18].mxu0  ;;  %v2538_v24 = vpop.f32.mrb[18].mxu1  ;;  %v1093_v22 = vadd.f32 %v2567_v53, %v2524_v11  ;;  %v1088_v11 = vadd.f32 %v2567_v53, %v2520_v7 }
 0x13c   : > { %v1105_v25 = vpop.f32.mrb[19].mxu0  ;;  %v1297_v26 = vpop.f32.mrb[19].mxu1 }
 0x13d   : > { %v1085_v25 = vadd.f32 %v2567_v53, %v2516_v3 }
 0x141   : > { %v2540_v27 = vpop.f32.mrb[20].mxu0  ;;  %v2542_v28 = vpop.f32.mrb[20].mxu1 }
 0x142   : > { %v1110_v29 = vpop.f32.mrb[21].mxu0  ;;  %v1302_v30 = vpop.f32.mrb[21].mxu1  ;;  %v1109_v7 = vadd.f32 %v2567_v53, %v2540_v27  ;;  %v1104_v27 = vadd.f32 %v2567_v53, %v2536_v23 }
 0x143   : > { %v2544_v31 = vpop.f32.mrb[22].mxu0  ;;  %v2546_v32 = vpop.f32.mrb[22].mxu1  ;;  %v1096_v30 = vadd.f32 %v2567_v53, %v2528_v15 }
 0x144   : > { %v1113_v33 = vpop.f32.mrb[23].mxu0  ;;  %v1305_v34 = vpop.f32.mrb[23].mxu1 }
 0x149   : > { %v2548_v35 = vpop.f32.mrb[24].mxu0  ;;  %v2550_v36 = vpop.f32.mrb[24].mxu1 }
 0x14a   : > { %v1118_v37 = vpop.f32.mrb[25].mxu0  ;;  %v1310_v38 = vpop.f32.mrb[25].mxu1 }
 0x14b   : > { %v2552_v39 = vpop.f32.mrb[26].mxu0  ;;  %v2554_v40 = vpop.f32.mrb[26].mxu1 }
 0x14c   : > { %v1121_v41 = vpop.f32.mrb[27].mxu0  ;;  %v1313_v42 = vpop.f32.mrb[27].mxu1 }
 0x151   : > { %v2556_v43 = vpop.f32.mrb[28].mxu0  ;;  %v2558_v44 = vpop.f32.mrb[28].mxu1 }
 0x152   : > { %v1126_v45 = vpop.f32.mrb[29].mxu0  ;;  %v1318_v46 = vpop.f32.mrb[29].mxu1  ;;  %v1125_v23 = vadd.f32 %v2567_v53, %v2556_v43  ;;  %v1120_v43 = vadd.f32 %v2567_v53, %v2552_v39 }
 0x153   : > { %v2560_v47 = vpop.f32.mrb[30].mxu0  ;;  %v2562_v48 = vpop.f32.mrb[30].mxu1 }
 0x154   : > { %v1129_v49 = vpop.f32.mrb[31].mxu0  ;;  %v1321_v50 = vpop.f32.mrb[31].mxu1 }
 0x159   : > { %v2573_v58 = vpop.f32.mrb[32].mxu0  ;;  %v1995_v61 = vpop.f32.mrb[32].mxu1 }
 0x15a   : > { %v1366_v1 = vadd.f32 %v1995_v61, %v1077_v54  ;;  %v1134_v2 = vpop.f32.mrb[33].mxu0  ;;  %v1357_v5 = vpop.f32.mrb[33].mxu1  ;;  %v1101_v61 = vadd.f32 %v2567_v53, %v2532_v19  ;;  %v1133_v39 = vadd.f32 %v2567_v53, %v2573_v58 }
 0x15b   : > { %v1358_v51 = vadd.f32 %v1357_v5, %v1069_v57  ;;  %v2583_v59 = vpop.f32.mrb[34].mxu0  ;;  %v1996_v63 = vpop.f32.mrb[34].mxu1  ;;  %v1112_v2 = vadd.f32 %v2567_v53, %v2544_v31 }
 0x15c   : > { %v1614_v9 = vmax.f32 %v1366_v1, 0.0  ;;  %v1369_v10 = vadd.f32 %v1996_v63, %v1080_v62  ;;  %v1137_v13 = vpop.f32.mrb[35].mxu0  ;;  %v1360_v14 = vpop.f32.mrb[35].mxu1 }
 0x15d   : > { %v1612_v17 = vmax.f32 %v1358_v51, 0.0  ;;  %v1361_v55 = vadd.f32 %v1360_v14, %v1072_v6 }
 0x15e   : > { %1679 = vst.msk [vmem:[%s2581_s8 + $0x10] sm:$0xff] %vm1676_vm1, %v1614_v9  ;;  %v1615_v18 = vmax.f32 %v1369_v10, 0.0 }
 0x15f   : > { %1677 = vst.msk [vmem:[%s2581_s8] sm:$0xff] %vm1676_vm1, %v1612_v17  ;;  %v1613_v21 = vmax.f32 %v1361_v55, 0.0 }
 0x160   : > { %1680 = vst.msk [vmem:[%s2581_s8 + $0x18] sm:$0xff] %vm1676_vm1, %v1615_v18 }
 0x161   : > { %1678 = vst.msk [vmem:[%s2581_s8 + $0x8] sm:$0xff] %vm1676_vm1, %v1613_v21  ;;  %v2597_v26 = vpop.f32.mrb[36].mxu0  ;;  %v1999_v29 = vpop.f32.mrb[36].mxu1 }
 0x162   : > { %v1382_v33 = vadd.f32 %v1999_v29, %v1093_v22  ;;  %v1142_v34 = vpop.f32.mrb[37].mxu0  ;;  %v1373_v37 = vpop.f32.mrb[37].mxu1  ;;  %v1117_v22 = vadd.f32 %v2567_v53, %v2548_v35 }
 0x163   : > { %v1374_v38 = vadd.f32 %v1373_v37, %v1085_v25  ;;  %v2603_v3 = vpop.f32.mrb[38].mxu0  ;;  %v2000_v41 = vpop.f32.mrb[38].mxu1 }
 0x164   : > { %v1618_v42 = vmax.f32 %v1382_v33, 0.0  ;;  %v1385_v45 = vadd.f32 %v2000_v41, %v1096_v30  ;;  %v1145_v46 = vpop.f32.mrb[39].mxu0  ;;  %v1376_v49 = vpop.f32.mrb[39].mxu1  ;;  %v1128_v30 = vadd.f32 %v2567_v53, %v2560_v47 }
 0x165   : > { %v1616_v50 = vmax.f32 %v1374_v38, 0.0  ;;  %v1377_v54 = vadd.f32 %v1376_v49, %v1088_v11 }
 0x166   : > { %1683 = vst.msk [vmem:[%s2581_s8 + $0x30] sm:$0xff] %vm1676_vm1, %v1618_v42  ;;  %v1619_v15 = vmax.f32 %v1385_v45, 0.0 }
 0x167   : > { %1681 = vst.msk [vmem:[%s2581_s8 + $0x20] sm:$0xff] %vm1676_vm1, %v1616_v50  ;;  %v1617_v57 = vmax.f32 %v1377_v54, 0.0 }
 0x168   : > { %1684 = vst.msk [vmem:[%s2581_s8 + $0x38] sm:$0xff] %vm1676_vm1, %v1619_v15  ;;  %v1141_v15 = vadd.f32 %v2567_v53, %v2597_v26  ;;  %v1136_v26 = vadd.f32 %v2567_v53, %v2583_v59 }
 0x169   : > { %1682 = vst.msk [vmem:[%s2581_s8 + $0x28] sm:$0xff] %vm1676_vm1, %v1617_v57  ;;  %v2617_v62 = vpop.f32.mrb[40].mxu0  ;;  %v2003_v1 = vpop.f32.mrb[40].mxu1 }
 0x16a   : > { %v1398_v5 = vadd.f32 %v2003_v1, %v1109_v7  ;;  %v1150_v6 = vpop.f32.mrb[41].mxu0  ;;  %v1389_v51 = vpop.f32.mrb[41].mxu1  ;;  %v1149_v59 = vadd.f32 %v2567_v53, %v2617_v62 }
 0x16b   : > { %v1390_v63 = vadd.f32 %v1389_v51, %v1101_v61  ;;  %v2623_v19 = vpop.f32.mrb[42].mxu0  ;;  %v2004_v9 = vpop.f32.mrb[42].mxu1  ;;  %v1144_v61 = vadd.f32 %v2567_v53, %v2603_v3 }
 0x16c   : > { %v1622_v10 = vmax.f32 %v1398_v5, 0.0  ;;  %v1401_v13 = vadd.f32 %v2004_v9, %v1112_v2  ;;  %v1153_v14 = vpop.f32.mrb[43].mxu0  ;;  %v1392_v17 = vpop.f32.mrb[43].mxu1 }
 0x16d   : > { %v1620_v55 = vmax.f32 %v1390_v63, 0.0  ;;  %v1393_v18 = vadd.f32 %v1392_v17, %v1104_v27 }
 0x16e   : > { %1687 = vst.msk [vmem:[%s2581_s8 + $0x50] sm:$0xff] %vm1676_vm1, %v1622_v10  ;;  %v1623_v31 = vmax.f32 %v1401_v13, 0.0 }
 0x16f   : > { %1685 = vst.msk [vmem:[%s2581_s8 + $0x40] sm:$0xff] %vm1676_vm1, %v1620_v55  ;;  %v1621_v21 = vmax.f32 %v1393_v18, 0.0 }
 0x170   : > { %1688 = vst.msk [vmem:[%s2581_s8 + $0x58] sm:$0xff] %vm1676_vm1, %v1623_v31 }
 0x171   : > { %1686 = vst.msk [vmem:[%s2581_s8 + $0x48] sm:$0xff] %vm1676_vm1, %v1621_v21  ;;  %v1156_v25 = vpop.f32.mrb[44].mxu0  ;;  %v2007_v29 = vpop.f32.mrb[44].mxu1 }
 0x172   : > { %v1414_v33 = vadd.f32 %v2007_v29, %v1125_v23  ;;  %v1158_v34 = vpop.f32.mrb[45].mxu0  ;;  %v1405_v37 = vpop.f32.mrb[45].mxu1  ;;  %v1157_v55 = vadd.f32 %v2567_v53, %v1156_v25  ;;  %v1152_v25 = vadd.f32 %v2567_v53, %v2623_v19 }
 0x173   : > { %v1406_v11 = vadd.f32 %v1405_v37, %v1117_v22  ;;  %v1159_v38 = vpop.f32.mrb[46].mxu0  ;;  %v2008_v35 = vpop.f32.mrb[46].mxu1 }
 0x174   : > { %v1626_v41 = vmax.f32 %v1414_v33, 0.0  ;;  %v1417_v42 = vadd.f32 %v2008_v35, %v1128_v30  ;;  %v1161_v45 = vpop.f32.mrb[47].mxu0  ;;  %v1408_v46 = vpop.f32.mrb[47].mxu1  ;;  %v1160_v21 = vadd.f32 %v2567_v53, %v1159_v38 }
 0x175   : > { %v1624_v49 = vmax.f32 %v1406_v11, 0.0  ;;  %v1409_v50 = vadd.f32 %v1408_v46, %v1120_v43 }
 0x176   : > { %1691 = vst.msk [vmem:[%s2581_s8 + $0x70] sm:$0xff] %vm1676_vm1, %v1626_v41  ;;  %v1627_v47 = vmax.f32 %v1417_v42, 0.0 }
 0x177   : > { %1689 = vst.msk [vmem:[%s2581_s8 + $0x60] sm:$0xff] %vm1676_vm1, %v1624_v49  ;;  %v1625_v54 = vmax.f32 %v1409_v50, 0.0 }
 0x178   : > { %1692 = vst.msk [vmem:[%s2581_s8 + $0x78] sm:$0xff] %vm1676_vm1, %v1627_v47 }
 0x179   : > { %1690 = vst.msk [vmem:[%s2581_s8 + $0x68] sm:$0xff] %vm1676_vm1, %v1625_v54  ;;  %v1164_v57 = vpop.f32.mrb[48].mxu0  ;;  %v2011_v7 = vpop.f32.mrb[48].mxu1 }
 0x17a   : > { %v1430_v1 = vadd.f32 %v2011_v7, %v1141_v15  ;;  %v1166_v2 = vpop.f32.mrb[49].mxu0  ;;  %v1421_v5 = vpop.f32.mrb[49].mxu1  ;;  %v1165_v19 = vadd.f32 %v2567_v53, %v1164_v57 }
 0x17b   : > { %v1422_v6 = vadd.f32 %v1421_v5, %v1133_v39  ;;  %v1167_v51 = vpop.f32.mrb[50].mxu0  ;;  %v2012_v58 = vpop.f32.mrb[50].mxu1 }
 0x17c   : > { %v1630_v27 = vmax.f32 %v1430_v1, 0.0  ;;  %v1433_v63 = vadd.f32 %v2012_v58, %v1144_v61  ;;  %v1169_v9 = vpop.f32.mrb[51].mxu0  ;;  %v1424_v10 = vpop.f32.mrb[51].mxu1  ;;  %v1168_v39 = vadd.f32 %v2567_v53, %v1167_v51 }
 0x17d   : > { %v1628_v13 = vmax.f32 %v1422_v6, 0.0  ;;  %v1425_v14 = vadd.f32 %v1424_v10, %v1136_v26 }
 0x17e   : > { %1695 = vst.msk [vmem:[%s2581_s8 + $0x90] sm:$0xff] %vm1676_vm1, %v1630_v27  ;;  %v1631_v3 = vmax.f32 %v1433_v63, 0.0 }
 0x17f   : > { %1693 = vst.msk [vmem:[%s2581_s8 + $0x80] sm:$0xff] %vm1676_vm1, %v1628_v13  ;;  %v1629_v17 = vmax.f32 %v1425_v14, 0.0 }
 0x180   : > { %1696 = vst.msk [vmem:[%s2581_s8 + $0x98] sm:$0xff] %vm1676_vm1, %v1631_v3 }
 0x181   : > { %1694 = vst.msk [vmem:[%s2581_s8 + $0x88] sm:$0xff] %vm1676_vm1, %v1629_v17  ;;  %v1172_v18 = vpop.f32.mrb[52].mxu0  ;;  %v2015_v31 = vpop.f32.mrb[52].mxu1 }
 0x182   : > { %v1446_v23 = vadd.f32 %v2015_v31, %v1157_v55  ;;  %v1174_v22 = vpop.f32.mrb[53].mxu0  ;;  %v1437_v29 = vpop.f32.mrb[53].mxu1  ;;  %v1173_v45 = vadd.f32 %v2567_v53, %v1172_v18 }
 0x183   : > { %v1438_v30 = vadd.f32 %v1437_v29, %v1149_v59  ;;  %v1175_v33 = vpop.f32.mrb[54].mxu0  ;;  %v2016_v34 = vpop.f32.mrb[54].mxu1 }
 0x184   : > { %v1634_v62 = vmax.f32 %v1446_v23, 0.0  ;;  %v1449_v37 = vadd.f32 %v2016_v34, %v1160_v21  ;;  %v1177_v43 = vpop.f32.mrb[55].mxu0  ;;  %v1440_v11 = vpop.f32.mrb[55].mxu1  ;;  %v1176_v50 = vadd.f32 %v2567_v53, %v1175_v33 }
 0x185   : > { %v1632_v35 = vmax.f32 %v1438_v30, 0.0  ;;  %v1441_v41 = vadd.f32 %v1440_v11, %v1152_v25 }
 0x186   : > { %1699 = vst.msk [vmem:[%s2581_s8 + $0xb0] sm:$0xff] %vm1676_vm1, %v1634_v62  ;;  %v1635_v38 = vmax.f32 %v1449_v37, 0.0 }
 0x187   : > { %1697 = vst.msk [vmem:[%s2581_s8 + $0xa0] sm:$0xff] %vm1676_vm1, %v1632_v35  ;;  %v1633_v42 = vmax.f32 %v1441_v41, 0.0 }
 0x188   : > { %1700 = vst.msk [vmem:[%s2581_s8 + $0xb8] sm:$0xff] %vm1676_vm1, %v1635_v38 }
 0x189   : > { %1698 = vst.msk [vmem:[%s2581_s8 + $0xa8] sm:$0xff] %vm1676_vm1, %v1633_v42  ;;  %v1180_v46 = vpop.f32.mrb[56].mxu0  ;;  %v2019_v49 = vpop.f32.mrb[56].mxu1 }
 0x18a   : > { %v1462_v47 = vadd.f32 %v2019_v49, %v1173_v45  ;;  %v1182_v54 = vpop.f32.mrb[57].mxu0  ;;  %v1453_v15 = vpop.f32.mrb[57].mxu1  ;;  %v1181_v51 = vadd.f32 %v2567_v53, %v1180_v46 }
 0x18b   : > { %v1454_v7 = vadd.f32 %v1453_v15, %v1165_v19  ;;  %v1183_v61 = vpop.f32.mrb[58].mxu0  ;;  %v2020_v1 = vpop.f32.mrb[58].mxu1 }
 0x18c   : > { %v1638_v2 = vmax.f32 %v1462_v47, 0.0  ;;  %v1465_v57 = vadd.f32 %v2020_v1, %v1176_v50  ;;  %v1185_v5 = vpop.f32.mrb[59].mxu0  ;;  %v1456_v26 = vpop.f32.mrb[59].mxu1  ;;  %v1184_v17 = vadd.f32 %v2567_v53, %v1183_v61 }
 0x18d   : > { %v1636_v6 = vmax.f32 %v1454_v7, 0.0  ;;  %v1457_v58 = vadd.f32 %v1456_v26, %v1168_v39 }
 0x18e   : > { %1703 = vst.msk [vmem:[%s2581_s8 + $0xd0] sm:$0xff] %vm1676_vm1, %v1638_v2  ;;  %v1639_v27 = vmax.f32 %v1465_v57, 0.0 }
 0x18f   : > { %1701 = vst.msk [vmem:[%s2581_s8 + $0xc0] sm:$0xff] %vm1676_vm1, %v1636_v6  ;;  %v1637_v63 = vmax.f32 %v1457_v58, 0.0 }
 0x190   : > { %1704 = vst.msk [vmem:[%s2581_s8 + $0xd8] sm:$0xff] %vm1676_vm1, %v1639_v27 }
 0x191   : > { %1702 = vst.msk [vmem:[%s2581_s8 + $0xc8] sm:$0xff] %vm1676_vm1, %v1637_v63  ;;  %v1188_v9 = vpop.f32.mrb[60].mxu0  ;;  %v2023_v10 = vpop.f32.mrb[60].mxu1 }
 0x192   : > { %v1189_v13 = vadd.f32 %v2567_v53, %v1188_v9  ;;  %v1190_v14 = vpop.f32.mrb[61].mxu0  ;;  %v1469_v3 = vpop.f32.mrb[61].mxu1 }
 0x193   : > { %v1470_v55 = vadd.f32 %v1469_v3, %v1181_v51  ;;  %v1191_v59 = vpop.f32.mrb[62].mxu0  ;;  %v2024_v18 = vpop.f32.mrb[62].mxu1 }
 0x194   : > { %v1478_v31 = vadd.f32 %v2023_v10, %v1189_v13  ;;  %v1192_v21 = vadd.f32 %v2567_v53, %v1191_v59  ;;  %v1193_v23 = vpop.f32.mrb[63].mxu0  ;;  %v1472_v22 = vpop.f32.mrb[63].mxu1 }
 0x195   : > { %v1640_v29 = vmax.f32 %v1470_v55, 0.0  ;;  %v1473_v25 = vadd.f32 %v1472_v22, %v1184_v17 }
 0x196   : > { %v1642_v30 = vmax.f32 %v1478_v31, 0.0  ;;  %v1481_v33 = vadd.f32 %v2024_v18, %v1192_v21 }
 0x197   : > { %1705 = vst.msk [vmem:[%s2581_s8 + $0xe0] sm:$0xff] %vm1676_vm1, %v1640_v29  ;;  %v1641_v34 = vmax.f32 %v1473_v25, 0.0 }
 0x198   : > { %1707 = vst.msk [vmem:[%s2581_s8 + $0xf0] sm:$0xff] %vm1676_vm1, %v1642_v30  ;;  %v1643_v62 = vmax.f32 %v1481_v33, 0.0 }
 0x199   : > { %1706 = vst.msk [vmem:[%s2581_s8 + $0xe8] sm:$0xff] %vm1676_vm1, %v1641_v34  ;;  %v1196_v37 = vpop.f32.mrb[64].mxu0  ;;  %v2027_v43 = vpop.f32.mrb[64].mxu1 }
 0x19a   : > { %1708 = vst.msk [vmem:[%s2581_s8 + $0xf8] sm:$0xff] %vm1676_vm1, %v1643_v62  ;;  %v1197_v11 = vadd.f32 %v2567_v53, %v1196_v37  ;;  %v1198_v35 = vpop.f32.mrb[65].mxu0  ;;  %v1485_v41 = vpop.f32.mrb[65].mxu1 }
 0x19b   : > { %v1199_v38 = vpop.f32.mrb[66].mxu0  ;;  %v2028_v42 = vpop.f32.mrb[66].mxu1 }
 0x19c   : > { %v1486_v45 = vadd.f32 %v1485_v41, %v1197_v11  ;;  %v1200_v19 = vadd.f32 %v2567_v53, %v1199_v38  ;;  %v1201_v46 = vpop.f32.mrb[67].mxu0  ;;  %v1488_v49 = vpop.f32.mrb[67].mxu1 }
 0x19e   : > { %v1644_v50 = vmax.f32 %v1486_v45, 0.0  ;;  %v1489_v47 = vadd.f32 %v1488_v49, %v1200_v19  ;;  %v1269_v19 = vadd.f32 %v2567_v53, %v2512_v60  ;;  %v1261_v49 = vadd.f32 %v2567_v53, %v2506_v52 }
 0x19f   : > { %v1264_v60 = vadd.f32 %v2567_v53, %v2510_v56 }
 0x1a0   : > { %1709 = vst.msk [vmem:[%s2581_s8 + $0x100] sm:$0xff] %vm1676_vm1, %v1644_v50  ;;  %v1645_v54 = vmax.f32 %v1489_v47, 0.0 }
 0x1a1   : > { %v1204_v15 = vpop.f32.mrb[68].mxu0  ;;  %v2031_v39 = vpop.f32.mrb[68].mxu1 }
 0x1a2   : > { %1710 = vst.msk [vmem:[%s2581_s8 + $0x108] sm:$0xff] %vm1676_vm1, %v1645_v54  ;;  %v1205_v7 = vadd.f32 %v2567_v53, %v1204_v15  ;;  %v1206_v61 = vpop.f32.mrb[69].mxu0  ;;  %v1501_v1 = vpop.f32.mrb[69].mxu1  ;;  %v1272_v54 = vadd.f32 %v2567_v53, %v2514_v0 }
 0x1a3   : > { %v1207_v2 = vpop.f32.mrb[70].mxu0  ;;  %v2032_v57 = vpop.f32.mrb[70].mxu1 }
 0x1a4   : > { %v1494_v5 = vadd.f32 %v2027_v43, %v1205_v7  ;;  %v1208_v26 = vadd.f32 %v2567_v53, %v1207_v2  ;;  %v1209_v6 = vpop.f32.mrb[71].mxu0  ;;  %v1504_v58 = vpop.f32.mrb[71].mxu1 }
 0x1a6   : > { %v1646_v27 = vmax.f32 %v1494_v5, 0.0  ;;  %v1497_v63 = vadd.f32 %v2028_v42, %v1208_v26 }
 0x1a8   : > { %1711 = vst.msk [vmem:[%s2581_s8 + $0x110] sm:$0xff] %vm1676_vm1, %v1646_v27  ;;  %v1647_v51 = vmax.f32 %v1497_v63, 0.0 }
 0x1a9   : > { %v1212_v9 = vpop.f32.mrb[72].mxu0  ;;  %v2713_v10 = vpop.f32.mrb[72].mxu1 }
 0x1aa   : > { %1712 = vst.msk [vmem:[%s2581_s8 + $0x118] sm:$0xff] %vm1676_vm1, %v1647_v51  ;;  %v1213_v13 = vadd.f32 %v2567_v53, %v1212_v9  ;;  %v1214_v14 = vpop.f32.mrb[73].mxu0  ;;  %v1517_v3 = vpop.f32.mrb[73].mxu1 }
 0x1ab   : > { %v1215_v17 = vpop.f32.mrb[74].mxu0  ;;  %v2718_v55 = vpop.f32.mrb[74].mxu1  ;;  %v1285_v14 = vadd.f32 %v2567_v53, %v2526_v12 }
 0x1ac   : > { %v1502_v59 = vadd.f32 %v1501_v1, %v1213_v13  ;;  %v1216_v18 = vadd.f32 %v2567_v53, %v1215_v17  ;;  %v1217_v31 = vpop.f32.mrb[75].mxu0  ;;  %v1520_v21 = vpop.f32.mrb[75].mxu1  ;;  %v1277_v17 = vadd.f32 %v2567_v53, %v2518_v4 }
 0x1ad   : > { %v1288_v31 = vadd.f32 %v2567_v53, %v2530_v16 }
 0x1ae   : > { %v1648_v23 = vmax.f32 %v1502_v59, 0.0  ;;  %v1505_v22 = vadd.f32 %v1504_v58, %v1216_v18 }
 0x1b0   : > { %1713 = vst.msk [vmem:[%s2581_s8 + $0x120] sm:$0xff] %vm1676_vm1, %v1648_v23  ;;  %v1649_v29 = vmax.f32 %v1505_v22, 0.0 }
 0x1b1   : > { %v1220_v25 = vpop.f32.mrb[76].mxu0  ;;  %v2723_v30 = vpop.f32.mrb[76].mxu1 }
 0x1b2   : > { %1714 = vst.msk [vmem:[%s2581_s8 + $0x128] sm:$0xff] %vm1676_vm1, %v1649_v29  ;;  %v1221_v33 = vadd.f32 %v2567_v53, %v1220_v25  ;;  %v1222_v34 = vpop.f32.mrb[77].mxu0  ;;  %v2728_v62 = vpop.f32.mrb[77].mxu1  ;;  %v1280_v29 = vadd.f32 %v2567_v53, %v2522_v8 }
 0x1b3   : > { %v1223_v37 = vpop.f32.mrb[78].mxu0  ;;  %v2730_v43 = vpop.f32.mrb[78].mxu1 }
 0x1b4   : > { %v1510_v11 = vadd.f32 %v2031_v39, %v1221_v33  ;;  %v1224_v35 = vadd.f32 %v2567_v53, %v1223_v37  ;;  %v1225_v41 = vpop.f32.mrb[79].mxu0  ;;  %v2733_v38 = vpop.f32.mrb[79].mxu1 }
 0x1b6   : > { %v1650_v42 = vmax.f32 %v1510_v11, 0.0  ;;  %v1513_v45 = vadd.f32 %v2032_v57, %v1224_v35 }
 0x1b8   : > { %1715 = vst.msk [vmem:[%s2581_s8 + $0x130] sm:$0xff] %vm1676_vm1, %v1650_v42  ;;  %v1651_v46 = vmax.f32 %v1513_v45, 0.0 }
 0x1b9   : > { %v1228_v50 = vpop.f32.mrb[80].mxu0  ;;  %v2043_v47 = vpop.f32.mrb[80].mxu1 }
 0x1ba   : > { %1716 = vst.msk [vmem:[%s2581_s8 + $0x138] sm:$0xff] %vm1676_vm1, %v1651_v46  ;;  %v1229_v15 = vadd.f32 %v2567_v53, %v1228_v50  ;;  %v1558_v39 = vadd.f32 %v2043_v47, %v1269_v19  ;;  %v1230_v7 = vpop.f32.mrb[81].mxu0  ;;  %v1549_v61 = vpop.f32.mrb[81].mxu1  ;;  %v1293_v47 = vadd.f32 %v2567_v53, %v2534_v20 }
 0x1bb   : > { %v1550_v1 = vadd.f32 %v1549_v61, %v1261_v49  ;;  %v1231_v2 = vpop.f32.mrb[82].mxu0  ;;  %v2044_v52 = vpop.f32.mrb[82].mxu1  ;;  %v1301_v49 = vadd.f32 %v2567_v53, %v2542_v28 }
 0x1bc   : > { %v1518_v57 = vadd.f32 %v1517_v3, %v1229_v15  ;;  %v1662_v5 = vmax.f32 %v1558_v39, 0.0  ;;  %v1232_v0 = vadd.f32 %v2567_v53, %v1231_v2  ;;  %v1561_v26 = vadd.f32 %v2044_v52, %v1272_v54  ;;  %v1233_v6 = vpop.f32.mrb[83].mxu0  ;;  %v1552_v58 = vpop.f32.mrb[83].mxu1 }
 0x1bd   : > { %v1660_v27 = vmax.f32 %v1550_v1, 0.0  ;;  %v1553_v63 = vadd.f32 %v1552_v58, %v1264_v60  ;;  %v1296_v60 = vadd.f32 %v2567_v53, %v2538_v24 }
 0x1be   : > { %v1652_v51 = vmax.f32 %v1518_v57, 0.0  ;;  %1727 = vst.msk [vmem:[%s2581_s8 + $0x190] sm:$0xff] %vm1676_vm1, %v1662_v5  ;;  %v1521_v56 = vadd.f32 %v1520_v21, %v1232_v0  ;;  %v1663_v9 = vmax.f32 %v1561_v26, 0.0 }
 0x1bf   : > { %1725 = vst.msk [vmem:[%s2581_s8 + $0x180] sm:$0xff] %vm1676_vm1, %v1660_v27  ;;  %v1661_v13 = vmax.f32 %v1553_v63, 0.0 }
 0x1c0   : > { %1717 = vst.msk [vmem:[%s2581_s8 + $0x140] sm:$0xff] %vm1676_vm1, %v1652_v51  ;;  %v1653_v3 = vmax.f32 %v1521_v56, 0.0  ;;  %1728 = vst.msk [vmem:[%s2581_s8 + $0x198] sm:$0xff] %vm1676_vm1, %v1663_v9  ;;  %v1317_v51 = vadd.f32 %v2567_v53, %v2558_v44  ;;  %v1309_v9 = vadd.f32 %v2567_v53, %v2550_v36 }
 0x1c1   : > { %1726 = vst.msk [vmem:[%s2581_s8 + $0x188] sm:$0xff] %vm1676_vm1, %v1661_v13  ;;  %v1236_v59 = vpop.f32.mrb[84].mxu0  ;;  %v2047_v18 = vpop.f32.mrb[84].mxu1 }
 0x1c2   : > { %1718 = vst.msk [vmem:[%s2581_s8 + $0x148] sm:$0xff] %vm1676_vm1, %v1653_v3  ;;  %v1237_v21 = vadd.f32 %v2567_v53, %v1236_v59  ;;  %v1574_v12 = vadd.f32 %v2047_v18, %v1285_v14  ;;  %v1238_v23 = vpop.f32.mrb[85].mxu0  ;;  %v1565_v22 = vpop.f32.mrb[85].mxu1  ;;  %v1312_v18 = vadd.f32 %v2567_v53, %v2554_v40 }
 0x1c3   : > { %v1566_v4 = vadd.f32 %v1565_v22, %v1277_v17  ;;  %v1239_v25 = vpop.f32.mrb[86].mxu0  ;;  %v2048_v33 = vpop.f32.mrb[86].mxu1 }
 0x1c4   : > { %v1526_v34 = vadd.f32 %v2713_v10, %v1237_v21  ;;  %v1666_v37 = vmax.f32 %v1574_v12, 0.0  ;;  %v1240_v16 = vadd.f32 %v2567_v53, %v1239_v25  ;;  %v1577_v11 = vadd.f32 %v2048_v33, %v1288_v31  ;;  %v1241_v35 = vpop.f32.mrb[87].mxu0  ;;  %v1568_v41 = vpop.f32.mrb[87].mxu1 }
 0x1c5   : > { %v1664_v42 = vmax.f32 %v1566_v4, 0.0  ;;  %v1569_v45 = vadd.f32 %v1568_v41, %v1280_v29 }
 0x1c6   : > { %v1654_v19 = vmax.f32 %v1526_v34, 0.0  ;;  %1731 = vst.msk [vmem:[%s2581_s8 + $0x1b0] sm:$0xff] %vm1676_vm1, %v1666_v37  ;;  %v1529_v8 = vadd.f32 %v2718_v55, %v1240_v16  ;;  %v1667_v46 = vmax.f32 %v1577_v11, 0.0  ;;  %v1304_v55 = vadd.f32 %v2567_v53, %v2546_v32 }
 0x1c7   : > { %1729 = vst.msk [vmem:[%s2581_s8 + $0x1a0] sm:$0xff] %vm1676_vm1, %v1664_v42  ;;  %v1665_v10 = vmax.f32 %v1569_v45, 0.0 }
 0x1c8   : > { %1719 = vst.msk [vmem:[%s2581_s8 + $0x150] sm:$0xff] %vm1676_vm1, %v1654_v19  ;;  %v1655_v50 = vmax.f32 %v1529_v8, 0.0  ;;  %1732 = vst.msk [vmem:[%s2581_s8 + $0x1b8] sm:$0xff] %vm1676_vm1, %v1667_v46 }
 0x1c9   : > { %1730 = vst.msk [vmem:[%s2581_s8 + $0x1a8] sm:$0xff] %vm1676_vm1, %v1665_v10  ;;  %v1244_v54 = vpop.f32.mrb[88].mxu0  ;;  %v2051_v15 = vpop.f32.mrb[88].mxu1 }
 0x1ca   : > { %1720 = vst.msk [vmem:[%s2581_s8 + $0x158] sm:$0xff] %vm1676_vm1, %v1655_v50  ;;  %v1245_v39 = vadd.f32 %v2567_v53, %v1244_v54  ;;  %v1590_v28 = vadd.f32 %v2051_v15, %v1301_v49  ;;  %v1246_v7 = vpop.f32.mrb[89].mxu0  ;;  %v1581_v61 = vpop.f32.mrb[89].mxu1 }
 0x1cb   : > { %v1582_v20 = vadd.f32 %v1581_v61, %v1293_v47  ;;  %v1247_v1 = vpop.f32.mrb[90].mxu0  ;;  %v2052_v2 = vpop.f32.mrb[90].mxu1 }
 0x1cc   : > { %v1534_v52 = vadd.f32 %v2728_v62, %v1245_v39  ;;  %v1670_v57 = vmax.f32 %v1590_v28, 0.0  ;;  %v1248_v32 = vadd.f32 %v2567_v53, %v1247_v1  ;;  %v1593_v5 = vadd.f32 %v2052_v2, %v1304_v55  ;;  %v1249_v0 = vpop.f32.mrb[91].mxu0  ;;  %v1584_v26 = vpop.f32.mrb[91].mxu1 }
 0x1cd   : > { %v1668_v6 = vmax.f32 %v1582_v20, 0.0  ;;  %v1585_v58 = vadd.f32 %v1584_v26, %v1296_v60 }
 0x1ce   : > { %v1656_v27 = vmax.f32 %v1534_v52, 0.0  ;;  %1735 = vst.msk [vmem:[%s2581_s8 + $0x1d0] sm:$0xff] %vm1676_vm1, %v1670_v57  ;;  %v1537_v24 = vadd.f32 %v2733_v38, %v1248_v32  ;;  %v1671_v63 = vmax.f32 %v1593_v5, 0.0  ;;  %v1320_v38 = vadd.f32 %v2567_v53, %v2562_v48 }
 0x1cf   : > { %1733 = vst.msk [vmem:[%s2581_s8 + $0x1c0] sm:$0xff] %vm1676_vm1, %v1668_v6  ;;  %v1669_v62 = vmax.f32 %v1585_v58, 0.0 }
 0x1d0   : > { %1721 = vst.msk [vmem:[%s2581_s8 + $0x160] sm:$0xff] %vm1676_vm1, %v1656_v27  ;;  %v1657_v56 = vmax.f32 %v1537_v24, 0.0  ;;  %1736 = vst.msk [vmem:[%s2581_s8 + $0x1d8] sm:$0xff] %vm1676_vm1, %v1671_v63 }
 0x1d1   : > { %1734 = vst.msk [vmem:[%s2581_s8 + $0x1c8] sm:$0xff] %vm1676_vm1, %v1669_v62  ;;  %v1252_v13 = vpop.f32.mrb[92].mxu0  ;;  %v2055_v14 = vpop.f32.mrb[92].mxu1 }
 0x1d2   : > { %1722 = vst.msk [vmem:[%s2581_s8 + $0x168] sm:$0xff] %vm1676_vm1, %v1657_v56  ;;  %v1253_v3 = vadd.f32 %v2567_v53, %v1252_v13  ;;  %v1606_v44 = vadd.f32 %v2055_v14, %v1317_v51  ;;  %v1254_v17 = vpop.f32.mrb[93].mxu0  ;;  %v1597_v59 = vpop.f32.mrb[93].mxu1 }
 0x1d3   : > { %v1598_v36 = vadd.f32 %v1597_v59, %v1309_v9  ;;  %v1255_v31 = vpop.f32.mrb[94].mxu0  ;;  %v2056_v21 = vpop.f32.mrb[94].mxu1 }
 0x1d4   : > { %v1542_v12 = vadd.f32 %v2723_v30, %v1253_v3  ;;  %v1674_v48 = vmax.f32 %v1606_v44, 0.0  ;;  %v1256_v23 = vadd.f32 %v2567_v53, %v1255_v31  ;;  %v1609_v22 = vadd.f32 %v2056_v21, %v1320_v38  ;;  %v1257_v29 = vpop.f32.mrb[95].mxu0  ;;  %v1600_v4 = vpop.f32.mrb[95].mxu1 }
 0x1d5   : > { %v1672_v25 = vmax.f32 %v1598_v36, 0.0  ;;  %v1601_v33 = vadd.f32 %v1600_v4, %v1312_v18 }
 0x1d6   : > { %v1658_v34 = vmax.f32 %v1542_v12, 0.0  ;;  %1739 = vst.msk [vmem:[%s2581_s8 + $0x1f0] sm:$0xff] %vm1676_vm1, %v1674_v48  ;;  %v1545_v40 = vadd.f32 %v2730_v43, %v1256_v23  ;;  %v1675_v37 = vmax.f32 %v1609_v22, 0.0 }
 0x1d7   : > { %1737 = vst.msk [vmem:[%s2581_s8 + $0x1e0] sm:$0xff] %vm1676_vm1, %v1672_v25  ;;  %v1673_v30 = vmax.f32 %v1601_v33, 0.0 }
 0x1d8   : > { %1723 = vst.msk [vmem:[%s2581_s8 + $0x170] sm:$0xff] %vm1676_vm1, %v1658_v34  ;;  %v1659_v16 = vmax.f32 %v1545_v40, 0.0  ;;  %1740 = vst.msk [vmem:[%s2581_s8 + $0x1f8] sm:$0xff] %vm1676_vm1, %v1675_v37 }
 0x1d9   : > { %1738 = vst.msk [vmem:[%s2581_s8 + $0x1e8] sm:$0xff] %vm1676_vm1, %v1673_v30 }
 0x1da   : > { %1724 = vst.msk [vmem:[%s2581_s8 + $0x178] sm:$0xff] %vm1676_vm1, %v1659_v16 }
 0x1db PF: > { %s13_s12 = sadd.s32 1, %s2251_s12  }
 0x1dc   : > { %p10_p4 = scmp.ge.s32.totalorder %s13_s12, 4  }
 0x1de   :  { %12 = sbr.rel (!%p10_p4) target bundleno = 1 (0x1), region = 62 }

// kernel: simple_lstm_forward.7
= control target key start
LH: loop header
LB: loop body
LE: loop exit
PB: predicated region body
PF: predicated region fallthrough
CT: control target
= control target key end

     0   :  { %vm1218_vm0 = vcmask 523264   ;;  %s2862_s1 = inlined_call_operand.vmem [shape: bf16[1728,128], index: 1, kind: input, shape index: {}]   ;;  %s2863_s0 = inlined_call_operand.vmem [shape: bf16[64,1728], index: 0, kind: input, shape index: {}]   ;;  %s2864_s2 = inlined_call_operand.vmem [shape: f32[1,128], index: 2, kind: input, shape index: {}]   ;;  %s2865_s3 = inlined_call_operand.vmem [shape: f32[64,128], index: 3, kind: output, shape index: {}]  }
   0x1   :  { %v2108_v0 = vld [vmem:[%s2862_s1 + $0x40] sm:$0xff]   ;;  %v2110_v2 = vld [vmem:[%s2862_s1 + $0x48] sm:$0xff]   ;;  %v2112_v4 = vld [vmem:[%s2862_s1 + $0x50] sm:$0xff]  }
   0x2   :  { %v2109_v1 = vld [vmem:[%s2862_s1] sm:$0xff]   ;;  %1867 = vmatprep.subr.bf16.mxu1 %v2108_v0  ;;  %v2111_v3 = vld [vmem:[%s2862_s1 + $0x8] sm:$0xff]   ;;  %v2113_v5 = vld [vmem:[%s2862_s1 + $0x10] sm:$0xff]  }
   0x3   :  { %1868 = vmatpush3.bf16.msra.mxu1 %v2109_v1  ;;  %v2114_v6 = vld [vmem:[%s2862_s1 + $0x58] sm:$0xff]   ;;  %v2118_v8 = vld [vmem:[%s2862_s1 + $0x140] sm:$0xff]   ;;  %v2122_v12 = vld [vmem:[%s2862_s1 + $0x148] sm:$0xff]  }
   0x4   :  { %1869 = vmatprep.subr.bf16.mxu1 %v2110_v2  ;;  %v2115_v7 = vld [vmem:[%s2862_s1 + $0x18] sm:$0xff]   ;;  %v2116_v9 = vld [vmem:[%s2862_s1 + $0x60] sm:$0xff]   ;;  %1947 = vmatprep.subr.bf16.mxu0 %v2118_v8  ;;  %v2119_v13 = vld [vmem:[%s2862_s1 + $0x68] sm:$0xff]  }
   0x5   :  { %v2120_v10 = vld [vmem:[%s2862_s1 + $0x100] sm:$0xff]   ;;  %v2124_v14 = vld [vmem:[%s2862_s1 + $0x108] sm:$0xff]   ;;  %v2126_v16 = vld [vmem:[%s2862_s1 + $0x150] sm:$0xff]  }
   0x6   :  { %v2117_v11 = vld [vmem:[%s2862_s1 + $0x20] sm:$0xff]   ;;  %1948 = vmatpush3.bf16.msra.mxu0 %v2120_v10  ;;  %v2121_v15 = vld [vmem:[%s2862_s1 + $0x28] sm:$0xff]   ;;  %v2123_v17 = vld [vmem:[%s2862_s1 + $0x70] sm:$0xff]  }
   0x7   :  { %1870 = vmatpush3.bf16.msra.mxu1 %v2111_v3  ;;  %1949 = vmatprep.subr.bf16.mxu0 %v2122_v12  ;;  %v2128_v18 = vld [vmem:[%s2862_s1 + $0x110] sm:$0xff]   ;;  %v2127_v20 = vld [vmem:[%s2862_s1 + $0x78] sm:$0xff]   ;;  %v2134_v25 = vld [vmem:[%s2862_s1 + $0xc0] sm:$0xff]  }
   0x8   :  { %1871 = vmatprep.subr.bf16.mxu1 %v2112_v4  ;;  %v2125_v19 = vld [vmem:[%s2862_s1 + $0x30] sm:$0xff]   ;;  %v2132_v21 = vld [vmem:[%s2863_s0 + $0x4] ss:$56 sps:$4 sm:$0xff]   ;;  %v2130_v26 = vld [vmem:[%s2863_s0] ss:$56 sps:$4 sm:$0xff]  }
   0x9   :  { %v2133_v22 = vld [vmem:[%s2862_s1 + $0x158] sm:$0xff]   ;;  %1263 = vmatprep.mubr.bf16.mxu1 %v2132_v21  ;;  %v2137_v27 = vld [vmem:[%s2862_s1 + $0x160] sm:$0xff]   ;;  %v2138_v30 = vld [vmem:[%s2862_s1 + $0xc8] sm:$0xff]  }
   0xa   :  { %1950 = vmatpush3.bf16.msra.mxu0 %v2124_v14  ;;  %v2129_v23 = vld [vmem:[%s2862_s1 + $0x38] sm:$0xff]   ;;  %v2136_v28 = vld [vmem:[%s2862_s1 + $0x80] sm:$0xff]   ;;  %v2141_v31 = vld [vmem:[%s2863_s0 + $0x74] ss:$56 sps:$4 sm:$0xff]  }
   0xb   :  { %1872 = vmatpush3.bf16.msra.mxu1 %v2113_v5  ;;  %1951 = vmatprep.subr.bf16.mxu0 %v2126_v16  ;;  %v2135_v24 = vld [vmem:[%s2862_s1 + $0x118] sm:$0xff]   ;;  %v2139_v29 = vld [vmem:[%s2862_s1 + $0x120] sm:$0xff]   ;;  %v2143_v32 = vld [vmem:[%s2862_s1 + $0x168] sm:$0xff]  }
   0xc   :  { %1873 = vmatprep.subr.bf16.mxu1 %v2114_v6  ;;  %v2140_v33 = vld [vmem:[%s2862_s1 + $0x88] sm:$0xff]   ;;  %v2145_v36 = vld [vmem:[%s2862_s1 + $0xd0] sm:$0xff]   ;;  %v2149_v40 = vld [vmem:[%s2862_s1 + $0xd8] sm:$0xff]  }
   0xd   :  { %v2146_v34 = vld [vmem:[%s2862_s1 + $0x128] sm:$0xff]   ;;  %v2148_v37 = vld [vmem:[%s2862_s1 + $0x170] sm:$0xff]   ;;  %v2152_v41 = vld [vmem:[%s2863_s0 + $0xe4] ss:$56 sps:$4 sm:$0xff]  }
   0xe   :  { %1952 = vmatpush3.bf16.msra.mxu0 %v2128_v18  ;;  %v2144_v35 = vld [vmem:[%s2863_s0 + $0x70] ss:$56 sps:$4 sm:$0xff]   ;;  %v2151_v42 = vld [vmem:[%s2862_s1 + $0x98] sm:$0xff]   ;;  %v2156_v44 = vld [vmem:[%s2862_s1 + $0xe0] sm:$0xff]  }
   0xf   :  { %1874 = vmatpush3.bf16.msra.mxu1 %v2115_v7  ;;  %1953 = vmatprep.subr.bf16.mxu0 %v2133_v22  ;;  %v2147_v38 = vld [vmem:[%s2862_s1 + $0x90] sm:$0xff]   ;;  %v2154_v43 = vld [vmem:[%s2862_s1 + $0x178] sm:$0xff]   ;;  %v2158_v47 = vld [vmem:[%s2862_s1 + $0xa0] sm:$0xff]  }
  0x10   :  { %1875 = vmatprep.subr.bf16.mxu1 %v2116_v9  ;;  %v2150_v39 = vld [vmem:[%s2862_s1 + $0x130] sm:$0xff]   ;;  %v2155_v45 = vld [vmem:[%s2863_s0 + $0xe0] ss:$56 sps:$4 sm:$0xff]   ;;  %v2163_v51 = vld [vmem:[%s2862_s1 + $0xe8] sm:$0xff]  }
  0x11   :  { %v2157_v46 = vld [vmem:[%s2862_s1 + $0x138] sm:$0xff]   ;;  %v2159_v48 = vld [vmem:[%s2863_s0 + $0x10] ss:$56 sps:$4 sm:$0xff]   ;;  %v2161_v49 = vld [vmem:[%s2863_s0 + $0x14] ss:$56 sps:$4 sm:$0xff]  }
  0x12   :  { %1954 = vmatpush3.bf16.msra.mxu0 %v2135_v24  ;;  %v2162_v50 = vld [vmem:[%s2862_s1 + $0x240] sm:$0xff]   ;;  %1393 = vmatprep.mubr.bf16.mxu0 %v2161_v49  ;;  %v2165_v53 = vld [vmem:[%s2862_s1 + $0xa8] sm:$0xff]   ;;  %v2170_v57 = vld [vmem:[%s2862_s1 + $0xf0] sm:$0xff]  }
  0x13   :  { %1876 = vmatpush3.bf16.msra.mxu1 %v2117_v11  ;;  %1955 = vmatprep.subr.bf16.mxu0 %v2137_v27  ;;  %v2164_v52 = vld [vmem:[%s2862_s1 + $0x200] sm:$0xff]   ;;  %v2166_v54 = vld [vmem:[%s2863_s0 + $0x154] ss:$56 sps:$4 sm:$0xff]   ;;  %v2169_v56 = vld [vmem:[%s2863_s0 + $0x150] ss:$56 sps:$4 sm:$0xff]  }
  0x14   :  { %1877 = vmatprep.subr.bf16.mxu1 %v2119_v13  ;;  %v2168_v55 = vld [vmem:[%s2862_s1 + $0x248] sm:$0xff]   ;;  %v2172_v59 = vld [vmem:[%s2862_s1 + $0xb0] sm:$0xff]   ;;  %v2173_v60 = vld [vmem:[%s2863_s0 + $0x84] ss:$56 sps:$4 sm:$0xff]  }
  0x15   :  { %v2171_v58 = vld [vmem:[%s2862_s1 + $0x208] sm:$0xff]   ;;  %v2175_v61 = vld [vmem:[%s2862_s1 + $0x250] sm:$0xff]   ;;  %v2176_v62 = vld [vmem:[%s2862_s1 + $0xf8] sm:$0xff]  }
  0x16   :  { %1956 = vmatpush3.bf16.msra.mxu0 %v2139_v29  ;;  %v2177_v63 = vld [vmem:[%s2863_s0 + $0x80] ss:$56 sps:$4 sm:$0xff]   ;;  %v2178_v0 = vld [vmem:[%s2862_s1 + $0x210] sm:$0xff]   ;;  %v2182_v3 = vld [vmem:[%s2863_s0 + $0xc] ss:$56 sps:$4 sm:$0xff]  }
  0x17   :  { %1878 = vmatpush3.bf16.msra.mxu1 %v2121_v15  ;;  %1957 = vmatprep.subr.bf16.mxu0 %v2143_v32  ;;  %v2179_v1 = vld [vmem:[%s2862_s1 + $0xb8] sm:$0xff]   ;;  %v2180_v2 = vld [vmem:[%s2863_s0 + $0x8] ss:$56 sps:$4 sm:$0xff]   ;;  %v2187_v8 = vld [vmem:[%s2863_s0 + $0xf4] ss:$56 sps:$4 sm:$0xff]  }
  0x18   :  { %1879 = vmatprep.subr.bf16.mxu1 %v2123_v17  ;;  %v2183_v4 = vld [vmem:[%s2862_s1 + $0x258] sm:$0xff]   ;;  %v2184_v5 = vld [vmem:[%s2862_s1 + $0x1c0] sm:$0xff]   ;;  %v2190_v10 = vld [vmem:[%s2863_s0 + $0xf0] ss:$56 sps:$4 sm:$0xff]  }
  0x19   :  { %v2185_v6 = vld [vmem:[%s2862_s1 + $0x218] sm:$0xff]   ;;  %v2186_v7 = vld [vmem:[%s2862_s1 + $0x180] sm:$0xff]   ;;  %v2191_v11 = vld [vmem:[%s2862_s1 + $0x1c8] sm:$0xff]  }
  0x1a   :  { %1958 = vmatpush3.bf16.msra.mxu0 %v2146_v34  ;;  %v2189_v9 = vld [vmem:[%s2862_s1 + $0x260] sm:$0xff]   ;;  %v2193_v13 = vld [vmem:[%s2862_s1 + $0x188] sm:$0xff]   ;;  %v2194_v14 = vld [vmem:[%s2863_s0 + $0x7c] ss:$56 sps:$4 sm:$0xff]   ;;  %v2300_v34 = vmov 0  }
  0x1b   :  { %1880 = vmatpush3.bf16.msra.mxu1 %v2125_v19  ;;  %1959 = vmatprep.subr.bf16.mxu0 %v2148_v37  ;;  %v2192_v12 = vld [vmem:[%s2862_s1 + $0x220] sm:$0xff]   ;;  %v2196_v15 = vld [vmem:[%s2862_s1 + $0x268] sm:$0xff]   ;;  %v2197_v16 = vld [vmem:[%s2863_s0 + $0x78] ss:$56 sps:$4 sm:$0xff]  }
  0x1c   :  { %1881 = vmatprep.subr.bf16.mxu1 %v2127_v20  ;;  %v2198_v17 = vld [vmem:[%s2862_s1 + $0x1d0] sm:$0xff]   ;;  %v2199_v18 = vld [vmem:[%s2862_s1 + $0x228] sm:$0xff]   ;;  %v2201_v20 = vld [vmem:[%s2863_s0 + $0x164] ss:$56 sps:$4 sm:$0xff]  }
  0x1d   :  { %v2200_v19 = vld [vmem:[%s2862_s1 + $0x190] sm:$0xff]   ;;  %v2204_v22 = vld [vmem:[%s2863_s0 + $0x160] ss:$56 sps:$4 sm:$0xff]   ;;  %v2220_v37 = vld [vmem:[%s2862_s1 + $0x1a8] sm:$0xff]  }
  0x1e   :  { %1960 = vmatpush3.bf16.msra.mxu0 %v2150_v39  ;;  %v2203_v21 = vld [vmem:[%s2862_s1 + $0x270] sm:$0xff]   ;;  %v2210_v27 = vld [vmem:[%s2862_s1 + $0x278] sm:$0xff]   ;;  %v2212_v29 = vld [vmem:[%s2862_s1 + $0x1e0] sm:$0xff]  }
  0x1f   :  { %1882 = vmatpush3.bf16.msra.mxu1 %v2129_v23  ;;  %1961 = vmatprep.subr.bf16.mxu0 %v2154_v43  ;;  %v2205_v23 = vld [vmem:[%s2862_s1 + $0x1d8] sm:$0xff]   ;;  %v2206_v24 = vld [vmem:[%s2862_s1 + $0x230] sm:$0xff]  }
  0x20   :  { %1907 = vmatprep.subr.bf16.mxu1 %v2134_v25  ;;  %v2207_v25 = vld [vmem:[%s2862_s1 + $0x198] sm:$0xff]  }
  0x21   :  { %v2215_v32 = vld [vmem:[%s2863_s0 + $0x20] ss:$56 sps:$4 sm:$0xff]  }
  0x22   :  { %1264 = vmatmul.mubr.bf16.vlgmr.msra.gmra.mrb[0].mxu1 %v2130_v26  ;;  %1962 = vmatpush3.bf16.msra.mxu0 %v2157_v46  ;;  %v2208_v26 = vld [vmem:[%s2863_s0 + $0xec] ss:$56 sps:$4 sm:$0xff]   ;;  %v2223_v39 = vld [vmem:[%s2863_s0 + $0x158] ss:$56 sps:$4 sm:$0xff]  }
  0x23   :  { %1908 = vmatpush3.bf16.msra.mxu1 %v2136_v28  ;;  %1271 = vmatprep.mubr.bf16.mxu1 %v2141_v31  ;;  %v2211_v28 = vld [vmem:[%s2863_s0 + $0xe8] ss:$56 sps:$4 sm:$0xff]   ;;  %v2227_v43 = vld [vmem:[%s2862_s1 + $0x1f8] sm:$0xff]  }
  0x24   :  { %1909 = vmatprep.subr.bf16.mxu1 %v2138_v30  ;;  %2027 = vmatprep.subr.bf16.mxu0 %v2162_v50  ;;  %v2213_v30 = vld [vmem:[%s2862_s1 + $0x238] sm:$0xff]   ;;  %v2214_v31 = vld [vmem:[%s2862_s1 + $0x1a0] sm:$0xff]  }
  0x25   :  { %1394 = vmatmul.mubr.bf16.vlgmr.msra.gmra.mrb[0].mxu0 %v2159_v48  ;;  %v2230_v46 = vld [vmem:[%s2863_s0 + $0x18] ss:$56 sps:$4 sm:$0xff]   ;;  %v2233_v48 = vld [vmem:[%s2862_s1 + $0x2c0] sm:$0xff]  }
  0x26   :  { %2028 = vmatpush3.bf16.msra.mxu0 %v2164_v52  ;;  %1401 = vmatprep.mubr.bf16.mxu0 %v2173_v60  ;;  %v2234_v49 = vld [vmem:[%s2862_s1 + $0x318] sm:$0xff]   ;;  %v2235_v50 = vld [vmem:[%s2862_s1 + $0x280] sm:$0xff]   ;;  %v2247_v60 = vld [vmem:[%s2863_s0 + $0x90] ss:$56 sps:$4 sm:$0xff]  }
  0x27   :  { %1910 = vmatpush3.bf16.msra.mxu1 %v2140_v33  ;;  %2029 = vmatprep.subr.bf16.mxu0 %v2168_v55  ;;  %v2217_v33 = vld [vmem:[%s2863_s0 + $0x24] ss:$56 sps:$4 sm:$0xff]   ;;  %v2241_v55 = vld [vmem:[%s2863_s0 + $0x88] ss:$56 sps:$4 sm:$0xff]  }
  0x28   :  { %1911 = vmatprep.subr.bf16.mxu1 %v2145_v36  ;;  %v2219_v36 = vld [vmem:[%s2862_s1 + $0x300] sm:$0xff]  }
  0x29   :  { %v2237_v52 = vld [vmem:[%s2862_s1 + $0x320] sm:$0xff]  }
  0x2a   :  { %1272 = vmatmul.mubr.bf16.gmra.mrb[4].mxu1 %v2144_v35  ;;  %2030 = vmatpush3.bf16.msra.mxu0 %v2171_v58  ;;  %v2218_v35 = vld [vmem:[%s2862_s1 + $0x1e8] sm:$0xff]  }
  0x2b   :  { %1912 = vmatpush3.bf16.msra.mxu1 %v2147_v38  ;;  %1279 = vmatprep.mubr.bf16.mxu1 %v2152_v41  ;;  %v2221_v38 = vld [vmem:[%s2863_s0 + $0x15c] ss:$56 sps:$4 sm:$0xff]   ;;  %v2225_v41 = vld [vmem:[%s2862_s1 + $0x308] sm:$0xff]  }
  0x2c   :  { %1913 = vmatprep.subr.bf16.mxu1 %v2149_v40  ;;  %2031 = vmatprep.subr.bf16.mxu0 %v2175_v61  ;;  %v2224_v40 = vld [vmem:[%s2862_s1 + $0x1f0] sm:$0xff]   ;;  %v2248_v61 = vld [vmem:[%s2862_s1 + $0x2d8] sm:$0xff]  }
  0x2d   :  { %1402 = vmatmul.mubr.bf16.gmra.mrb[4].mxu0 %v2177_v63  ;;  %v2244_v58 = vld [vmem:[%s2863_s0 + $0x94] ss:$56 sps:$4 sm:$0xff]   ;;  %v2250_v63 = vld [vmem:[%s2862_s1 + $0x298] sm:$0xff]  }
  0x2e   :  { %2032 = vmatpush3.bf16.msra.mxu0 %v2178_v0  ;;  %1409 = vmatprep.mubr.bf16.mxu0 %v2187_v8  ;;  %v2251_v0 = vld [vmem:[%s2863_s0 + $0xfc] ss:$56 sps:$4 sm:$0xff]   ;;  %v2261_v8 = vld [vmem:[%s2862_s1 + $0x340] sm:$0xff]  }
  0x2f   :  { %1914 = vmatpush3.bf16.msra.mxu1 %v2151_v42  ;;  %2033 = vmatprep.subr.bf16.mxu0 %v2183_v4  ;;  %v2226_v42 = vld [vmem:[%s2862_s1 + $0x1b0] sm:$0xff]   ;;  %v2256_v4 = vld [vmem:[%s2863_s0 + $0x104] ss:$56 sps:$4 sm:$0xff]  }
  0x30   :  { %1915 = vmatprep.subr.bf16.mxu1 %v2156_v44  ;;  %v2228_v44 = vld [vmem:[%s2862_s1 + $0x310] sm:$0xff]  }
  0x32   :  { %1280 = vmatmul.mubr.bf16.gmra.mrb[8].mxu1 %v2155_v45  ;;  %2034 = vmatpush3.bf16.msra.mxu0 %v2185_v6  ;;  %v2229_v45 = vld [vmem:[%s2862_s1 + $0x1b8] sm:$0xff]  }
  0x33   :  { %1916 = vmatpush3.bf16.msra.mxu1 %v2158_v47  ;;  %1287 = vmatprep.mubr.bf16.mxu1 %v2166_v54  ;;  %v2232_v47 = vld [vmem:[%s2863_s0 + $0x1c] ss:$56 sps:$4 sm:$0xff]   ;;  %v2239_v54 = vld [vmem:[%s2863_s0 + $0x8c] ss:$56 sps:$4 sm:$0xff]   ;;  %v2259_v6 = vld [vmem:[%s2863_s0 + $0x100] ss:$56 sps:$4 sm:$0xff]  }
  0x34   :  { %1917 = vmatprep.subr.bf16.mxu1 %v2163_v51  ;;  %2035 = vmatprep.subr.bf16.mxu0 %v2189_v9  ;;  %v2236_v51 = vld [vmem:[%s2862_s1 + $0x2c8] sm:$0xff]  }
  0x35   :  { %1410 = vmatmul.mubr.bf16.gmra.mrb[8].mxu0 %v2190_v10  ;;  %v2262_v9 = vld [vmem:[%s2862_s1 + $0x2a8] sm:$0xff]  }
  0x36   :  { %2036 = vmatpush3.bf16.msra.mxu0 %v2192_v12  ;;  %1417 = vmatprep.mubr.bf16.mxu0 %v2201_v20  ;;  %v2263_v10 = vld [vmem:[%s2863_s0 + $0x16c] ss:$56 sps:$4 sm:$0xff]   ;;  %v2266_v12 = vld [vmem:[%s2862_s1 + $0x2f0] sm:$0xff]   ;;  %v2275_v20 = vld [vmem:[%s2863_s0 + $0x28] ss:$56 sps:$4 sm:$0xff]  }
  0x37   :  { %1918 = vmatpush3.bf16.msra.mxu1 %v2165_v53  ;;  %2037 = vmatprep.subr.bf16.mxu0 %v2196_v15  ;;  %v2238_v53 = vld [vmem:[%s2862_s1 + $0x288] sm:$0xff]   ;;  %v2270_v15 = vld [vmem:[%s2862_s1 + $0x2b0] sm:$0xff]  }
  0x38   :  { %1919 = vmatprep.subr.bf16.mxu1 %v2170_v57  ;;  %v2243_v57 = vld [vmem:[%s2862_s1 + $0x328] sm:$0xff]  }
  0x3a   :  { %1288 = vmatmul.mubr.bf16.gmra.mrb[12].mxu1 %v2169_v56  ;;  %2038 = vmatpush3.bf16.msra.mxu0 %v2199_v18  ;;  %v2242_v56 = vld [vmem:[%s2862_s1 + $0x2d0] sm:$0xff]  }
  0x3b   :  { %1920 = vmatpush3.bf16.msra.mxu1 %v2172_v59  ;;  %1328 = vmatprep.mubr.bf16.mxu1 %v2182_v3  ;;  %v2246_v59 = vld [vmem:[%s2862_s1 + $0x290] sm:$0xff]   ;;  %v2255_v3 = vld [vmem:[%s2862_s1 + $0x338] sm:$0xff]  }
  0x3c   :  { %1921 = vmatprep.subr.bf16.mxu1 %v2176_v62  ;;  %2039 = vmatprep.subr.bf16.mxu0 %v2203_v21  ;;  %v2249_v62 = vld [vmem:[%s2862_s1 + $0x330] sm:$0xff]   ;;  %v2277_v21 = vld [vmem:[%s2863_s0 + $0x2c] ss:$56 sps:$4 sm:$0xff]  }
  0x3d   :  { %1418 = vmatmul.mubr.bf16.gmra.mrb[12].mxu0 %v2204_v22  ;;  %v2273_v18 = vld [vmem:[%s2862_s1 + $0x350] sm:$0xff]   ;;  %v2278_v22 = vld [vmem:[%s2862_s1 + $0x358] sm:$0xff]  }
  0x3e   :  { %2040 = vmatpush3.bf16.msra.mxu0 %v2206_v24  ;;  %1523 = vmatprep.mubr.bf16.mxu0 %v2217_v33  ;;  %v2281_v24 = vld [vmem:[%s2863_s0 + $0x34] ss:$56 sps:$4 sm:$0xff]   ;;  %v2293_v33 = vld [vmem:[%s2863_s0 + $0x110] ss:$56 sps:$4 sm:$0xff]  }
  0x3f   :  { %1922 = vmatpush3.bf16.msra.mxu1 %v2179_v1  ;;  %2041 = vmatprep.subr.bf16.mxu0 %v2210_v27  ;;  %v2253_v1 = vld [vmem:[%s2863_s0 + $0xf8] ss:$56 sps:$4 sm:$0xff]  }
  0x40   :  { %1987 = vmatprep.subr.bf16.mxu1 %v2184_v5  ;;  %v2258_v5 = vld [vmem:[%s2862_s1 + $0x2a0] sm:$0xff]   ;;  %v2284_v27 = vld [vmem:[%s2863_s0 + $0x98] ss:$56 sps:$4 sm:$0xff]  }
  0x42   :  { %1329 = vmatmul.mubr.bf16.vlgmr.msra.gmra.mrb[16].mxu1 %v2180_v2  ;;  %2042 = vmatpush3.bf16.msra.mxu0 %v2213_v30  ;;  %v2254_v2 = vld [vmem:[%s2862_s1 + $0x2e0] sm:$0xff]   ;;  %v2291_v30 = vld [vmem:[%s2863_s0 + $0x114] ss:$56 sps:$4 sm:$0xff]  }
  0x43   :  { %1988 = vmatpush3.bf16.msra.mxu1 %v2186_v7  ;;  %1336 = vmatprep.mubr.bf16.mxu1 %v2194_v14  ;;  %v2260_v7 = vld [vmem:[%s2862_s1 + $0x2e8] sm:$0xff]  }
  0x44   :  { %1989 = vmatprep.subr.bf16.mxu1 %v2191_v11  ;;  %1621 = vmatprep.subr.bf16.mxu0 %v2300_v34  ;;  %v2265_v11 = vld [vmem:[%s2863_s0 + $0x168] ss:$56 sps:$4 sm:$0xff]   ;;  %v2268_v14 = vld [vmem:[%s2863_s0 + $0x174] ss:$56 sps:$4 sm:$0xff]  }
  0x45   :  { %1524 = vmatmul.mubr.bf16.vlgmr.msra.gmra.mrb[16].mxu0 %v2215_v32  ;;  %v2294_v32 = vld [vmem:[%s2863_s0 + $0x17c] ss:$56 sps:$4 sm:$0xff]  }
  0x46   :  { %1622 = vmatpush1.bf16.msra.mxu0 %v2219_v36  ;;  %1531 = vmatprep.mubr.bf16.mxu0 %v2244_v58  ;;  %v2299_v36 = vld [vmem:[%s2863_s0 + $0x180] ss:$56 sps:$4 sm:$0xff]  }
  0x47   :  { %1990 = vmatpush3.bf16.msra.mxu1 %v2193_v13  ;;  %1623 = vmatprep.subr.bf16.mxu0 %v2300_v34  ;;  %v2267_v13 = vld [vmem:[%s2862_s1 + $0x348] sm:$0xff]  }
  0x48   :  { %1991 = vmatprep.subr.bf16.mxu1 %v2198_v17  ;;  %v2272_v17 = vld [vmem:[%s2862_s1 + $0x2f8] sm:$0xff]  }
  0x4a   :  { %1337 = vmatmul.mubr.bf16.gmra.mrb[20].mxu1 %v2197_v16  ;;  %1624 = vmatpush1.bf16.msra.mxu0 %v2225_v41  ;;  %v2271_v16 = vld [vmem:[%s2863_s0 + $0x170] ss:$56 sps:$4 sm:$0xff]  }
  0x4b   :  { %1992 = vmatpush3.bf16.msra.mxu1 %v2200_v19  ;;  %1344 = vmatprep.mubr.bf16.mxu1 %v2208_v26  ;;  %v2274_v19 = vld [vmem:[%s2862_s1 + $0x2b8] sm:$0xff]  }
  0x4c   :  { %1993 = vmatprep.subr.bf16.mxu1 %v2205_v23  ;;  %1625 = vmatprep.subr.bf16.mxu0 %v2300_v34  ;;  %v2279_v23 = vld [vmem:[%s2863_s0 + $0x30] ss:$56 sps:$4 sm:$0xff]   ;;  %v2285_v26 = vld [vmem:[%s2863_s0 + $0xa4] ss:$56 sps:$4 sm:$0xff]  }
  0x4d   :  { %1532 = vmatmul.mubr.bf16.gmra.mrb[20].mxu0 %v2247_v60 }
  0x4e   :  { %1626 = vmatpush1.bf16.msra.mxu0 %v2228_v44  ;;  %1539 = vmatprep.mubr.bf16.mxu0 %v2256_v4 }
  0x4f   :  { %1994 = vmatpush3.bf16.msra.mxu1 %v2207_v25  ;;  %1627 = vmatprep.subr.bf16.mxu0 %v2300_v34  ;;  %v2282_v25 = vld [vmem:[%s2863_s0 + $0x9c] ss:$56 sps:$4 sm:$0xff]  }
  0x50   :  { %1995 = vmatprep.subr.bf16.mxu1 %v2212_v29  ;;  %v2287_v29 = vld [vmem:[%s2863_s0 + $0xa0] ss:$56 sps:$4 sm:$0xff]  }
  0x52   :  { %1345 = vmatmul.mubr.bf16.gmra.mrb[24].mxu1 %v2211_v28  ;;  %1628 = vmatpush1.bf16.msra.mxu0 %v2234_v49  ;;  %v2288_v28 = vld [vmem:[%s2863_s0 + $0x10c] ss:$56 sps:$4 sm:$0xff]  }
  0x53   :  { %1996 = vmatpush3.bf16.msra.mxu1 %v2214_v31  ;;  %1352 = vmatprep.mubr.bf16.mxu1 %v2221_v38  ;;  %v2290_v31 = vld [vmem:[%s2863_s0 + $0x108] ss:$56 sps:$4 sm:$0xff]  }
  0x54   :  { %1997 = vmatprep.subr.bf16.mxu1 %v2218_v35  ;;  %1629 = vmatprep.subr.bf16.mxu0 %v2300_v34  ;;  %v2296_v35 = vld [vmem:[%s2863_s0 + $0x178] ss:$56 sps:$4 sm:$0xff]  }
  0x55   :  { %1540 = vmatmul.mubr.bf16.gmra.mrb[24].mxu0 %v2259_v6 }
  0x56   :  { %1630 = vmatpush1.bf16.msra.mxu0 %v2237_v52  ;;  %1547 = vmatprep.mubr.bf16.mxu0 %v2268_v14 }
  0x57   :  { %1998 = vmatpush3.bf16.msra.mxu1 %v2220_v37  ;;  %1631 = vmatprep.subr.bf16.mxu0 %v2300_v34 }
  0x58   :  { %1999 = vmatprep.subr.bf16.mxu1 %v2224_v40 }
  0x5a   :  { %1353 = vmatmul.mubr.bf16.gmra.mrb[28].mxu1 %v2223_v39  ;;  %1632 = vmatpush1.bf16.msra.mxu0 %v2243_v57 }
  0x5b   :  { %2000 = vmatpush3.bf16.msra.mxu1 %v2226_v42  ;;  %1458 = vmatprep.mubr.bf16.mxu1 %v2232_v47 }
  0x5c   :  { %2001 = vmatprep.subr.bf16.mxu1 %v2227_v43  ;;  %1633 = vmatprep.subr.bf16.mxu0 %v2300_v34 }
  0x5d   :  { %1548 = vmatmul.mubr.bf16.gmra.mrb[28].mxu0 %v2271_v16 }
  0x5e   :  { %1634 = vmatpush1.bf16.msra.mxu0 %v2249_v62  ;;  %1863 = vmatprep.mubr.msk.bf16.mxu0 %vm1218_vm0, %v2281_v24 }
  0x5f   :  { %2002 = vmatpush3.bf16.msra.mxu1 %v2229_v45  ;;  %1635 = vmatprep.subr.bf16.mxu0 %v2300_v34 }
  0x60   :  { %2067 = vmatprep.subr.bf16.mxu1 %v2233_v48 }
  0x62   :  { %1459 = vmatmul.mubr.bf16.vlgmr.msra.gmra.mrb[32].mxu1 %v2230_v46  ;;  %1636 = vmatpush1.bf16.msra.mxu0 %v2255_v3 }
  0x63   :  { %2068 = vmatpush3.bf16.msra.mxu1 %v2235_v50  ;;  %1466 = vmatprep.mubr.bf16.mxu1 %v2239_v54 }
  0x64   :  { %2069 = vmatprep.subr.bf16.mxu1 %v2236_v51  ;;  %1637 = vmatprep.subr.bf16.mxu0 %v2300_v34 }
  0x66   :  { %1638 = vmatpush1.bf16.msra.mxu0 %v2261_v8  ;;  %v1698_v8 = vld [vmem:[%s2864_s2] ss:$0 sm:$0xff] }
  0x67   :  { %2070 = vmatpush3.bf16.msra.mxu1 %v2238_v53  ;;  %1639 = vmatprep.subr.bf16.mxu0 %v2300_v34 }
  0x68   :  { %2071 = vmatprep.subr.bf16.mxu1 %v2242_v56 }
  0x6a   :  { %1467 = vmatmul.mubr.bf16.gmra.mrb[36].mxu1 %v2241_v55  ;;  %1640 = vmatpush1.bf16.msra.mxu0 %v2267_v13 }
  0x6b   :  { %2072 = vmatpush3.bf16.msra.mxu1 %v2246_v59  ;;  %1474 = vmatprep.mubr.bf16.mxu1 %v2251_v0 }
  0x6c   :  { %2073 = vmatprep.subr.bf16.mxu1 %v2248_v61  ;;  %1641 = vmatprep.subr.bf16.mxu0 %v2300_v34 }
  0x6e   :  { %1642 = vmatpush1.bf16.msra.mxu0 %v2273_v18 }
  0x6f   :  { %2074 = vmatpush3.bf16.msra.mxu1 %v2250_v63  ;;  %1643 = vmatprep.subr.bf16.mxu0 %v2300_v34  ;;  %v2297_v34 = vld [vmem:[%s2863_s0 + $0x184] ss:$56 sps:$4 sm:$0xff]  }
  0x70   :  { %2075 = vmatprep.subr.bf16.mxu1 %v2254_v2 }
  0x72   :  { %1475 = vmatmul.mubr.bf16.gmra.mrb[40].mxu1 %v2253_v1  ;;  %1644 = vmatpush1.bf16.msra.mxu0 %v2278_v22 }
  0x73   :  { %2076 = vmatpush3.bf16.msra.mxu1 %v2258_v5  ;;  %1482 = vmatprep.mubr.bf16.mxu1 %v2263_v10 }
  0x74   :  { %2077 = vmatprep.subr.bf16.mxu1 %v2260_v7 }
  0x75   :  { %1654 = vmatmul.mubr.bf16.vlgmr.msra.gmra.mrb[32].mxu0 %v2279_v23 }
  0x76   :  { %1864 = vmatprep.mubr.msk.bf16.mxu0 %vm1218_vm0, %v2285_v26 }
  0x77   :  { %2078 = vmatpush3.bf16.msra.mxu1 %v2262_v9 }
  0x78   :  { %2079 = vmatprep.subr.bf16.mxu1 %v2266_v12 }
  0x7a   :  { %1483 = vmatmul.mubr.bf16.gmra.mrb[44].mxu1 %v2265_v11 }
  0x7b   :  { %2080 = vmatpush3.bf16.msra.mxu1 %v2270_v15  ;;  %1588 = vmatprep.mubr.bf16.mxu1 %v2277_v21 }
  0x7c   :  { %2081 = vmatprep.subr.bf16.mxu1 %v2272_v17 }
  0x7d   :  { %1662 = vmatmul.mubr.bf16.gmra.mrb[36].mxu0 %v2287_v29 }
  0x7e   :  { %1865 = vmatprep.mubr.msk.bf16.mxu0 %vm1218_vm0, %v2291_v30 }
  0x7f   :  { %2082 = vmatpush3.bf16.msra.mxu1 %v2274_v19 }
  0x82   :  { %1589 = vmatmul.mubr.bf16.vlgmr.msra.gmra.mrb[48].mxu1 %v2275_v20 }
  0x83   :  { %1596 = vmatprep.mubr.bf16.mxu1 %v2282_v25 }
  0x85   :  { %1670 = vmatmul.mubr.bf16.gmra.mrb[40].mxu0 %v2293_v33 }
  0x86   :  { %1866 = vmatprep.mubr.msk.bf16.mxu0 %vm1218_vm0, %v2297_v34 }
  0x8a   :  { %1597 = vmatmul.mubr.bf16.gmra.mrb[52].mxu1 %v2284_v27 }
  0x8b   :  { %1604 = vmatprep.mubr.bf16.mxu1 %v2288_v28 }
  0x8d   :  { %1678 = vmatmul.mubr.bf16.gmra.mrb[44].mxu0 %v2299_v36 }
  0x92   :  { %1605 = vmatmul.mubr.bf16.gmra.mrb[56].mxu1 %v2290_v31 }
  0x93   :  { %1612 = vmatprep.mubr.bf16.mxu1 %v2294_v32 }
  0x9a   :  { %1613 = vmatmul.mubr.bf16.gmra.mrb[60].mxu1 %v2296_v35 }
  0xf5   :  { %v1883_v37 = vpop.f32.mrb[0].mxu1 }
  0xf6   :  { %v1884_v38 = vpop.f32.mrb[1].mxu1 }
  0xf7   :  { %v1885_v39 = vadd.f32 %v1884_v38, %v1883_v37  ;;  %v1886_v40 = vpop.f32.mrb[2].mxu1 }
  0xf8   :  { %v1887_v41 = vpop.f32.mrb[3].mxu1  ;;  %v1963_v51 = vpop.f32.mrb[0].mxu0 }
  0xf9   :  { %v1888_v42 = vadd.f32 %v1887_v41, %v1886_v40  ;;  %v1964_v54 = vpop.f32.mrb[1].mxu0  ;;  %v1266_v12 = vadd.f32 %v1885_v39, %v1698_v8 }
  0xfa   :  { %v1965_v56 = vadd.f32 %v1964_v54, %v1963_v51  ;;  %v1966_v57 = vpop.f32.mrb[2].mxu0 }
  0xfb   :  { %v1967_v59 = vpop.f32.mrb[3].mxu0  ;;  %v1269_v16 = vadd.f32 %v1888_v42, %v1698_v8 }
  0xfc   :  { %v1968_v60 = vadd.f32 %v1967_v59, %v1966_v57 }
  0xfd   :  { %v1889_v43 = vpop.f32.mrb[4].mxu1 }
  0xfe   :  { %v1890_v44 = vpop.f32.mrb[5].mxu1 }
  0xff   :  { %v1891_v45 = vadd.f32 %v1890_v44, %v1889_v43  ;;  %v1892_v46 = vpop.f32.mrb[6].mxu1 }
 0x100   :  { %v1893_v47 = vpop.f32.mrb[7].mxu1  ;;  %v1969_v2 = vpop.f32.mrb[4].mxu0 }
 0x101   :  { %v1894_v48 = vadd.f32 %v1893_v47, %v1892_v46  ;;  %v1970_v4 = vpop.f32.mrb[5].mxu0  ;;  %v1274_v30 = vadd.f32 %v1891_v45, %v1698_v8 }
 0x102   :  { %v1971_v5 = vadd.f32 %v1970_v4, %v1969_v2  ;;  %v1972_v6 = vpop.f32.mrb[6].mxu0 }
 0x103   :  { %v1973_v7 = vpop.f32.mrb[7].mxu0  ;;  %v1277_v34 = vadd.f32 %v1894_v48, %v1698_v8 }
 0x104   :  { %v1974_v9 = vadd.f32 %v1973_v7, %v1972_v6 }
 0x105   :  { %v1895_v49 = vpop.f32.mrb[8].mxu1 }
 0x106   :  { %v1896_v50 = vpop.f32.mrb[9].mxu1 }
 0x107   :  { %v1897_v52 = vadd.f32 %v1896_v50, %v1895_v49  ;;  %v1898_v53 = vpop.f32.mrb[10].mxu1 }
 0x108   :  { %v1899_v55 = vpop.f32.mrb[11].mxu1  ;;  %v1975_v19 = vpop.f32.mrb[8].mxu0 }
 0x109   :  { %v1900_v58 = vadd.f32 %v1899_v55, %v1898_v53  ;;  %v1976_v21 = vpop.f32.mrb[9].mxu0  ;;  %v1282_v50 = vadd.f32 %v1897_v52, %v1698_v8 }
 0x10a   :  { %v1977_v23 = vadd.f32 %v1976_v21, %v1975_v19  ;;  %v1978_v24 = vpop.f32.mrb[10].mxu0 }
 0x10b   :  { %v1979_v25 = vpop.f32.mrb[11].mxu0  ;;  %v1285_v54 = vadd.f32 %v1900_v58, %v1698_v8 }
 0x10c   :  { %v1980_v27 = vadd.f32 %v1979_v25, %v1978_v24 }
 0x10d   :  { %v1901_v61 = vpop.f32.mrb[12].mxu1 }
 0x10e   :  { %v1902_v62 = vpop.f32.mrb[13].mxu1 }
 0x10f   :  { %v2829_v63 = vadd.f32 %v1902_v62, %v1901_v61  ;;  %v1904_v0 = vpop.f32.mrb[14].mxu1 }
 0x110   :  { %v1905_v1 = vpop.f32.mrb[15].mxu1  ;;  %v1981_v38 = vpop.f32.mrb[12].mxu0 }
 0x111   :  { %v2831_v3 = vadd.f32 %v1905_v1, %v1904_v0  ;;  %v1982_v40 = vpop.f32.mrb[13].mxu0  ;;  %v1290_v6 = vadd.f32 %v2829_v63, %v1698_v8 }
 0x112   :  { %v1983_v41 = vadd.f32 %v1982_v40, %v1981_v38  ;;  %v1984_v42 = vpop.f32.mrb[14].mxu0 }
 0x113   :  { %v1985_v44 = vpop.f32.mrb[15].mxu0  ;;  %v1293_v58 = vadd.f32 %v2831_v3, %v1698_v8 }
 0x114   :  { %v1986_v46 = vadd.f32 %v1985_v44, %v1984_v42 }
 0x115   :  { %v1923_v10 = vpop.f32.mrb[16].mxu1 }
 0x116   :  { %v1924_v11 = vpop.f32.mrb[17].mxu1 }
 0x117   :  { %v1925_v13 = vadd.f32 %v1924_v11, %v1923_v10  ;;  %v1926_v14 = vpop.f32.mrb[18].mxu1 }
 0x118   :  { %v1927_v15 = vpop.f32.mrb[19].mxu1 }
 0x119   :  { %v1331_v17 = vadd.f32 %v1925_v13, %v1266_v12  ;;  %v1928_v18 = vadd.f32 %v1927_v15, %v1926_v14 }
 0x11b   :  { %v1334_v20 = vadd.f32 %v1928_v18, %v1269_v16  ;;  %v1396_v22 = vadd.f32 %v1965_v56, %v1331_v17  ;;  %v2043_v56 = vpop.f32.mrb[16].mxu0 }
 0x11c   :  { %v2044_v59 = vpop.f32.mrb[17].mxu0 }
 0x11d   :  { %v1399_v26 = vadd.f32 %v1968_v60, %v1334_v20  ;;  %v1929_v28 = vpop.f32.mrb[20].mxu1  ;;  %v2045_v61 = vadd.f32 %v2044_v59, %v2043_v56  ;;  %v2046_v62 = vpop.f32.mrb[18].mxu0 }
 0x11e   :  { %v1930_v29 = vpop.f32.mrb[21].mxu1  ;;  %v2047_v0 = vpop.f32.mrb[19].mxu0 }
 0x11f   :  { %v1931_v31 = vadd.f32 %v1930_v29, %v1929_v28  ;;  %v1932_v32 = vpop.f32.mrb[22].mxu1  ;;  %v2048_v2 = vadd.f32 %v2047_v0, %v2046_v62 }
 0x120   :  { %v1933_v33 = vpop.f32.mrb[23].mxu1  ;;  %v2049_v28 = vpop.f32.mrb[20].mxu0 }
 0x121   :  { %v1339_v35 = vadd.f32 %v1931_v31, %v1274_v30  ;;  %v1934_v36 = vadd.f32 %v1933_v33, %v1932_v32  ;;  %v2050_v8 = vpop.f32.mrb[21].mxu0 }
 0x122   :  { %v2051_v31 = vadd.f32 %v2050_v8, %v2049_v28  ;;  %v2052_v32 = vpop.f32.mrb[22].mxu0 }
 0x123   :  { %v1342_v37 = vadd.f32 %v1934_v36, %v1277_v34  ;;  %v1404_v39 = vadd.f32 %v1971_v5, %v1339_v35  ;;  %v2053_v35 = vpop.f32.mrb[23].mxu0 }
 0x124   :  { %v2054_v36 = vadd.f32 %v2053_v35, %v2052_v32 }
 0x125   :  { %v1407_v43 = vadd.f32 %v1974_v9, %v1342_v37  ;;  %v1935_v47 = vpop.f32.mrb[24].mxu1 }
 0x126   :  { %v1936_v49 = vpop.f32.mrb[25].mxu1 }
 0x127   :  { %v1937_v51 = vadd.f32 %v1936_v49, %v1935_v47  ;;  %v1938_v45 = vpop.f32.mrb[26].mxu1 }
 0x128   :  { %v1939_v53 = vpop.f32.mrb[27].mxu1  ;;  %v2055_v44 = vpop.f32.mrb[24].mxu0 }
 0x129   :  { %v1347_v55 = vadd.f32 %v1937_v51, %v1282_v50  ;;  %v1940_v48 = vadd.f32 %v1939_v53, %v1938_v45  ;;  %v2056_v47 = vpop.f32.mrb[25].mxu0 }
 0x12a   :  { %v2057_v51 = vadd.f32 %v2056_v47, %v2055_v44  ;;  %v2058_v45 = vpop.f32.mrb[26].mxu0 }
 0x12b   :  { %v1350_v57 = vadd.f32 %v1940_v48, %v1285_v54  ;;  %v1412_v60 = vadd.f32 %v1977_v23, %v1347_v55  ;;  %v2059_v53 = vpop.f32.mrb[27].mxu0 }
 0x12c   :  { %v2060_v55 = vadd.f32 %v2059_v53, %v2058_v45 }
 0x12d   :  { %v1415_v1 = vadd.f32 %v1980_v27, %v1350_v57  ;;  %v1941_v4 = vpop.f32.mrb[28].mxu1 }
 0x12e   :  { %v1942_v5 = vpop.f32.mrb[29].mxu1 }
 0x12f   :  { %v1943_v52 = vadd.f32 %v1942_v5, %v1941_v4  ;;  %v1944_v7 = vpop.f32.mrb[30].mxu1 }
 0x130   :  { %v1945_v9 = vpop.f32.mrb[31].mxu1 }
 0x131   :  { %v1355_v10 = vadd.f32 %v1943_v52, %v1290_v6  ;;  %v1946_v11 = vadd.f32 %v1945_v9, %v1944_v7 }
 0x133   :  { %v1358_v12 = vadd.f32 %v1946_v11, %v1293_v58  ;;  %v1420_v13 = vadd.f32 %v1983_v41, %v1355_v10 }
 0x135   :  { %v1423_v14 = vadd.f32 %v1986_v46, %v1358_v12  ;;  %v2003_v15 = vpop.f32.mrb[32].mxu1 }
 0x136   :  { %v2004_v16 = vpop.f32.mrb[33].mxu1 }
 0x137   :  { %v2005_v17 = vadd.f32 %v2004_v16, %v2003_v15  ;;  %v2006_v18 = vpop.f32.mrb[34].mxu1 }
 0x138   :  { %v2007_v19 = vpop.f32.mrb[35].mxu1 }
 0x139   :  { %v1461_v20 = vadd.f32 %v2005_v17, %v1396_v22  ;;  %v2008_v21 = vadd.f32 %v2007_v19, %v2006_v18 }
 0x13b   :  { %v1464_v23 = vadd.f32 %v2008_v21, %v1399_v26  ;;  %v1526_v24 = vadd.f32 %v2045_v61, %v1461_v20  ;;  %v2061_v61 = vpop.f32.mrb[28].mxu0 }
 0x13c   :  { %v2062_v0 = vpop.f32.mrb[29].mxu0 }
 0x13d   :  { %v2009_v63 = vpop.f32.mrb[36].mxu1  ;;  %v1529_v25 = vadd.f32 %v2048_v2, %v1464_v23  ;;  %v2063_v5 = vadd.f32 %v2062_v0, %v2061_v61  ;;  %v2064_v6 = vpop.f32.mrb[30].mxu0 }
 0x13e   :  { %v2010_v27 = vpop.f32.mrb[37].mxu1 }
 0x13f   :  { %v2011_v29 = vadd.f32 %v2010_v27, %v2009_v63  ;;  %v2012_v3 = vpop.f32.mrb[38].mxu1 }
 0x140   :  { %v2013_v30 = vpop.f32.mrb[39].mxu1 }
 0x141   :  { %v1469_v33 = vadd.f32 %v2011_v29, %v1404_v39  ;;  %v2014_v34 = vadd.f32 %v2013_v30, %v2012_v3 }
 0x143   :  { %v1472_v37 = vadd.f32 %v2014_v34, %v1407_v43  ;;  %v1534_v38 = vadd.f32 %v2051_v31, %v1469_v33 }
 0x145   :  { %v1537_v22 = vadd.f32 %v2054_v36, %v1472_v37  ;;  %v2015_v40 = vpop.f32.mrb[40].mxu1 }
 0x146   :  { %v2016_v26 = vpop.f32.mrb[41].mxu1 }
 0x147   :  { %v2017_v41 = vadd.f32 %v2016_v26, %v2015_v40  ;;  %v2018_v42 = vpop.f32.mrb[42].mxu1 }
 0x148   :  { %v2019_v46 = vpop.f32.mrb[43].mxu1 }
 0x149   :  { %v1477_v49 = vadd.f32 %v2017_v41, %v1412_v60  ;;  %v2020_v50 = vadd.f32 %v2019_v46, %v2018_v42  ;;  %v2065_v60 = vpop.f32.mrb[31].mxu0 }
 0x14a   :  { %v2066_v9 = vadd.f32 %v2065_v60, %v2064_v6  ;;  %v1655_v15 = vpop.f32.mrb[32].mxu0 }
 0x14b   :  { %v1480_v54 = vadd.f32 %v2020_v50, %v1415_v1  ;;  %v1542_v39 = vadd.f32 %v2057_v51, %v1477_v49  ;;  %v1657_v17 = vpop.f32.mrb[33].mxu0 }
 0x14c   :  { %v1658_v20 = vpop.f32.mrb[34].mxu0 }
 0x14d   :  { %v1545_v48 = vadd.f32 %v2060_v55, %v1480_v54  ;;  %v2021_v56 = vpop.f32.mrb[44].mxu1  ;;  %v1660_v21 = vpop.f32.mrb[35].mxu0 }
 0x14e   :  { %v2022_v43 = vpop.f32.mrb[45].mxu1 }
 0x14f   :  { %v2023_v57 = vadd.f32 %v2022_v43, %v2021_v56  ;;  %v2024_v59 = vpop.f32.mrb[46].mxu1 }
 0x150   :  { %v2025_v62 = vpop.f32.mrb[47].mxu1  ;;  %v1663_v3 = vpop.f32.mrb[36].mxu0 }
 0x151   :  { %v1485_v2 = vadd.f32 %v2023_v57, %v1420_v13  ;;  %v2026_v4 = vadd.f32 %v2025_v62, %v2024_v59 }
 0x153   :  { %v1488_v52 = vadd.f32 %v2026_v4, %v1423_v14  ;;  %v1550_v7 = vadd.f32 %v2063_v5, %v1485_v2 }
 0x155   :  { %v1553_v58 = vadd.f32 %v2066_v9, %v1488_v52  ;;  %v2083_v1 = vpop.f32.mrb[48].mxu1 }
 0x156   :  { %v2084_v10 = vpop.f32.mrb[49].mxu1 }
 0x157   :  { %v2085_v11 = vadd.f32 %v2084_v10, %v2083_v1  ;;  %v2086_v12 = vpop.f32.mrb[50].mxu1 }
 0x158   :  { %v2087_v16 = vpop.f32.mrb[51].mxu1 }
 0x159   :  { %v2088_v18 = vadd.f32 %v2087_v16, %v2086_v12  ;;  %v1591_v19 = vadd.f32 %v2085_v11, %v1526_v24  ;;  %v1665_v24 = vpop.f32.mrb[37].mxu0 }
 0x15a   :  { %v1666_v32 = vpop.f32.mrb[38].mxu0 }
 0x15b   :  { %v1656_v13 = vadd.f32 %v1655_v15, %v1591_v19  ;;  %v1594_v23 = vadd.f32 %v2088_v18, %v1529_v25  ;;  %v1668_v25 = vpop.f32.mrb[39].mxu0 }
 0x15c   :  { %v1671_v41 = vpop.f32.mrb[40].mxu0 }
 0x15d   :  { %1686 = vst [vmem:[%s2865_s3] sm:$0xff] %v1656_v13  ;;  %v1659_v14 = vadd.f32 %v1658_v20, %v1594_v23  ;;  %v2089_v63 = vpop.f32.mrb[52].mxu1 }
 0x15e   :  { %v2090_v27 = vpop.f32.mrb[53].mxu1 }
 0x15f   :  { %1687 = vst [vmem:[%s2865_s3 + $0x8] sm:$0xff] %v1659_v14  ;;  %v2091_v28 = vadd.f32 %v2090_v27, %v2089_v63  ;;  %v2092_v29 = vpop.f32.mrb[54].mxu1 }
 0x160   :  { %v2093_v8 = vpop.f32.mrb[55].mxu1 }
 0x161   :  { %v2094_v30 = vadd.f32 %v2093_v8, %v2092_v29  ;;  %v1599_v31 = vadd.f32 %v2091_v28, %v1534_v38  ;;  %v1673_v38 = vpop.f32.mrb[41].mxu0 }
 0x162   :  { %v1674_v47 = vpop.f32.mrb[42].mxu0 }
 0x163   :  { %v1664_v33 = vadd.f32 %v1663_v3, %v1599_v31  ;;  %v1602_v34 = vadd.f32 %v2094_v30, %v1537_v22  ;;  %v1676_v22 = vpop.f32.mrb[43].mxu0 }
 0x164   :  { %v1679_v56 = vpop.f32.mrb[44].mxu0 }
 0x165   :  { %1688 = vst [vmem:[%s2865_s3 + $0x10] sm:$0xff] %v1664_v33  ;;  %v1667_v35 = vadd.f32 %v1666_v32, %v1602_v34  ;;  %v2095_v36 = vpop.f32.mrb[56].mxu1 }
 0x166   :  { %v2096_v37 = vpop.f32.mrb[57].mxu1 }
 0x167   :  { %1689 = vst [vmem:[%s2865_s3 + $0x18] sm:$0xff] %v1667_v35  ;;  %v2097_v40 = vadd.f32 %v2096_v37, %v2095_v36  ;;  %v2098_v26 = vpop.f32.mrb[58].mxu1 }
 0x168   :  { %v2099_v42 = vpop.f32.mrb[59].mxu1 }
 0x169   :  { %v2100_v44 = vadd.f32 %v2099_v42, %v2098_v26  ;;  %v1607_v46 = vadd.f32 %v2097_v40, %v1542_v39  ;;  %v1681_v39 = vpop.f32.mrb[45].mxu0 }
 0x16a   :  { %v1682_v61 = vpop.f32.mrb[46].mxu0 }
 0x16b   :  { %v1672_v49 = vadd.f32 %v1671_v41, %v1607_v46  ;;  %v1610_v50 = vadd.f32 %v2100_v44, %v1545_v48  ;;  %v1684_v48 = vpop.f32.mrb[47].mxu0 }
 0x16d   :  { %1690 = vst [vmem:[%s2865_s3 + $0x20] sm:$0xff] %v1672_v49  ;;  %v1675_v51 = vadd.f32 %v1674_v47, %v1610_v50  ;;  %v2101_v45 = vpop.f32.mrb[60].mxu1 }
 0x16e   :  { %v2102_v53 = vpop.f32.mrb[61].mxu1 }
 0x16f   :  { %1691 = vst [vmem:[%s2865_s3 + $0x28] sm:$0xff] %v1675_v51  ;;  %v2103_v54 = vadd.f32 %v2102_v53, %v2101_v45  ;;  %v2104_v55 = vpop.f32.mrb[62].mxu1 }
 0x170   :  { %v2105_v43 = vpop.f32.mrb[63].mxu1 }
 0x171   :  { %v2106_v57 = vadd.f32 %v2105_v43, %v2104_v55  ;;  %v1615_v59 = vadd.f32 %v2103_v54, %v1550_v7 }
 0x173   :  { %v1680_v62 = vadd.f32 %v1679_v56, %v1615_v59  ;;  %v1618_v0 = vadd.f32 %v2106_v57, %v1553_v58 }
 0x175   :  { %1692 = vst [vmem:[%s2865_s3 + $0x30] sm:$0xff] %v1680_v62  ;;  %v1683_v2 = vadd.f32 %v1682_v61, %v1618_v0 }
 0x177   :  { %1693 = vst [vmem:[%s2865_s3 + $0x38] sm:$0xff] %v1683_v2 }

// kernel: simple_lstm_forward.9
= control target key start
LH: loop header
LB: loop body
LE: loop exit
PB: predicated region body
PF: predicated region fallthrough
CT: control target
= control target key end

     0   :  { %vm41_vm0 = vcmask 261120   ;;  %s327_s1 = inlined_call_operand.vmem [shape: f32[32,128], index: 1, kind: input, shape index: {}]   ;;  %s328_s0 = inlined_call_operand.vmem [shape: f32[64,32], index: 0, kind: input, shape index: {}]   ;;  %s329_s2 = inlined_call_operand.vmem [shape: f32[1,128], index: 2, kind: input, shape index: {}]   ;;  %s330_s3 = inlined_call_operand.vmem [shape: f32[64,128], index: 3, kind: output, shape index: {}]  }
   0x1   :  { %v30_v0 = vld [vmem:[%s327_s1] sm:$0xff]  ;;  %v31_v1 = vld [vmem:[%s327_s1 + $0x8] sm:$0xff]  ;;  %v32_v2 = vld [vmem:[%s327_s1 + $0x10] sm:$0xff] }
   0x2   :  { %v224_v3 = vpack.c.bf16 %v31_v1, %v30_v0  ;;  %v33_v4 = vld [vmem:[%s327_s1 + $0x18] sm:$0xff]  ;;  %v14_v5 = vld [vmem:[%s328_s0] sm:$0xff]  ;;  %v15_v10 = vld [vmem:[%s328_s0 + $0x8] sm:$0xff] }
   0x3   :  { %v18_v6 = vld [vmem:[%s328_s0 + $0x20] sm:$0xff]  ;;  %v228_v7 = vpack.c.bf16 %v33_v4, %v32_v2  ;;  %v22_v8 = vmax.f32 %v14_v5, 0.0  ;;  %v19_v11 = vld [vmem:[%s328_s0 + $0x28] sm:$0xff]  ;;  %v16_v12 = vld [vmem:[%s328_s0 + $0x10] sm:$0xff]  ;;  %v23_v14 = vmax.f32 %v15_v10, 0.0 }
   0x4   :  { %v26_v9 = vmax.f32 %v18_v6, 0.0  ;;  %225 = vmatprep.subr.bf16.mxu0 %v224_v3  ;;  %232 = vmatprep.subr.bf16.mxu1 %v224_v3  ;;  %v20_v13 = vld [vmem:[%s328_s0 + $0x30] sm:$0xff]  ;;  %v27_v15 = vmax.f32 %v19_v11, 0.0  ;;  %v24_v16 = vmax.f32 %v16_v12, 0.0  ;;  %v17_v18 = vld [vmem:[%s328_s0 + $0x18] sm:$0xff] }
   0x5   :  { %227 = vmatpush3.bf16.msra.mxu0 %v224_v3  ;;  %234 = vmatpush3.bf16.msra.mxu1 %v224_v3  ;;  %v28_v17 = vmax.f32 %v20_v13, 0.0  ;;  %v21_v19 = vld [vmem:[%s328_s0 + $0x38] sm:$0xff]  ;;  %v25_v20 = vmax.f32 %v17_v18, 0.0  ;;  %v183_v22 = vld [vmem:[%s329_s2] ss:$0 sm:$0xff] }
   0x6   :  { %229 = vmatprep.subr.bf16.mxu0 %v228_v7  ;;  %233 = vmatprep.subr.bf16.mxu1 %v228_v7  ;;  %v29_v21 = vmax.f32 %v21_v19, 0.0 }
   0x7   :  { %212 = vmatprep.mubr.msk.f32.mxu0 %vm41_vm0, %v22_v8  ;;  %218 = vmatprep.mubr.msk.f32.mxu1 %vm41_vm0, %v26_v9 }
   0x9   :  { %231 = vmatpush3.bf16.msra.mxu0 %v228_v7  ;;  %235 = vmatpush3.bf16.msra.mxu1 %v228_v7 }
   0xc   :  { %213 = vmatmul.mubr.msk.f32.vlgmr.msra.gmra.mrb[0].mxu0 %vm41_vm0, %v23_v14  ;;  %219 = vmatmul.mubr.msk.f32.vlgmr.msra.gmra.mrb[0].mxu1 %vm41_vm0, %v27_v15 }
   0xd   :  { %215 = vmatprep.mubr.msk.f32.mxu0 %vm41_vm0, %v24_v16  ;;  %221 = vmatprep.mubr.msk.f32.mxu1 %vm41_vm0, %v28_v17 }
  0x10   :  { %216 = vmatmul.mubr.msk.f32.gmra.mrb[2].mxu0 %vm41_vm0, %v25_v20  ;;  %222 = vmatmul.mubr.msk.f32.gmra.mrb[2].mxu1 %vm41_vm0, %v29_v21 }
  0xdf   :  { %v214_v23 = vpop.f32.mrb[0].mxu0  ;;  %v220_v24 = vpop.f32.mrb[0].mxu1 }
  0xe0   :  { %v138_v25 = vadd.f32 %v214_v23, %v183_v22  ;;  %v158_v26 = vadd.f32 %v220_v24, %v183_v22  ;;  %v132_v27 = vpop.f32.mrb[1].mxu0  ;;  %v152_v28 = vpop.f32.mrb[1].mxu1 }
  0xe1   :  { %v133_v29 = vadd.f32 %v183_v22, %v132_v27  ;;  %v153_v30 = vadd.f32 %v183_v22, %v152_v28 }
  0xe2   :  { %172 = vst [vmem:[%s330_s3 + $0x8] sm:$0xff] %v138_v25  ;;  %176 = vst [vmem:[%s330_s3 + $0x28] sm:$0xff] %v158_v26 }
  0xe3   :  { %171 = vst [vmem:[%s330_s3] sm:$0xff] %v133_v29  ;;  %175 = vst [vmem:[%s330_s3 + $0x20] sm:$0xff] %v153_v30  ;;  %v217_v31 = vpop.f32.mrb[2].mxu0  ;;  %v223_v32 = vpop.f32.mrb[2].mxu1 }
  0xe4   :  { %v148_v33 = vadd.f32 %v217_v31, %v183_v22  ;;  %v168_v34 = vadd.f32 %v223_v32, %v183_v22  ;;  %v142_v35 = vpop.f32.mrb[3].mxu0  ;;  %v162_v36 = vpop.f32.mrb[3].mxu1 }
  0xe5   :  { %v143_v37 = vadd.f32 %v183_v22, %v142_v35  ;;  %v163_v38 = vadd.f32 %v183_v22, %v162_v36 }
  0xe6   :  { %174 = vst [vmem:[%s330_s3 + $0x18] sm:$0xff] %v148_v33  ;;  %178 = vst [vmem:[%s330_s3 + $0x38] sm:$0xff] %v168_v34 }
  0xe7   :  { %173 = vst [vmem:[%s330_s3 + $0x10] sm:$0xff] %v143_v37  ;;  %177 = vst [vmem:[%s330_s3 + $0x30] sm:$0xff] %v163_v38 }

// kernel: simple_lstm_forward.8
= control target key start
LH: loop header
LB: loop body
LE: loop exit
PB: predicated region body
PF: predicated region fallthrough
CT: control target
= control target key end

     0   :  { %vm18_vm0 = vcmask 261120   ;;  %v1220_v0 = vmov 0.0|0.0   ;;  %vm1221_vm1 = vmmov 0   ;;  %v1222_v4 = vmov 0.0   ;;  %s1224_s21 = smov 64   ;;  %s1225_s22 = smov 32   ;;  %s1506_s2 = inlined_call_operand.vmem [shape: f32[32,128], index: 2, kind: input, shape index: {}]   ;;  %s1507_s0 = inlined_call_operand.vmem [shape: f32[8,8,128], index: 0, kind: input, shape index: {}]   ;;  %s1508_s1 = inlined_call_operand.vmem [shape: f32[8,8,1], index: 1, kind: input, shape index: {}]   ;;  %s1509_s3 = inlined_call_operand.vmem [shape: f32[8,8,32], index: 3, kind: output, shape index: {}]  }
   0x1   :  { %1131 = vmatprep.subr.bf16.mxu0 %v1220_v0  ;;  %v26_v1 = vld [vmem:[%s1506_s2] sm:$0xff]  ;;  %v27_v2 = vld [vmem:[%s1506_s2 + $0x8] sm:$0xff]  ;;  %v28_v3 = vld [vmem:[%s1506_s2 + $0x10] sm:$0xff]  ;;  %1051 = vmatprep.mubr.msk.f32.mxu0 %vm1221_vm1, %v1222_v4  ;;  %19 = vst.msk [vmem:[#allocation2] sm:$0xff] %vm18_vm0, %v1222_v4  ;;  %v21_v9 = vlaneseq  ;;  %v1223_v18 = vmov 0  }
   0x2   :  { %20 = vst.msk [vmem:[#allocation3] sm:$0xff] %vm18_vm0, %v1222_v4  ;;  %v1263_v5 = vpack.c.bf16 %v27_v2, %v26_v1  ;;  %v29_v6 = vld [vmem:[%s1506_s2 + $0x18] sm:$0xff]  ;;  %1137 = vmatprep.subr.bf16.mxu1 %v1220_v0  ;;  %1062 = vmatprep.mubr.msk.f32.mxu1 %vm1221_vm1, %v1222_v4  ;;  %v32_v11 = vld [vmem:[%s1507_s0] sm:$0xff]  ;;  %v975_v37 = vld [vmem:[%s1507_s0 + $0x8] sm:$0xff] }
   0x3   :  { %v1272_v7 = vpack.c.bf16 %v29_v6, %v28_v3  ;;  %v22_v10 = vand.u32 127, %v21_v9  ;;  %1186 = vset.pattern.permute.xlu1 %v1223_v18  ;;  %1187 = vset.pattern.permute.xlu0 %v1223_v18  ;;  %v140_v26 = vld [vmem:[%s1508_s1] sm:$0xff]  ;;  %v978_v47 = vld [vmem:[%s1508_s1 + $0x8] sm:$0xff]  ;;  %v979_v60 = vld [vmem:[%s1507_s0 + $0x10] sm:$0xff] }
   0x4   :  { %1133 = vmatpush3.bf16.msra.mxu0 %v1263_v5  ;;  %1139 = vmatpush3.bf16.msra.mxu1 %v1263_v5 }
   0x5   :  { %1134 = vmatprep.subr.bf16.mxu0 %v1220_v0  ;;  %1140 = vmatprep.subr.bf16.mxu1 %v1220_v0  ;;  %vm23_vm2 = vcmp.ge.s32.totalorder %v22_v10, 64  ;;  %vm24_vm3 = vcmp.lt.s32.totalorder %v22_v10, 96  ;;  %v982_v10 = vld [vmem:[%s1508_s1 + $0x10] sm:$0xff] }
   0x6   :  { %vm1291_vm4 = vmand %vm23_vm2, %vm24_vm3 }
   0x8   :  { %1136 = vmatpush3.bf16.msra.mxu0 %v1272_v7  ;;  %v30_v8 = vld [vmem:[#allocation2] sm:$0xff]  ;;  %1142 = vmatpush3.bf16.msra.mxu1 %v1272_v7 }
   0x9   :  { %1143 = vmatprep.subr.bf16.mxu0 %v1220_v0  ;;  %1149 = vmatprep.subr.bf16.mxu1 %v1220_v0  ;;  %v31_v23 = vld [vmem:[#allocation3] sm:$0xff] }
   0xb   :  { %1052 = vmatmul.mubr.msk.f32.vlgmr.msra.gmra.mrb[0].mxu0 %vm18_vm0, %v30_v8 }
   0xc   :  { %1145 = vmatpush3.bf16.msra.mxu0 %v1263_v5  ;;  %1073 = vmatprep.mubr.msk.f32.mxu0 %vm1221_vm1, %v1222_v4 }
   0xd   :  { %1146 = vmatprep.subr.bf16.mxu0 %v1220_v0 }
  0x10   :  { %1148 = vmatpush3.bf16.msra.mxu0 %v1272_v7 }
  0x11   :  { %1155 = vmatprep.subr.bf16.mxu0 %v1220_v0 }
  0xde   :  { %v103_v12 = vpop.f32.mrb[0].mxu0 }
  0xdf   :  { %v107_v13 = vadd.f32 %v103_v12, %v32_v11  ;;  %v1053_v14 = vpop.f32.mrb[1].mxu0 }
  0xe1   :  { %v108_v16 = vmul.f32 0.5, %v107_v13 }
  0xe3   :  { %v109_v17 = vsel %vm1291_vm4, %v107_v13, %v108_v16 }
  0xe4   :  { %1188 = vtanh.f32 %v109_v17 }
  0xee   :  { %v1189_v19 = vpop.eup %1188 }
  0xef   :  { %v111_v20 = vmul.f32 0.5, %v1189_v19 }
  0xf1   :  { %v112_v21 = vadd.f32 0.5, %v111_v20 }
  0xf3   :  { %v113_v22 = vsel %vm1291_vm4, %v1189_v19, %v112_v21 }
  0xf4   :  { %120 = vrot.lane.b32.xlu0 %v113_v22, %s1224_s21 }
  0xf8   :  { %115 = vrot.lane.b32.xlu0 %v31_v23, %s1225_s22 }
 0x166   :  { %v121_v24 = vpop.permute.xlu0 %120 }
 0x167   :  { %v123_v25 = vmul.f32 %v121_v24, %v113_v22  ;;  %v983_v24 = vld [vmem:[%s1507_s0 + $0x18] sm:$0xff] }
 0x169   :  { %125 = vrot.lane.b32.xlu1 %v123_v25, %s1225_s22 }
 0x16a   :  { %v116_v27 = vpop.permute.xlu0 %115 }
 0x16b   :  { %v118_v28 = vmul.f32 %v116_v27, %v113_v22 }
 0x16d   :  { %143 = vperm.xlu1 %1186, %v140_v26  }
 0x1db   :  { %v126_v29 = vpop.permute.xlu1 %125 }
 0x1dc   :  { %v128_v30 = vadd.f32 %v126_v29, %v118_v28 }
 0x1de   :  { %1190 = vtanh.f32 %v128_v30 }
 0x1e8   :  { %v1191_v31 = vpop.eup %1190 }
 0x1e9   :  { %131 = vrot.lane.b32.xlu0 %v1191_v31, %s1224_s21 }
 0x1ec   :  { %v144_v34 = vpop.permute.xlu1 %143 }
 0x1ed   :  { %v147_v50 = vmul.f32 %v144_v34, %v128_v30 }
 0x25b   :  { %v132_v32 = vpop.permute.xlu0 %131 }
 0x25c   :  { %v1306_v33 = vmul.f32 %v132_v32, %v113_v22 }
 0x25e   :  { %v146_v35 = vmul.f32 %v144_v34, %v1306_v33 }
 0x260   :  { %151 = vrot.lane.b32.xlu1 %v146_v35, %s1225_s22  ;;  %v986_v35 = vld [vmem:[%s1508_s1 + $0x18] sm:$0xff] }
 0x2d2   :  { %v152_v36 = vpop.permute.xlu1 %151 }
 0x2d3   :  { %1063 = vmatmul.mubr.msk.f32.vlgmr.msra.gmra.mrb[0].mxu1 %vm18_vm0, %v152_v36 }
 0x2d4   :  { %1151 = vmatpush3.bf16.msra.mxu1 %v1263_v5  ;;  %1084 = vmatprep.mubr.msk.f32.mxu1 %vm1221_vm1, %v1222_v4 }
 0x2d5   :  { %1152 = vmatprep.subr.bf16.mxu1 %v1220_v0 }
 0x2d8   :  { %1154 = vmatpush3.bf16.msra.mxu1 %v1272_v7 }
 0x2d9   :  { %1161 = vmatprep.subr.bf16.mxu1 %v1220_v0 }
 0x3a6   :  { %v221_v38 = vpop.f32.mrb[0].mxu1 }
 0x3a7   :  { %v225_v39 = vadd.f32 %v975_v37, %v221_v38  ;;  %v1064_v40 = vpop.f32.mrb[1].mxu1 }
 0x3a9   :  { %v226_v41 = vmul.f32 0.5, %v225_v39 }
 0x3ab   :  { %v227_v42 = vsel %vm1291_vm4, %v225_v39, %v226_v41 }
 0x3ac   :  { %1192 = vtanh.f32 %v227_v42 }
 0x3b6   :  { %v1193_v43 = vpop.eup %1192 }
 0x3b7   :  { %v229_v44 = vmul.f32 0.5, %v1193_v43 }
 0x3b9   :  { %v230_v45 = vadd.f32 0.5, %v229_v44 }
 0x3bb   :  { %v231_v46 = vsel %vm1291_vm4, %v1193_v43, %v230_v45 }
 0x3bc   :  { %234 = vrot.lane.b32.xlu0 %v231_v46, %s1224_s21  ;;  %v232_v51 = vmul.f32 %v231_v46, %v147_v50 }
 0x3c0   :  { %259 = vperm.xlu0 %1187, %v978_v47  }
 0x42e   :  { %v235_v48 = vpop.permute.xlu0 %234 }
 0x42f   :  { %v237_v49 = vmul.f32 %v235_v48, %v231_v46  ;;  %v987_v48 = vld [vmem:[%s1507_s0 + $0x20] sm:$0xff] }
 0x431   :  { %239 = vrot.lane.b32.xlu1 %v237_v49, %s1225_s22 }
 0x43f   :  { %v260_v57 = vpop.permute.xlu0 %259 }
 0x4a3   :  { %v240_v52 = vpop.permute.xlu1 %239 }
 0x4a4   :  { %v242_v53 = vadd.f32 %v240_v52, %v232_v51 }
 0x4a6   :  { %1194 = vtanh.f32 %v242_v53  ;;  %v263_v13 = vmul.f32 %v260_v57, %v242_v53 }
 0x4b0   :  { %v1195_v54 = vpop.eup %1194 }
 0x4b1   :  { %245 = vrot.lane.b32.xlu1 %v1195_v54, %s1224_s21 }
 0x523   :  { %v246_v55 = vpop.permute.xlu1 %245 }
 0x524   :  { %v1330_v56 = vmul.f32 %v246_v55, %v231_v46 }
 0x526   :  { %v262_v58 = vmul.f32 %v260_v57, %v1330_v56 }
 0x528   :  { %267 = vrot.lane.b32.xlu1 %v262_v58, %s1225_s22 }
 0x59a   :  { %v268_v59 = vpop.permute.xlu1 %267 }
 0x59b   :  { %1074 = vmatmul.mubr.msk.f32.vlgmr.msra.gmra.mrb[2].mxu0 %vm18_vm0, %v268_v59  ;;  %v990_v59 = vld [vmem:[%s1508_s1 + $0x20] sm:$0xff] }
 0x59c   :  { %1157 = vmatpush3.bf16.msra.mxu0 %v1263_v5  ;;  %1095 = vmatprep.mubr.msk.f32.mxu0 %vm1221_vm1, %v1222_v4 }
 0x59d   :  { %1158 = vmatprep.subr.bf16.mxu0 %v1220_v0 }
 0x5a0   :  { %1160 = vmatpush3.bf16.msra.mxu0 %v1272_v7 }
 0x5a1   :  { %1167 = vmatprep.subr.bf16.mxu0 %v1220_v0 }
 0x66e   :  { %v337_v61 = vpop.f32.mrb[2].mxu0 }
 0x66f   :  { %v341_v62 = vadd.f32 %v979_v60, %v337_v61  ;;  %v1075_v63 = vpop.f32.mrb[3].mxu0 }
 0x671   :  { %v342_v1 = vmul.f32 0.5, %v341_v62 }
 0x673   :  { %v343_v2 = vsel %vm1291_vm4, %v341_v62, %v342_v1 }
 0x674   :  { %1196 = vtanh.f32 %v343_v2 }
 0x67e   :  { %v1197_v3 = vpop.eup %1196 }
 0x67f   :  { %v345_v6 = vmul.f32 0.5, %v1197_v3 }
 0x681   :  { %v346_v8 = vadd.f32 0.5, %v345_v6 }
 0x683   :  { %v347_v9 = vsel %vm1291_vm4, %v1197_v3, %v346_v8 }
 0x684   :  { %350 = vrot.lane.b32.xlu0 %v347_v9, %s1224_s21  ;;  %v348_v14 = vmul.f32 %v347_v9, %v263_v13 }
 0x688   :  { %375 = vperm.xlu0 %1187, %v982_v10  }
 0x6f6   :  { %v351_v11 = vpop.permute.xlu0 %350 }
 0x6f7   :  { %v353_v12 = vmul.f32 %v351_v11, %v347_v9 }
 0x6f9   :  { %355 = vrot.lane.b32.xlu1 %v353_v12, %s1225_s22  ;;  %v991_v12 = vld [vmem:[%s1507_s0 + $0x28] sm:$0xff] }
 0x707   :  { %v376_v21 = vpop.permute.xlu0 %375 }
 0x76b   :  { %v356_v16 = vpop.permute.xlu1 %355 }
 0x76c   :  { %v358_v17 = vadd.f32 %v356_v16, %v348_v14 }
 0x76e   :  { %1198 = vtanh.f32 %v358_v17  ;;  %v379_v38 = vmul.f32 %v376_v21, %v358_v17 }
 0x778   :  { %v1199_v18 = vpop.eup %1198 }
 0x779   :  { %361 = vrot.lane.b32.xlu1 %v1199_v18, %s1224_s21 }
 0x7eb   :  { %v362_v19 = vpop.permute.xlu1 %361 }
 0x7ec   :  { %v1354_v20 = vmul.f32 %v362_v19, %v347_v9 }
 0x7ee   :  { %v378_v22 = vmul.f32 %v376_v21, %v1354_v20 }
 0x7f0   :  { %383 = vrot.lane.b32.xlu0 %v378_v22, %s1225_s22 }
 0x862   :  { %v384_v23 = vpop.permute.xlu0 %383 }
 0x863   :  { %1085 = vmatmul.mubr.msk.f32.vlgmr.msra.gmra.mrb[2].mxu1 %vm18_vm0, %v384_v23 }
 0x864   :  { %1163 = vmatpush3.bf16.msra.mxu1 %v1263_v5  ;;  %1106 = vmatprep.mubr.msk.f32.mxu1 %vm1221_vm1, %v1222_v4 }
 0x865   :  { %1164 = vmatprep.subr.bf16.mxu1 %v1220_v0 }
 0x868   :  { %1166 = vmatpush3.bf16.msra.mxu1 %v1272_v7 }
 0x869   :  { %1173 = vmatprep.subr.bf16.mxu1 %v1220_v0 }
 0x936   :  { %v453_v25 = vpop.f32.mrb[2].mxu1 }
 0x937   :  { %v457_v26 = vadd.f32 %v983_v24, %v453_v25  ;;  %v1086_v27 = vpop.f32.mrb[3].mxu1 }
 0x939   :  { %v458_v28 = vmul.f32 0.5, %v457_v26 }
 0x93b   :  { %v459_v29 = vsel %vm1291_vm4, %v457_v26, %v458_v28 }
 0x93c   :  { %1200 = vtanh.f32 %v459_v29 }
 0x946   :  { %v1201_v30 = vpop.eup %1200 }
 0x947   :  { %v461_v31 = vmul.f32 0.5, %v1201_v30 }
 0x949   :  { %v462_v32 = vadd.f32 0.5, %v461_v31 }
 0x94b   :  { %v463_v34 = vsel %vm1291_vm4, %v1201_v30, %v462_v32 }
 0x94c   :  { %466 = vrot.lane.b32.xlu1 %v463_v34, %s1224_s21  ;;  %v464_v39 = vmul.f32 %v463_v34, %v379_v38 }
 0x950   :  { %491 = vperm.xlu1 %1186, %v986_v35  }
 0x9be   :  { %v467_v36 = vpop.permute.xlu1 %466 }
 0x9bf   :  { %v469_v37 = vmul.f32 %v467_v36, %v463_v34 }
 0x9c1   :  { %471 = vrot.lane.b32.xlu0 %v469_v37, %s1225_s22 }
 0x9cf   :  { %v492_v45 = vpop.permute.xlu1 %491 }
 0xa33   :  { %v472_v40 = vpop.permute.xlu0 %471 }
 0xa34   :  { %v474_v41 = vadd.f32 %v472_v40, %v464_v39 }
 0xa36   :  { %1202 = vtanh.f32 %v474_v41  ;;  %v495_v62 = vmul.f32 %v492_v45, %v474_v41 }
 0xa40   :  { %v1203_v42 = vpop.eup %1202 }
 0xa41   :  { %477 = vrot.lane.b32.xlu0 %v1203_v42, %s1224_s21 }
 0xab3   :  { %v478_v43 = vpop.permute.xlu0 %477 }
 0xab4   :  { %v1378_v44 = vmul.f32 %v478_v43, %v463_v34  ;;  %v995_v34 = vld [vmem:[%s1507_s0 + $0x30] sm:$0xff] }
 0xab6   :  { %v494_v46 = vmul.f32 %v492_v45, %v1378_v44  ;;  %v998_v45 = vld [vmem:[%s1508_s1 + $0x30] sm:$0xff] }
 0xab8   :  { %499 = vrot.lane.b32.xlu1 %v494_v46, %s1225_s22 }
 0xb2a   :  { %v500_v47 = vpop.permute.xlu1 %499 }
 0xb2b   :  { %1096 = vmatmul.mubr.msk.f32.vlgmr.msra.gmra.mrb[4].mxu0 %vm18_vm0, %v500_v47 }
 0xb2c   :  { %1169 = vmatpush3.bf16.msra.mxu0 %v1263_v5  ;;  %1117 = vmatprep.mubr.msk.f32.mxu0 %vm1221_vm1, %v1222_v4 }
 0xb2d   :  { %1170 = vmatprep.subr.bf16.mxu0 %v1220_v0 }
 0xb30   :  { %1172 = vmatpush3.bf16.msra.mxu0 %v1272_v7 }
 0xbfe   :  { %v569_v49 = vpop.f32.mrb[4].mxu0 }
 0xbff   :  { %v573_v50 = vadd.f32 %v987_v48, %v569_v49  ;;  %v1097_v51 = vpop.f32.mrb[5].mxu0 }
 0xc01   :  { %v574_v52 = vmul.f32 0.5, %v573_v50 }
 0xc03   :  { %v575_v53 = vsel %vm1291_vm4, %v573_v50, %v574_v52 }
 0xc04   :  { %1204 = vtanh.f32 %v575_v53 }
 0xc0e   :  { %v1205_v54 = vpop.eup %1204 }
 0xc0f   :  { %v577_v55 = vmul.f32 0.5, %v1205_v54 }
 0xc11   :  { %v578_v57 = vadd.f32 0.5, %v577_v55 }
 0xc13   :  { %v579_v58 = vsel %vm1291_vm4, %v1205_v54, %v578_v57 }
 0xc14   :  { %582 = vrot.lane.b32.xlu0 %v579_v58, %s1224_s21  ;;  %v580_v63 = vmul.f32 %v579_v58, %v495_v62 }
 0xc18   :  { %607 = vperm.xlu0 %1187, %v990_v59   ;;  %v999_v59 = vld [vmem:[%s1507_s0 + $0x38] sm:$0xff] }
 0xc86   :  { %v583_v60 = vpop.permute.xlu0 %582 }
 0xc87   :  { %v585_v61 = vmul.f32 %v583_v60, %v579_v58 }
 0xc89   :  { %587 = vrot.lane.b32.xlu1 %v585_v61, %s1225_s22 }
 0xc97   :  { %v608_v9 = vpop.permute.xlu0 %607 }
 0xcfb   :  { %v588_v1 = vpop.permute.xlu1 %587 }
 0xcfc   :  { %v590_v2 = vadd.f32 %v588_v1, %v580_v63 }
 0xcfe   :  { %1206 = vtanh.f32 %v590_v2  ;;  %v611_v23 = vmul.f32 %v608_v9, %v590_v2 }
 0xd08   :  { %v1207_v3 = vpop.eup %1206 }
 0xd09   :  { %593 = vrot.lane.b32.xlu1 %v1207_v3, %s1224_s21 }
 0xd7b   :  { %v594_v6 = vpop.permute.xlu1 %593 }
 0xd7c   :  { %v1401_v8 = vmul.f32 %v594_v6, %v579_v58 }
 0xd7e   :  { %v610_v10 = vmul.f32 %v608_v9, %v1401_v8 }
 0xd80   :  { %615 = vrot.lane.b32.xlu0 %v610_v10, %s1225_s22  ;;  %v1002_v10 = vld [vmem:[%s1508_s1 + $0x38] sm:$0xff] }
 0xdf2   :  { %v616_v11 = vpop.permute.xlu0 %615 }
 0xdf3   :  { %1107 = vmatmul.mubr.msk.f32.vlgmr.msra.gmra.mrb[4].mxu1 %vm18_vm0, %v616_v11 }
 0xdf4   :  { %1175 = vmatpush3.bf16.msra.mxu1 %v1263_v5  ;;  %1128 = vmatprep.mubr.msk.f32.mxu1 %vm1221_vm1, %v1222_v4  ;;  %v994_v4 = vld [vmem:[%s1508_s1 + $0x28] sm:$0xff] }
 0xdf5   :  { %1176 = vmatprep.subr.bf16.mxu1 %v1220_v0 }
 0xdf8   :  { %1178 = vmatpush3.bf16.msra.mxu1 %v1272_v7 }
 0xec6   :  { %v685_v13 = vpop.f32.mrb[4].mxu1 }
 0xec7   :  { %v689_v14 = vadd.f32 %v991_v12, %v685_v13  ;;  %v1108_v16 = vpop.f32.mrb[5].mxu1 }
 0xec9   :  { %v690_v17 = vmul.f32 0.5, %v689_v14 }
 0xecb   :  { %v691_v18 = vsel %vm1291_vm4, %v689_v14, %v690_v17 }
 0xecc   :  { %1208 = vtanh.f32 %v691_v18 }
 0xed6   :  { %v1209_v5 = vpop.eup %1208 }
 0xed7   :  { %v693_v19 = vmul.f32 0.5, %v1209_v5 }
 0xed9   :  { %v694_v21 = vadd.f32 0.5, %v693_v19 }
 0xedb   :  { %v695_v0 = vsel %vm1291_vm4, %v1209_v5, %v694_v21 }
 0xedc   :  { %698 = vrot.lane.b32.xlu1 %v695_v0, %s1224_s21  ;;  %v696_v24 = vmul.f32 %v695_v0, %v611_v23 }
 0xee0   :  { %723 = vperm.xlu1 %1186, %v994_v4  }
 0xf4e   :  { %v699_v7 = vpop.permute.xlu1 %698 }
 0xf4f   :  { %v701_v22 = vmul.f32 %v699_v7, %v695_v0 }
 0xf51   :  { %703 = vrot.lane.b32.xlu0 %v701_v22, %s1225_s22 }
 0xf5f   :  { %v724_v30 = vpop.permute.xlu1 %723 }
 0xfc3   :  { %v704_v25 = vpop.permute.xlu0 %703 }
 0xfc4   :  { %v706_v26 = vadd.f32 %v704_v25, %v696_v24 }
 0xfc6   :  { %1210 = vtanh.f32 %v706_v26  ;;  %v727_v48 = vmul.f32 %v724_v30, %v706_v26 }
 0xfd0   :  { %v1211_v27 = vpop.eup %1210 }
 0xfd1   :  { %709 = vrot.lane.b32.xlu0 %v1211_v27, %s1224_s21 }
0x1043   :  { %v710_v28 = vpop.permute.xlu0 %709 }
0x1044   :  { %v1424_v29 = vmul.f32 %v710_v28, %v695_v0 }
0x1046   :  { %v726_v31 = vmul.f32 %v724_v30, %v1424_v29 }
0x1048   :  { %731 = vrot.lane.b32.xlu1 %v726_v31, %s1225_s22 }
0x10ba   :  { %v732_v32 = vpop.permute.xlu1 %731 }
0x10bb   :  { %1118 = vmatmul.mubr.msk.f32.vlgmr.msra.gmra.mrb[6].mxu0 %vm18_vm0, %v732_v32 }
0x118e   :  { %v801_v35 = vpop.f32.mrb[6].mxu0 }
0x118f   :  { %v805_v36 = vadd.f32 %v995_v34, %v801_v35  ;;  %v1119_v37 = vpop.f32.mrb[7].mxu0 }
0x1191   :  { %v806_v38 = vmul.f32 0.5, %v805_v36 }
0x1193   :  { %v807_v39 = vsel %vm1291_vm4, %v805_v36, %v806_v38 }
0x1194   :  { %1212 = vtanh.f32 %v807_v39 }
0x119e   :  { %v1213_v40 = vpop.eup %1212 }
0x119f   :  { %v809_v41 = vmul.f32 0.5, %v1213_v40 }
0x11a1   :  { %v810_v42 = vadd.f32 0.5, %v809_v41 }
0x11a3   :  { %v811_v43 = vsel %vm1291_vm4, %v1213_v40, %v810_v42 }
0x11a4   :  { %814 = vrot.lane.b32.xlu0 %v811_v43, %s1224_s21  ;;  %v812_v49 = vmul.f32 %v811_v43, %v727_v48 }
0x11a8   :  { %839 = vperm.xlu0 %1187, %v998_v45  }
0x1216   :  { %v815_v46 = vpop.permute.xlu0 %814 }
0x1217   :  { %v817_v47 = vmul.f32 %v815_v46, %v811_v43 }
0x1219   :  { %819 = vrot.lane.b32.xlu1 %v817_v47, %s1225_s22 }
0x1227   :  { %v840_v55 = vpop.permute.xlu0 %839 }
0x128b   :  { %v820_v50 = vpop.permute.xlu1 %819 }
0x128c   :  { %v822_v51 = vadd.f32 %v820_v50, %v812_v49 }
0x128e   :  { %1214 = vtanh.f32 %v822_v51  ;;  %v843_v14 = vmul.f32 %v840_v55, %v822_v51 }
0x1298   :  { %v1215_v52 = vpop.eup %1214 }
0x1299   :  { %825 = vrot.lane.b32.xlu1 %v1215_v52, %s1224_s21 }
0x130b   :  { %v826_v53 = vpop.permute.xlu1 %825 }
0x130c   :  { %v828_v54 = vmul.f32 %v826_v53, %v811_v43 }
0x130e   :  { %v842_v57 = vmul.f32 %v840_v55, %v828_v54 }
0x1310   :  { %847 = vrot.lane.b32.xlu0 %v842_v57, %s1225_s22 }
0x1382   :  { %v848_v58 = vpop.permute.xlu0 %847 }
0x1383   :  { %1129 = vmatmul.mubr.msk.f32.vlgmr.msra.gmra.mrb[6].mxu1 %vm18_vm0, %v848_v58 }
0x1456   :  { %v917_v60 = vpop.f32.mrb[6].mxu1 }
0x1457   :  { %v921_v61 = vadd.f32 %v999_v59, %v917_v60  ;;  %v1130_v62 = vpop.f32.mrb[7].mxu1 }
0x1459   :  { %v922_v63 = vmul.f32 0.5, %v921_v61 }
0x145b   :  { %v923_v1 = vsel %vm1291_vm4, %v921_v61, %v922_v63 }
0x145c   :  { %1216 = vtanh.f32 %v923_v1 }
0x1466   :  { %v1217_v2 = vpop.eup %1216 }
0x1467   :  { %v925_v3 = vmul.f32 0.5, %v1217_v2 }
0x1469   :  { %v926_v6 = vadd.f32 0.5, %v925_v3 }
0x146b   :  { %v927_v9 = vsel %vm1291_vm4, %v1217_v2, %v926_v6 }
0x146c   :  { %930 = vrot.lane.b32.xlu1 %v927_v9, %s1224_s21  ;;  %v928_v16 = vmul.f32 %v927_v9, %v843_v14 }
0x1470   :  { %955 = vperm.xlu1 %1186, %v1002_v10  }
0x1474   :  { %136 = vrot.lane.b32.xlu1 %v1306_v33, %s1225_s22 }
0x1478   :  { %366 = vrot.lane.b32.xlu1 %v1354_v20, %s1225_s22 }
0x147c   :  { %598 = vrot.lane.b32.xlu1 %v1401_v8, %s1225_s22 }
0x1480   :  { %830 = vrot.lane.b32.xlu1 %v828_v54, %s1225_s22 }
0x14de   :  { %v931_v15 = vpop.permute.xlu1 %930 }
0x14df   :  { %v933_v11 = vmul.f32 %v931_v15, %v927_v9 }
0x14e1   :  { %935 = vrot.lane.b32.xlu0 %v933_v11, %s1225_s22 }
0x14ef   :  { %v956_v12 = vpop.permute.xlu1 %955 }
0x14f3   :  { %v137_v13 = vpop.permute.xlu1 %136 }
0x14f4   :  { %139 = vst.msk [vmem:[%s1509_s3] sm:$0xff] %vm18_vm0, %v137_v13 }
0x14f7   :  { %v367_v33 = vpop.permute.xlu1 %366 }
0x14f8   :  { %981 = vst.msk [vmem:[%s1509_s3 + $0x10] sm:$0xff] %vm18_vm0, %v367_v33 }
0x14fb   :  { %v599_v20 = vpop.permute.xlu1 %598 }
0x14fc   :  { %989 = vst.msk [vmem:[%s1509_s3 + $0x20] sm:$0xff] %vm18_vm0, %v599_v20 }
0x14ff   :  { %v831_v8 = vpop.permute.xlu1 %830 }
0x1500   :  { %997 = vst.msk [vmem:[%s1509_s3 + $0x30] sm:$0xff] %vm18_vm0, %v831_v8 }
0x1553   :  { %v936_v17 = vpop.permute.xlu0 %935 }
0x1554   :  { %v938_v18 = vadd.f32 %v936_v17, %v928_v16 }
0x1556   :  { %1218 = vtanh.f32 %v938_v18  ;;  %v959_v7 = vmul.f32 %v956_v12, %v938_v18 }
0x1560   :  { %v1219_v5 = vpop.eup %1218 }
0x1561   :  { %941 = vrot.lane.b32.xlu0 %v1219_v5, %s1224_s21  ;;  %s1226_s21 = smov 96  }
0x1565   :  { %250 = vrot.lane.b32.xlu0 %v1330_v56, %s1225_s22 }
0x1569   :  { %482 = vrot.lane.b32.xlu0 %v1378_v44, %s1225_s22 }
0x156d   :  { %714 = vrot.lane.b32.xlu0 %v1424_v29, %s1225_s22 }
0x15d3   :  { %v942_v19 = vpop.permute.xlu0 %941 }
0x15d4   :  { %v944_v21 = vmul.f32 %v942_v19, %v927_v9 }
0x15d6   :  { %v958_v0 = vmul.f32 %v956_v12, %v944_v21  ;;  %946 = vrot.lane.b32.xlu0 %v944_v21, %s1225_s22 }
0x15d7   :  { %v251_v4 = vpop.permute.xlu0 %250 }
0x15d8   :  { %977 = vst.msk [vmem:[%s1509_s3 + $0x8] sm:$0xff] %vm18_vm0, %v251_v4  ;;  %961 = vrot.lane.b32.xlu1 %v958_v0, %s1225_s22 }
0x15da   :  { %966 = vrot.lane.b32.xlu0 %v959_v7, %s1226_s21 }
0x15db   :  { %v483_v56 = vpop.permute.xlu0 %482 }
0x15dc   :  { %985 = vst.msk [vmem:[%s1509_s3 + $0x18] sm:$0xff] %vm18_vm0, %v483_v56 }
0x15df   :  { %v715_v44 = vpop.permute.xlu0 %714 }
0x15e0   :  { %993 = vst.msk [vmem:[%s1509_s3 + $0x28] sm:$0xff] %vm18_vm0, %v715_v44 }
0x1648   :  { %v947_v22 = vpop.permute.xlu0 %946 }
0x1649   :  { %1001 = vst.msk [vmem:[%s1509_s3 + $0x38] sm:$0xff] %vm18_vm0, %v947_v22 }
0x164a   :  { %v962_v23 = vpop.permute.xlu1 %961 }
0x164b   :  { %964 = vst.msk [vmem:[#allocation2] sm:$0xff] %vm18_vm0, %v962_v23 }
0x164c   :  { %v967_v24 = vpop.permute.xlu0 %966 }
0x164d   :  { %969 = vst.msk [vmem:[#allocation3] sm:$0xff] %vm18_vm0, %v967_v24 }

</bundles_post_ra>
